<compile_context>
chip_gen: v7x
topology: tpu7x:2x2x1
jax: 0.10.0
libtpu: 0.0.40
codegen_flags: <defaults>
</compile_context>

<pallas_src>
import jax
import jax.numpy as jnp
from jax.experimental import pallas as pl
from jax.experimental.pallas import tpu as pltpu


# ----------------------------- Pallas kernel ------------------------------ #
def _build_fused_kernel(T, B, E, H):
    """Fused embedding -> encoder(2) -> broadcast -> decoder(2) kernel.

    Kernel refs (in order): token ids (SMEM, (B*T,)), embedding table (V, E),
    then 4x (w_ih, w_hh, bias) for encoder L0, encoder L1, decoder L0,
    decoder L1, then the two outputs (decoded, embedded) as batch-major flat
    (B*T, E), then three VMEM scratch sequence buffers.
    """
    f32 = jnp.float32

    def kernel(tok_ref, emb_ref,
               e0_wih, e0_whh, e0_b,
               e1_wih, e1_whh, e1_b,
               d0_wih, d0_whh, d0_b,
               d1_wih, d1_whh, d1_b,
               dec_ref, embo_ref,
               xtm_ref, act_ref, mid_ref):

        # ---------- fused embedding lookup (replaces XLA gather+transpose) --
        # For every (b, t): read the id from SMEM, copy that embedding row to
        #   * the batch-major `embedded` output at row b*T + t, and
        #   * the time-major VMEM scratch at row t*B + b (encoder input).
        for b in range(B):
            for t in range(T):
                s = tok_ref[b * T + t]                          # SMEM scalar
                row = emb_ref[pl.ds(s, 1), :]                   # (1, E)
                embo_ref[pl.ds(b * T + t, 1), :] = row
                xtm_ref[pl.ds(t * B + b, 1), :] = row

        # ------------------ LSTM cell, fully unrolled over T ----------------
        def run_layer(pre_at, w_hh_ref, hs, store_fn):
            """pre_at(t) -> (B, 4*hs) input-path pre-activation (bias already
            included; hoisted out of the loop).  Returns the final hidden
            state; store_fn(t, h), if given, records each step's hidden."""
            h = jnp.zeros((B, hs), f32)
            c = jnp.zeros((B, hs), f32)
            for t in range(T):                       # static unroll, T small
                gates = pre_at(t) + jnp.dot(h, w_hh_ref[...],
                                            preferred_element_type=f32)
                sig = jax.nn.sigmoid(gates)          # 1 EUP pass over 4 gates
                tnh = jnp.tanh(gates)                # 1 EUP pass over 4 gates
                i = sig[:, 0 * hs:1 * hs]
                f = sig[:, 1 * hs:2 * hs]
                o = sig[:, 3 * hs:4 * hs]
                g = tnh[:, 2 * hs:3 * hs]
                c = f * c + i * g
                h = o * jnp.tanh(c)
                if store_fn is not None:
                    store_fn(t, h)
            return h

        def store_time_major(out_ref):
            def fn(t, h):
                out_ref[pl.ds(t * B, B), :] = h
            return fn

        def store_batch_major(out_ref):
            def fn(t, h):
                for b in range(B):                   # static row scatter
                    out_ref[pl.ds(b * T + t, 1), :] = h[b:b + 1, :]
            return fn

        # ---- encoder layer 0: input projection hoisted over full sequence --
        x = xtm_ref[...]                                             # (T*B, E)
        p0 = jnp.dot(x, e0_wih[...], preferred_element_type=f32) + e0_b[...]
        run_layer(lambda t: p0[t * B:(t + 1) * B, :], e0_whh, H,
                  store_time_major(act_ref))

        # ---- encoder layer 1: only its final hidden state is needed --------
        a0 = act_ref[...]                                            # (T*B, H)
        p1 = jnp.dot(a0, e1_wih[...], preferred_element_type=f32) + e1_b[...]
        enc_last = run_layer(lambda t: p1[t * B:(t + 1) * B, :],
                             e1_whh, H, None)                        # (B, H)

        # ---- decoder layer 0: constant input (enc_last) -> project ONCE ----
        q0 = jnp.dot(enc_last, d0_wih[...],
                     preferred_element_type=f32) + d0_b[...]         # (B, 4E)
        run_layer(lambda t: q0, d0_whh, E, store_time_major(mid_ref))

        # ---- decoder layer 1: final sequence, scattered to batch-major -----
        m0 = mid_ref[...]                                            # (T*B, E)
        q1 = jnp.dot(m0, d1_wih[...], preferred_element_type=f32) + d1_b[...]
        run_layer(lambda t: q1[t * B:(t + 1) * B, :], d1_whh, E,
                  store_batch_major(dec_ref))

    return kernel


# ------------------------------ model wrapper ------------------------------ #
def init_params(key, vocab=22, res_emb_dim=8, hidden_size=32, num_layers=2):
    keys = iter(jax.random.split(key, 64))

    def lstm_params(d_in, h):
        w_ih = 0.2 * jax.random.normal(next(keys), (d_in, 4 * h), jnp.float32)
        w_hh = 0.2 * jax.random.normal(next(keys), (h, 4 * h), jnp.float32)
        bias = 0.05 * jax.random.normal(next(keys), (4 * h,), jnp.float32)
        return (w_ih, w_hh, bias)

    enc, dec = [], []
    for l in range(num_layers):
        enc.append(lstm_params(res_emb_dim if l == 0 else hidden_size, hidden_size))
    for l in range(num_layers):
        dec.append(lstm_params(hidden_size if l == 0 else res_emb_dim, res_emb_dim))

    emb = jax.random.normal(next(keys), (vocab, res_emb_dim), jnp.float32)
    return {"embedding": emb, "encoder": enc, "decoder": dec}


def gapped_seq2vec_forward(tokens, params):
    """tokens: (B, T) int32 in [0, 22). Returns (decoded (B,T,E), embedded (B,T,E))."""
    B, T = tokens.shape
    emb_tbl = params["embedding"]
    E = emb_tbl.shape[1]
    H = params["encoder"][0][1].shape[0]
    assert len(params["encoder"]) == 2 and len(params["decoder"]) == 2

    flat_w = []
    for (w_ih, w_hh, b) in list(params["encoder"]) + list(params["decoder"]):
        flat_w.extend([w_ih, w_hh, b.reshape(1, -1)])

    tok_flat = tokens.reshape(B * T).astype(jnp.int32)          # bitcast-only

    vmem = pltpu.MemorySpace.VMEM
    smem = pltpu.MemorySpace.SMEM
    in_specs = ([pl.BlockSpec(memory_space=smem)]
                + [pl.BlockSpec(memory_space=vmem)] * (1 + len(flat_w)))

    dec_flat, emb_flat = pl.pallas_call(
        _build_fused_kernel(T, B, E, H),
        out_shape=(jax.ShapeDtypeStruct((B * T, E), jnp.float32),
                   jax.ShapeDtypeStruct((B * T, E), jnp.float32)),
        in_specs=in_specs,
        out_specs=(pl.BlockSpec(memory_space=vmem),
                   pl.BlockSpec(memory_space=vmem)),
        scratch_shapes=[
            pltpu.VMEM((T * B, E), jnp.float32),   # time-major embedded seq
            pltpu.VMEM((T * B, H), jnp.float32),   # encoder layer-0 outputs
            pltpu.VMEM((T * B, E), jnp.float32),   # decoder layer-0 outputs
        ],
    )(tok_flat, emb_tbl, *flat_w)

    decoded = dec_flat.reshape(B, T, E)     # row-major: free reshape
    embedded = emb_flat.reshape(B, T, E)    # row-major: free reshape
    return decoded, embedded


# ------------------------------- pure-JAX ref ------------------------------ #
def _ref_lstm_layer(x_tbd, w_ih, w_hh, b):
    T, B, _ = x_tbd.shape
    H = w_hh.shape[0]

    def step(carry, x_t):
        h, c = carry
        gates = x_t @ w_ih + h @ w_hh + b
        i = jax.nn.sigmoid(gates[:, :H])
        f = jax.nn.sigmoid(gates[:, H:2 * H])
        g = jnp.tanh(gates[:, 2 * H:3 * H])
        o = jax.nn.sigmoid(gates[:, 3 * H:])
        c = f * c + i * g
        h = o * jnp.tanh(c)
        return (h, c), h

    init = (jnp.zeros((B, H), jnp.float32), jnp.zeros((B, H), jnp.float32))
    _, ys = jax.lax.scan(step, init, x_tbd)
    return ys


def _ref_forward(tokens, params):
    emb = params["embedding"][tokens]
    x = jnp.transpose(emb, (1, 0, 2))
    h = x
    for layer in params["encoder"]:
        h = _ref_lstm_layer(h, *layer)
    enc_last = h[-1]
    T = x.shape[0]
    d = jnp.broadcast_to(enc_last[None], (T,) + enc_last.shape)
    for layer in params["decoder"]:
        d = _ref_lstm_layer(d, *layer)
    return jnp.transpose(d, (1, 0, 2)), emb


# ---------------------------------- main ----------------------------------- #
if __name__ == "__main__":
    key = jax.random.PRNGKey(0)
    k_tok, k_par = jax.random.split(key)

    B, T = 4, 8
    VOCAB, E, H, L = 22, 8, 32, 2

    tokens = jax.random.randint(k_tok, (B, T), 0, VOCAB, dtype=jnp.int32)
    params = init_params(k_par, vocab=VOCAB, res_emb_dim=E, hidden_size=H,
                         num_layers=L)

    fwd = jax.jit(gapped_seq2vec_forward)
    decoded, embedded = fwd(tokens, params)
    decoded = jax.block_until_ready(decoded)
    embedded = jax.block_until_ready(embedded)

    ref_dec, ref_emb = _ref_forward(tokens, params)
    assert decoded.shape == (B, T, E) and embedded.shape == (B, T, E)
    assert jnp.allclose(decoded, ref_dec, atol=2e-3, rtol=2e-3)
    assert jnp.allclose(embedded, ref_emb)

    print("KERNEL_OK")
</pallas_src>

<mosaic_0001>
module attributes {stable_mosaic.version = 11 : i64} {
  func.func @kernel(%arg0: memref<32xi32, #tpu.memory_space<smem>>, %arg1: memref<22x8xf32, #tpu.memory_space<vmem>>, %arg2: memref<8x128xf32, #tpu.memory_space<vmem>>, %arg3: memref<32x128xf32, #tpu.memory_space<vmem>>, %arg4: memref<1x128xf32, #tpu.memory_space<vmem>>, %arg5: memref<32x128xf32, #tpu.memory_space<vmem>>, %arg6: memref<32x128xf32, #tpu.memory_space<vmem>>, %arg7: memref<1x128xf32, #tpu.memory_space<vmem>>, %arg8: memref<32x32xf32, #tpu.memory_space<vmem>>, %arg9: memref<8x32xf32, #tpu.memory_space<vmem>>, %arg10: memref<1x32xf32, #tpu.memory_space<vmem>>, %arg11: memref<8x32xf32, #tpu.memory_space<vmem>>, %arg12: memref<8x32xf32, #tpu.memory_space<vmem>>, %arg13: memref<1x32xf32, #tpu.memory_space<vmem>>, %arg14: memref<32x8xf32, #tpu.memory_space<vmem>>, %arg15: memref<32x8xf32, #tpu.memory_space<vmem>>, %arg16: memref<32x8xf32, #tpu.memory_space<vmem>>, %arg17: memref<32x32xf32, #tpu.memory_space<vmem>>, %arg18: memref<32x8xf32, #tpu.memory_space<vmem>>) attributes {dimension_semantics = [], scalar_prefetch = 0 : i64, scratch_operands = 3 : i64, tpu.core_type = #tpu.core_type<tc>} {
    %c0 = arith.constant 0 : index
    %0 = memref.load %arg0[%c0] : memref<32xi32, #tpu.memory_space<smem>>
    %1 = arith.index_cast %0 : i32 to index
    %c0_0 = arith.constant 0 : index
    %2 = vector.load %arg1[%1, %c0_0] : memref<22x8xf32, #tpu.memory_space<vmem>>, vector<1x8xf32>
    %c0_1 = arith.constant 0 : index
    %c0_2 = arith.constant 0 : index
    %3 = vector.load %arg15[%c0_1, %c0_2] : memref<32x8xf32, #tpu.memory_space<vmem>>, vector<1x8xf32>
    tpu.vector_store %arg15[%c0_1, %c0_2], %2 {strides = array<i32>} : memref<32x8xf32, #tpu.memory_space<vmem>>, vector<1x8xf32>,
    %c0_3 = arith.constant 0 : index
    %c0_4 = arith.constant 0 : index
    %4 = vector.load %arg16[%c0_3, %c0_4] : memref<32x8xf32, #tpu.memory_space<vmem>>, vector<1x8xf32>
    tpu.vector_store %arg16[%c0_3, %c0_4], %2 {strides = array<i32>} : memref<32x8xf32, #tpu.memory_space<vmem>>, vector<1x8xf32>,
    %c1 = arith.constant 1 : index
    %5 = memref.load %arg0[%c1] : memref<32xi32, #tpu.memory_space<smem>>
    %6 = arith.index_cast %5 : i32 to index
    %c0_5 = arith.constant 0 : index
    %7 = vector.load %arg1[%6, %c0_5] : memref<22x8xf32, #tpu.memory_space<vmem>>, vector<1x8xf32>
    %c1_6 = arith.constant 1 : index
    %c0_7 = arith.constant 0 : index
    %8 = vector.load %arg15[%c1_6, %c0_7] : memref<32x8xf32, #tpu.memory_space<vmem>>, vector<1x8xf32>
    tpu.vector_store %arg15[%c1_6, %c0_7], %7 {strides = array<i32>} : memref<32x8xf32, #tpu.memory_space<vmem>>, vector<1x8xf32>,
    %c4 = arith.constant 4 : index
    %c0_8 = arith.constant 0 : index
    %9 = vector.load %arg16[%c4, %c0_8] : memref<32x8xf32, #tpu.memory_space<vmem>>, vector<1x8xf32>
    tpu.vector_store %arg16[%c4, %c0_8], %7 {strides = array<i32>} : memref<32x8xf32, #tpu.memory_space<vmem>>, vector<1x8xf32>,
    %c2 = arith.constant 2 : index
    %10 = memref.load %arg0[%c2] : memref<32xi32, #tpu.memory_space<smem>>
    %11 = arith.index_cast %10 : i32 to index
    %c0_9 = arith.constant 0 : index
    %12 = vector.load %arg1[%11, %c0_9] : memref<22x8xf32, #tpu.memory_space<vmem>>, vector<1x8xf32>
    %c2_10 = arith.constant 2 : index
    %c0_11 = arith.constant 0 : index
    %13 = vector.load %arg15[%c2_10, %c0_11] : memref<32x8xf32, #tpu.memory_space<vmem>>, vector<1x8xf32>
    tpu.vector_store %arg15[%c2_10, %c0_11], %12 {strides = array<i32>} : memref<32x8xf32, #tpu.memory_space<vmem>>, vector<1x8xf32>,
    %c8 = arith.constant 8 : index
    %c0_12 = arith.constant 0 : index
    %14 = vector.load %arg16[%c8, %c0_12] : memref<32x8xf32, #tpu.memory_space<vmem>>, vector<1x8xf32>
    tpu.vector_store %arg16[%c8, %c0_12], %12 {strides = array<i32>} : memref<32x8xf32, #tpu.memory_space<vmem>>, vector<1x8xf32>,
    %c3 = arith.constant 3 : index
    %15 = memref.load %arg0[%c3] : memref<32xi32, #tpu.memory_space<smem>>
    %16 = arith.index_cast %15 : i32 to index
    %c0_13 = arith.constant 0 : index
    %17 = vector.load %arg1[%16, %c0_13] : memref<22x8xf32, #tpu.memory_space<vmem>>, vector<1x8xf32>
    %c3_14 = arith.constant 3 : index
    %c0_15 = arith.constant 0 : index
    %18 = vector.load %arg15[%c3_14, %c0_15] : memref<32x8xf32, #tpu.memory_space<vmem>>, vector<1x8xf32>
    tpu.vector_store %arg15[%c3_14, %c0_15], %17 {strides = array<i32>} : memref<32x8xf32, #tpu.memory_space<vmem>>, vector<1x8xf32>,
    %c12 = arith.constant 12 : index
    %c0_16 = arith.constant 0 : index
    %19 = vector.load %arg16[%c12, %c0_16] : memref<32x8xf32, #tpu.memory_space<vmem>>, vector<1x8xf32>
    tpu.vector_store %arg16[%c12, %c0_16], %17 {strides = array<i32>} : memref<32x8xf32, #tpu.memory_space<vmem>>, vector<1x8xf32>,
    %c4_17 = arith.constant 4 : index
    %20 = memref.load %arg0[%c4_17] : memref<32xi32, #tpu.memory_space<smem>>
    %21 = arith.index_cast %20 : i32 to index
    %c0_18 = arith.constant 0 : index
    %22 = vector.load %arg1[%21, %c0_18] : memref<22x8xf32, #tpu.memory_space<vmem>>, vector<1x8xf32>
    %c4_19 = arith.constant 4 : index
    %c0_20 = arith.constant 0 : index
    %23 = vector.load %arg15[%c4_19, %c0_20] : memref<32x8xf32, #tpu.memory_space<vmem>>, vector<1x8xf32>
    tpu.vector_store %arg15[%c4_19, %c0_20], %22 {strides = array<i32>} : memref<32x8xf32, #tpu.memory_space<vmem>>, vector<1x8xf32>,
    %c16 = arith.constant 16 : index
    %c0_21 = arith.constant 0 : index
    %24 = vector.load %arg16[%c16, %c0_21] : memref<32x8xf32, #tpu.memory_space<vmem>>, vector<1x8xf32>
    tpu.vector_store %arg16[%c16, %c0_21], %22 {strides = array<i32>} : memref<32x8xf32, #tpu.memory_space<vmem>>, vector<1x8xf32>,
    %c5 = arith.constant 5 : index
    %25 = memref.load %arg0[%c5] : memref<32xi32, #tpu.memory_space<smem>>
    %26 = arith.index_cast %25 : i32 to index
    %c0_22 = arith.constant 0 : index
    %27 = vector.load %arg1[%26, %c0_22] : memref<22x8xf32, #tpu.memory_space<vmem>>, vector<1x8xf32>
    %c5_23 = arith.constant 5 : index
    %c0_24 = arith.constant 0 : index
    %28 = vector.load %arg15[%c5_23, %c0_24] : memref<32x8xf32, #tpu.memory_space<vmem>>, vector<1x8xf32>
    tpu.vector_store %arg15[%c5_23, %c0_24], %27 {strides = array<i32>} : memref<32x8xf32, #tpu.memory_space<vmem>>, vector<1x8xf32>,
    %c20 = arith.constant 20 : index
    %c0_25 = arith.constant 0 : index
    %29 = vector.load %arg16[%c20, %c0_25] : memref<32x8xf32, #tpu.memory_space<vmem>>, vector<1x8xf32>
    tpu.vector_store %arg16[%c20, %c0_25], %27 {strides = array<i32>} : memref<32x8xf32, #tpu.memory_space<vmem>>, vector<1x8xf32>,
    %c6 = arith.constant 6 : index
    %30 = memref.load %arg0[%c6] : memref<32xi32, #tpu.memory_space<smem>>
    %31 = arith.index_cast %30 : i32 to index
    %c0_26 = arith.constant 0 : index
    %32 = vector.load %arg1[%31, %c0_26] : memref<22x8xf32, #tpu.memory_space<vmem>>, vector<1x8xf32>
    %c6_27 = arith.constant 6 : index
    %c0_28 = arith.constant 0 : index
    %33 = vector.load %arg15[%c6_27, %c0_28] : memref<32x8xf32, #tpu.memory_space<vmem>>, vector<1x8xf32>
    tpu.vector_store %arg15[%c6_27, %c0_28], %32 {strides = array<i32>} : memref<32x8xf32, #tpu.memory_space<vmem>>, vector<1x8xf32>,
    %c24 = arith.constant 24 : index
    %c0_29 = arith.constant 0 : index
    %34 = vector.load %arg16[%c24, %c0_29] : memref<32x8xf32, #tpu.memory_space<vmem>>, vector<1x8xf32>
    tpu.vector_store %arg16[%c24, %c0_29], %32 {strides = array<i32>} : memref<32x8xf32, #tpu.memory_space<vmem>>, vector<1x8xf32>,
    %c7 = arith.constant 7 : index
    %35 = memref.load %arg0[%c7] : memref<32xi32, #tpu.memory_space<smem>>
    %36 = arith.index_cast %35 : i32 to index
    %c0_30 = arith.constant 0 : index
    %37 = vector.load %arg1[%36, %c0_30] : memref<22x8xf32, #tpu.memory_space<vmem>>, vector<1x8xf32>
    %c7_31 = arith.constant 7 : index
    %c0_32 = arith.constant 0 : index
    %38 = vector.load %arg15[%c7_31, %c0_32] : memref<32x8xf32, #tpu.memory_space<vmem>>, vector<1x8xf32>
    tpu.vector_store %arg15[%c7_31, %c0_32], %37 {strides = array<i32>} : memref<32x8xf32, #tpu.memory_space<vmem>>, vector<1x8xf32>,
    %c28 = arith.constant 28 : index
    %c0_33 = arith.constant 0 : index
    %39 = vector.load %arg16[%c28, %c0_33] : memref<32x8xf32, #tpu.memory_space<vmem>>, vector<1x8xf32>
    tpu.vector_store %arg16[%c28, %c0_33], %37 {strides = array<i32>} : memref<32x8xf32, #tpu.memory_space<vmem>>, vector<1x8xf32>,
    %c8_34 = arith.constant 8 : index
    %40 = memref.load %arg0[%c8_34] : memref<32xi32, #tpu.memory_space<smem>>
    %41 = arith.index_cast %40 : i32 to index
    %c0_35 = arith.constant 0 : index
    %42 = vector.load %arg1[%41, %c0_35] : memref<22x8xf32, #tpu.memory_space<vmem>>, vector<1x8xf32>
    %c8_36 = arith.constant 8 : index
    %c0_37 = arith.constant 0 : index
    %43 = vector.load %arg15[%c8_36, %c0_37] : memref<32x8xf32, #tpu.memory_space<vmem>>, vector<1x8xf32>
    tpu.vector_store %arg15[%c8_36, %c0_37], %42 {strides = array<i32>} : memref<32x8xf32, #tpu.memory_space<vmem>>, vector<1x8xf32>,
    %c1_38 = arith.constant 1 : index
    %c0_39 = arith.constant 0 : index
    %44 = vector.load %arg16[%c1_38, %c0_39] : memref<32x8xf32, #tpu.memory_space<vmem>>, vector<1x8xf32>
    tpu.vector_store %arg16[%c1_38, %c0_39], %42 {strides = array<i32>} : memref<32x8xf32, #tpu.memory_space<vmem>>, vector<1x8xf32>,
    %c9 = arith.constant 9 : index
    %45 = memref.load %arg0[%c9] : memref<32xi32, #tpu.memory_space<smem>>
    %46 = arith.index_cast %45 : i32 to index
    %c0_40 = arith.constant 0 : index
    %47 = vector.load %arg1[%46, %c0_40] : memref<22x8xf32, #tpu.memory_space<vmem>>, vector<1x8xf32>
    %c9_41 = arith.constant 9 : index
    %c0_42 = arith.constant 0 : index
    %48 = vector.load %arg15[%c9_41, %c0_42] : memref<32x8xf32, #tpu.memory_space<vmem>>, vector<1x8xf32>
    tpu.vector_store %arg15[%c9_41, %c0_42], %47 {strides = array<i32>} : memref<32x8xf32, #tpu.memory_space<vmem>>, vector<1x8xf32>,
    %c5_43 = arith.constant 5 : index
    %c0_44 = arith.constant 0 : index
    %49 = vector.load %arg16[%c5_43, %c0_44] : memref<32x8xf32, #tpu.memory_space<vmem>>, vector<1x8xf32>
    tpu.vector_store %arg16[%c5_43, %c0_44], %47 {strides = array<i32>} : memref<32x8xf32, #tpu.memory_space<vmem>>, vector<1x8xf32>,
    %c10 = arith.constant 10 : index
    %50 = memref.load %arg0[%c10] : memref<32xi32, #tpu.memory_space<smem>>
    %51 = arith.index_cast %50 : i32 to index
    %c0_45 = arith.constant 0 : index
    %52 = vector.load %arg1[%51, %c0_45] : memref<22x8xf32, #tpu.memory_space<vmem>>, vector<1x8xf32>
    %c10_46 = arith.constant 10 : index
    %c0_47 = arith.constant 0 : index
    %53 = vector.load %arg15[%c10_46, %c0_47] : memref<32x8xf32, #tpu.memory_space<vmem>>, vector<1x8xf32>
    tpu.vector_store %arg15[%c10_46, %c0_47], %52 {strides = array<i32>} : memref<32x8xf32, #tpu.memory_space<vmem>>, vector<1x8xf32>,
    %c9_48 = arith.constant 9 : index
    %c0_49 = arith.constant 0 : index
    %54 = vector.load %arg16[%c9_48, %c0_49] : memref<32x8xf32, #tpu.memory_space<vmem>>, vector<1x8xf32>
    tpu.vector_store %arg16[%c9_48, %c0_49], %52 {strides = array<i32>} : memref<32x8xf32, #tpu.memory_space<vmem>>, vector<1x8xf32>,
    %c11 = arith.constant 11 : index
    %55 = memref.load %arg0[%c11] : memref<32xi32, #tpu.memory_space<smem>>
    %56 = arith.index_cast %55 : i32 to index
    %c0_50 = arith.constant 0 : index
    %57 = vector.load %arg1[%56, %c0_50] : memref<22x8xf32, #tpu.memory_space<vmem>>, vector<1x8xf32>
    %c11_51 = arith.constant 11 : index
    %c0_52 = arith.constant 0 : index
    %58 = vector.load %arg15[%c11_51, %c0_52] : memref<32x8xf32, #tpu.memory_space<vmem>>, vector<1x8xf32>
    tpu.vector_store %arg15[%c11_51, %c0_52], %57 {strides = array<i32>} : memref<32x8xf32, #tpu.memory_space<vmem>>, vector<1x8xf32>,
    %c13 = arith.constant 13 : index
    %c0_53 = arith.constant 0 : index
    %59 = vector.load %arg16[%c13, %c0_53] : memref<32x8xf32, #tpu.memory_space<vmem>>, vector<1x8xf32>
    tpu.vector_store %arg16[%c13, %c0_53], %57 {strides = array<i32>} : memref<32x8xf32, #tpu.memory_space<vmem>>, vector<1x8xf32>,
    %c12_54 = arith.constant 12 : index
    %60 = memref.load %arg0[%c12_54] : memref<32xi32, #tpu.memory_space<smem>>
    %61 = arith.index_cast %60 : i32 to index
    %c0_55 = arith.constant 0 : index
    %62 = vector.load %arg1[%61, %c0_55] : memref<22x8xf32, #tpu.memory_space<vmem>>, vector<1x8xf32>
    %c12_56 = arith.constant 12 : index
    %c0_57 = arith.constant 0 : index
    %63 = vector.load %arg15[%c12_56, %c0_57] : memref<32x8xf32, #tpu.memory_space<vmem>>, vector<1x8xf32>
    tpu.vector_store %arg15[%c12_56, %c0_57], %62 {strides = array<i32>} : memref<32x8xf32, #tpu.memory_space<vmem>>, vector<1x8xf32>,
    %c17 = arith.constant 17 : index
    %c0_58 = arith.constant 0 : index
    %64 = vector.load %arg16[%c17, %c0_58] : memref<32x8xf32, #tpu.memory_space<vmem>>, vector<1x8xf32>
    tpu.vector_store %arg16[%c17, %c0_58], %62 {strides = array<i32>} : memref<32x8xf32, #tpu.memory_space<vmem>>, vector<1x8xf32>,
    %c13_59 = arith.constant 13 : index
    %65 = memref.load %arg0[%c13_59] : memref<32xi32, #tpu.memory_space<smem>>
    %66 = arith.index_cast %65 : i32 to index
    %c0_60 = arith.constant 0 : index
    %67 = vector.load %arg1[%66, %c0_60] : memref<22x8xf32, #tpu.memory_space<vmem>>, vector<1x8xf32>
    %c13_61 = arith.constant 13 : index
    %c0_62 = arith.constant 0 : index
    %68 = vector.load %arg15[%c13_61, %c0_62] : memref<32x8xf32, #tpu.memory_space<vmem>>, vector<1x8xf32>
    tpu.vector_store %arg15[%c13_61, %c0_62], %67 {strides = array<i32>} : memref<32x8xf32, #tpu.memory_space<vmem>>, vector<1x8xf32>,
    %c21 = arith.constant 21 : index
    %c0_63 = arith.constant 0 : index
    %69 = vector.load %arg16[%c21, %c0_63] : memref<32x8xf32, #tpu.memory_space<vmem>>, vector<1x8xf32>
    tpu.vector_store %arg16[%c21, %c0_63], %67 {strides = array<i32>} : memref<32x8xf32, #tpu.memory_space<vmem>>, vector<1x8xf32>,
    %c14 = arith.constant 14 : index
    %70 = memref.load %arg0[%c14] : memref<32xi32, #tpu.memory_space<smem>>
    %71 = arith.index_cast %70 : i32 to index
    %c0_64 = arith.constant 0 : index
    %72 = vector.load %arg1[%71, %c0_64] : memref<22x8xf32, #tpu.memory_space<vmem>>, vector<1x8xf32>
    %c14_65 = arith.constant 14 : index
    %c0_66 = arith.constant 0 : index
    %73 = vector.load %arg15[%c14_65, %c0_66] : memref<32x8xf32, #tpu.memory_space<vmem>>, vector<1x8xf32>
    tpu.vector_store %arg15[%c14_65, %c0_66], %72 {strides = array<i32>} : memref<32x8xf32, #tpu.memory_space<vmem>>, vector<1x8xf32>,
    %c25 = arith.constant 25 : index
    %c0_67 = arith.constant 0 : index
    %74 = vector.load %arg16[%c25, %c0_67] : memref<32x8xf32, #tpu.memory_space<vmem>>, vector<1x8xf32>
    tpu.vector_store %arg16[%c25, %c0_67], %72 {strides = array<i32>} : memref<32x8xf32, #tpu.memory_space<vmem>>, vector<1x8xf32>,
    %c15 = arith.constant 15 : index
    %75 = memref.load %arg0[%c15] : memref<32xi32, #tpu.memory_space<smem>>
    %76 = arith.index_cast %75 : i32 to index
    %c0_68 = arith.constant 0 : index
    %77 = vector.load %arg1[%76, %c0_68] : memref<22x8xf32, #tpu.memory_space<vmem>>, vector<1x8xf32>
    %c15_69 = arith.constant 15 : index
    %c0_70 = arith.constant 0 : index
    %78 = vector.load %arg15[%c15_69, %c0_70] : memref<32x8xf32, #tpu.memory_space<vmem>>, vector<1x8xf32>
    tpu.vector_store %arg15[%c15_69, %c0_70], %77 {strides = array<i32>} : memref<32x8xf32, #tpu.memory_space<vmem>>, vector<1x8xf32>,
    %c29 = arith.constant 29 : index
    %c0_71 = arith.constant 0 : index
    %79 = vector.load %arg16[%c29, %c0_71] : memref<32x8xf32, #tpu.memory_space<vmem>>, vector<1x8xf32>
    tpu.vector_store %arg16[%c29, %c0_71], %77 {strides = array<i32>} : memref<32x8xf32, #tpu.memory_space<vmem>>, vector<1x8xf32>,
    %c16_72 = arith.constant 16 : index
    %80 = memref.load %arg0[%c16_72] : memref<32xi32, #tpu.memory_space<smem>>
    %81 = arith.index_cast %80 : i32 to index
    %c0_73 = arith.constant 0 : index
    %82 = vector.load %arg1[%81, %c0_73] : memref<22x8xf32, #tpu.memory_space<vmem>>, vector<1x8xf32>
    %c16_74 = arith.constant 16 : index
    %c0_75 = arith.constant 0 : index
    %83 = vector.load %arg15[%c16_74, %c0_75] : memref<32x8xf32, #tpu.memory_space<vmem>>, vector<1x8xf32>
    tpu.vector_store %arg15[%c16_74, %c0_75], %82 {strides = array<i32>} : memref<32x8xf32, #tpu.memory_space<vmem>>, vector<1x8xf32>,
    %c2_76 = arith.constant 2 : index
    %c0_77 = arith.constant 0 : index
    %84 = vector.load %arg16[%c2_76, %c0_77] : memref<32x8xf32, #tpu.memory_space<vmem>>, vector<1x8xf32>
    tpu.vector_store %arg16[%c2_76, %c0_77], %82 {strides = array<i32>} : memref<32x8xf32, #tpu.memory_space<vmem>>, vector<1x8xf32>,
    %c17_78 = arith.constant 17 : index
    %85 = memref.load %arg0[%c17_78] : memref<32xi32, #tpu.memory_space<smem>>
    %86 = arith.index_cast %85 : i32 to index
    %c0_79 = arith.constant 0 : index
    %87 = vector.load %arg1[%86, %c0_79] : memref<22x8xf32, #tpu.memory_space<vmem>>, vector<1x8xf32>
    %c17_80 = arith.constant 17 : index
    %c0_81 = arith.constant 0 : index
    %88 = vector.load %arg15[%c17_80, %c0_81] : memref<32x8xf32, #tpu.memory_space<vmem>>, vector<1x8xf32>
    tpu.vector_store %arg15[%c17_80, %c0_81], %87 {strides = array<i32>} : memref<32x8xf32, #tpu.memory_space<vmem>>, vector<1x8xf32>,
    %c6_82 = arith.constant 6 : index
    %c0_83 = arith.constant 0 : index
    %89 = vector.load %arg16[%c6_82, %c0_83] : memref<32x8xf32, #tpu.memory_space<vmem>>, vector<1x8xf32>
    tpu.vector_store %arg16[%c6_82, %c0_83], %87 {strides = array<i32>} : memref<32x8xf32, #tpu.memory_space<vmem>>, vector<1x8xf32>,
    %c18 = arith.constant 18 : index
    %90 = memref.load %arg0[%c18] : memref<32xi32, #tpu.memory_space<smem>>
    %91 = arith.index_cast %90 : i32 to index
    %c0_84 = arith.constant 0 : index
    %92 = vector.load %arg1[%91, %c0_84] : memref<22x8xf32, #tpu.memory_space<vmem>>, vector<1x8xf32>
    %c18_85 = arith.constant 18 : index
    %c0_86 = arith.constant 0 : index
    %93 = vector.load %arg15[%c18_85, %c0_86] : memref<32x8xf32, #tpu.memory_space<vmem>>, vector<1x8xf32>
    tpu.vector_store %arg15[%c18_85, %c0_86], %92 {strides = array<i32>} : memref<32x8xf32, #tpu.memory_space<vmem>>, vector<1x8xf32>,
    %c10_87 = arith.constant 10 : index
    %c0_88 = arith.constant 0 : index
    %94 = vector.load %arg16[%c10_87, %c0_88] : memref<32x8xf32, #tpu.memory_space<vmem>>, vector<1x8xf32>
    tpu.vector_store %arg16[%c10_87, %c0_88], %92 {strides = array<i32>} : memref<32x8xf32, #tpu.memory_space<vmem>>, vector<1x8xf32>,
    %c19 = arith.constant 19 : index
    %95 = memref.load %arg0[%c19] : memref<32xi32, #tpu.memory_space<smem>>
    %96 = arith.index_cast %95 : i32 to index
    %c0_89 = arith.constant 0 : index
    %97 = vector.load %arg1[%96, %c0_89] : memref<22x8xf32, #tpu.memory_space<vmem>>, vector<1x8xf32>
    %c19_90 = arith.constant 19 : index
    %c0_91 = arith.constant 0 : index
    %98 = vector.load %arg15[%c19_90, %c0_91] : memref<32x8xf32, #tpu.memory_space<vmem>>, vector<1x8xf32>
    tpu.vector_store %arg15[%c19_90, %c0_91], %97 {strides = array<i32>} : memref<32x8xf32, #tpu.memory_space<vmem>>, vector<1x8xf32>,
    %c14_92 = arith.constant 14 : index
    %c0_93 = arith.constant 0 : index
    %99 = vector.load %arg16[%c14_92, %c0_93] : memref<32x8xf32, #tpu.memory_space<vmem>>, vector<1x8xf32>
    tpu.vector_store %arg16[%c14_92, %c0_93], %97 {strides = array<i32>} : memref<32x8xf32, #tpu.memory_space<vmem>>, vector<1x8xf32>,
    %c20_94 = arith.constant 20 : index
    %100 = memref.load %arg0[%c20_94] : memref<32xi32, #tpu.memory_space<smem>>
    %101 = arith.index_cast %100 : i32 to index
    %c0_95 = arith.constant 0 : index
    %102 = vector.load %arg1[%101, %c0_95] : memref<22x8xf32, #tpu.memory_space<vmem>>, vector<1x8xf32>
    %c20_96 = arith.constant 20 : index
    %c0_97 = arith.constant 0 : index
    %103 = vector.load %arg15[%c20_96, %c0_97] : memref<32x8xf32, #tpu.memory_space<vmem>>, vector<1x8xf32>
    tpu.vector_store %arg15[%c20_96, %c0_97], %102 {strides = array<i32>} : memref<32x8xf32, #tpu.memory_space<vmem>>, vector<1x8xf32>,
    %c18_98 = arith.constant 18 : index
    %c0_99 = arith.constant 0 : index
    %104 = vector.load %arg16[%c18_98, %c0_99] : memref<32x8xf32, #tpu.memory_space<vmem>>, vector<1x8xf32>
    tpu.vector_store %arg16[%c18_98, %c0_99], %102 {strides = array<i32>} : memref<32x8xf32, #tpu.memory_space<vmem>>, vector<1x8xf32>,
    %c21_100 = arith.constant 21 : index
    %105 = memref.load %arg0[%c21_100] : memref<32xi32, #tpu.memory_space<smem>>
    %106 = arith.index_cast %105 : i32 to index
    %c0_101 = arith.constant 0 : index
    %107 = vector.load %arg1[%106, %c0_101] : memref<22x8xf32, #tpu.memory_space<vmem>>, vector<1x8xf32>
    %c21_102 = arith.constant 21 : index
    %c0_103 = arith.constant 0 : index
    %108 = vector.load %arg15[%c21_102, %c0_103] : memref<32x8xf32, #tpu.memory_space<vmem>>, vector<1x8xf32>
    tpu.vector_store %arg15[%c21_102, %c0_103], %107 {strides = array<i32>} : memref<32x8xf32, #tpu.memory_space<vmem>>, vector<1x8xf32>,
    %c22 = arith.constant 22 : index
    %c0_104 = arith.constant 0 : index
    %109 = vector.load %arg16[%c22, %c0_104] : memref<32x8xf32, #tpu.memory_space<vmem>>, vector<1x8xf32>
    tpu.vector_store %arg16[%c22, %c0_104], %107 {strides = array<i32>} : memref<32x8xf32, #tpu.memory_space<vmem>>, vector<1x8xf32>,
    %c22_105 = arith.constant 22 : index
    %110 = memref.load %arg0[%c22_105] : memref<32xi32, #tpu.memory_space<smem>>
    %111 = arith.index_cast %110 : i32 to index
    %c0_106 = arith.constant 0 : index
    %112 = vector.load %arg1[%111, %c0_106] : memref<22x8xf32, #tpu.memory_space<vmem>>, vector<1x8xf32>
    %c22_107 = arith.constant 22 : index
    %c0_108 = arith.constant 0 : index
    %113 = vector.load %arg15[%c22_107, %c0_108] : memref<32x8xf32, #tpu.memory_space<vmem>>, vector<1x8xf32>
    tpu.vector_store %arg15[%c22_107, %c0_108], %112 {strides = array<i32>} : memref<32x8xf32, #tpu.memory_space<vmem>>, vector<1x8xf32>,
    %c26 = arith.constant 26 : index
    %c0_109 = arith.constant 0 : index
    %114 = vector.load %arg16[%c26, %c0_109] : memref<32x8xf32, #tpu.memory_space<vmem>>, vector<1x8xf32>
    tpu.vector_store %arg16[%c26, %c0_109], %112 {strides = array<i32>} : memref<32x8xf32, #tpu.memory_space<vmem>>, vector<1x8xf32>,
    %c23 = arith.constant 23 : index
    %115 = memref.load %arg0[%c23] : memref<32xi32, #tpu.memory_space<smem>>
    %116 = arith.index_cast %115 : i32 to index
    %c0_110 = arith.constant 0 : index
    %117 = vector.load %arg1[%116, %c0_110] : memref<22x8xf32, #tpu.memory_space<vmem>>, vector<1x8xf32>
    %c23_111 = arith.constant 23 : index
    %c0_112 = arith.constant 0 : index
    %118 = vector.load %arg15[%c23_111, %c0_112] : memref<32x8xf32, #tpu.memory_space<vmem>>, vector<1x8xf32>
    tpu.vector_store %arg15[%c23_111, %c0_112], %117 {strides = array<i32>} : memref<32x8xf32, #tpu.memory_space<vmem>>, vector<1x8xf32>,
    %c30 = arith.constant 30 : index
    %c0_113 = arith.constant 0 : index
    %119 = vector.load %arg16[%c30, %c0_113] : memref<32x8xf32, #tpu.memory_space<vmem>>, vector<1x8xf32>
    tpu.vector_store %arg16[%c30, %c0_113], %117 {strides = array<i32>} : memref<32x8xf32, #tpu.memory_space<vmem>>, vector<1x8xf32>,
    %c24_114 = arith.constant 24 : index
    %120 = memref.load %arg0[%c24_114] : memref<32xi32, #tpu.memory_space<smem>>
    %121 = arith.index_cast %120 : i32 to index
    %c0_115 = arith.constant 0 : index
    %122 = vector.load %arg1[%121, %c0_115] : memref<22x8xf32, #tpu.memory_space<vmem>>, vector<1x8xf32>
    %c24_116 = arith.constant 24 : index
    %c0_117 = arith.constant 0 : index
    %123 = vector.load %arg15[%c24_116, %c0_117] : memref<32x8xf32, #tpu.memory_space<vmem>>, vector<1x8xf32>
    tpu.vector_store %arg15[%c24_116, %c0_117], %122 {strides = array<i32>} : memref<32x8xf32, #tpu.memory_space<vmem>>, vector<1x8xf32>,
    %c3_118 = arith.constant 3 : index
    %c0_119 = arith.constant 0 : index
    %124 = vector.load %arg16[%c3_118, %c0_119] : memref<32x8xf32, #tpu.memory_space<vmem>>, vector<1x8xf32>
    tpu.vector_store %arg16[%c3_118, %c0_119], %122 {strides = array<i32>} : memref<32x8xf32, #tpu.memory_space<vmem>>, vector<1x8xf32>,
    %c25_120 = arith.constant 25 : index
    %125 = memref.load %arg0[%c25_120] : memref<32xi32, #tpu.memory_space<smem>>
    %126 = arith.index_cast %125 : i32 to index
    %c0_121 = arith.constant 0 : index
    %127 = vector.load %arg1[%126, %c0_121] : memref<22x8xf32, #tpu.memory_space<vmem>>, vector<1x8xf32>
    %c25_122 = arith.constant 25 : index
    %c0_123 = arith.constant 0 : index
    %128 = vector.load %arg15[%c25_122, %c0_123] : memref<32x8xf32, #tpu.memory_space<vmem>>, vector<1x8xf32>
    tpu.vector_store %arg15[%c25_122, %c0_123], %127 {strides = array<i32>} : memref<32x8xf32, #tpu.memory_space<vmem>>, vector<1x8xf32>,
    %c7_124 = arith.constant 7 : index
    %c0_125 = arith.constant 0 : index
    %129 = vector.load %arg16[%c7_124, %c0_125] : memref<32x8xf32, #tpu.memory_space<vmem>>, vector<1x8xf32>
    tpu.vector_store %arg16[%c7_124, %c0_125], %127 {strides = array<i32>} : memref<32x8xf32, #tpu.memory_space<vmem>>, vector<1x8xf32>,
    %c26_126 = arith.constant 26 : index
    %130 = memref.load %arg0[%c26_126] : memref<32xi32, #tpu.memory_space<smem>>
    %131 = arith.index_cast %130 : i32 to index
    %c0_127 = arith.constant 0 : index
    %132 = vector.load %arg1[%131, %c0_127] : memref<22x8xf32, #tpu.memory_space<vmem>>, vector<1x8xf32>
    %c26_128 = arith.constant 26 : index
    %c0_129 = arith.constant 0 : index
    %133 = vector.load %arg15[%c26_128, %c0_129] : memref<32x8xf32, #tpu.memory_space<vmem>>, vector<1x8xf32>
    tpu.vector_store %arg15[%c26_128, %c0_129], %132 {strides = array<i32>} : memref<32x8xf32, #tpu.memory_space<vmem>>, vector<1x8xf32>,
    %c11_130 = arith.constant 11 : index
    %c0_131 = arith.constant 0 : index
    %134 = vector.load %arg16[%c11_130, %c0_131] : memref<32x8xf32, #tpu.memory_space<vmem>>, vector<1x8xf32>
    tpu.vector_store %arg16[%c11_130, %c0_131], %132 {strides = array<i32>} : memref<32x8xf32, #tpu.memory_space<vmem>>, vector<1x8xf32>,
    %c27 = arith.constant 27 : index
    %135 = memref.load %arg0[%c27] : memref<32xi32, #tpu.memory_space<smem>>
    %136 = arith.index_cast %135 : i32 to index
    %c0_132 = arith.constant 0 : index
    %137 = vector.load %arg1[%136, %c0_132] : memref<22x8xf32, #tpu.memory_space<vmem>>, vector<1x8xf32>
    %c27_133 = arith.constant 27 : index
    %c0_134 = arith.constant 0 : index
    %138 = vector.load %arg15[%c27_133, %c0_134] : memref<32x8xf32, #tpu.memory_space<vmem>>, vector<1x8xf32>
    tpu.vector_store %arg15[%c27_133, %c0_134], %137 {strides = array<i32>} : memref<32x8xf32, #tpu.memory_space<vmem>>, vector<1x8xf32>,
    %c15_135 = arith.constant 15 : index
    %c0_136 = arith.constant 0 : index
    %139 = vector.load %arg16[%c15_135, %c0_136] : memref<32x8xf32, #tpu.memory_space<vmem>>, vector<1x8xf32>
    tpu.vector_store %arg16[%c15_135, %c0_136], %137 {strides = array<i32>} : memref<32x8xf32, #tpu.memory_space<vmem>>, vector<1x8xf32>,
    %c28_137 = arith.constant 28 : index
    %140 = memref.load %arg0[%c28_137] : memref<32xi32, #tpu.memory_space<smem>>
    %141 = arith.index_cast %140 : i32 to index
    %c0_138 = arith.constant 0 : index
    %142 = vector.load %arg1[%141, %c0_138] : memref<22x8xf32, #tpu.memory_space<vmem>>, vector<1x8xf32>
    %c28_139 = arith.constant 28 : index
    %c0_140 = arith.constant 0 : index
    %143 = vector.load %arg15[%c28_139, %c0_140] : memref<32x8xf32, #tpu.memory_space<vmem>>, vector<1x8xf32>
    tpu.vector_store %arg15[%c28_139, %c0_140], %142 {strides = array<i32>} : memref<32x8xf32, #tpu.memory_space<vmem>>, vector<1x8xf32>,
    %c19_141 = arith.constant 19 : index
    %c0_142 = arith.constant 0 : index
    %144 = vector.load %arg16[%c19_141, %c0_142] : memref<32x8xf32, #tpu.memory_space<vmem>>, vector<1x8xf32>
    tpu.vector_store %arg16[%c19_141, %c0_142], %142 {strides = array<i32>} : memref<32x8xf32, #tpu.memory_space<vmem>>, vector<1x8xf32>,
    %c29_143 = arith.constant 29 : index
    %145 = memref.load %arg0[%c29_143] : memref<32xi32, #tpu.memory_space<smem>>
    %146 = arith.index_cast %145 : i32 to index
    %c0_144 = arith.constant 0 : index
    %147 = vector.load %arg1[%146, %c0_144] : memref<22x8xf32, #tpu.memory_space<vmem>>, vector<1x8xf32>
    %c29_145 = arith.constant 29 : index
    %c0_146 = arith.constant 0 : index
    %148 = vector.load %arg15[%c29_145, %c0_146] : memref<32x8xf32, #tpu.memory_space<vmem>>, vector<1x8xf32>
    tpu.vector_store %arg15[%c29_145, %c0_146], %147 {strides = array<i32>} : memref<32x8xf32, #tpu.memory_space<vmem>>, vector<1x8xf32>,
    %c23_147 = arith.constant 23 : index
    %c0_148 = arith.constant 0 : index
    %149 = vector.load %arg16[%c23_147, %c0_148] : memref<32x8xf32, #tpu.memory_space<vmem>>, vector<1x8xf32>
    tpu.vector_store %arg16[%c23_147, %c0_148], %147 {strides = array<i32>} : memref<32x8xf32, #tpu.memory_space<vmem>>, vector<1x8xf32>,
    %c30_149 = arith.constant 30 : index
    %150 = memref.load %arg0[%c30_149] : memref<32xi32, #tpu.memory_space<smem>>
    %151 = arith.index_cast %150 : i32 to index
    %c0_150 = arith.constant 0 : index
    %152 = vector.load %arg1[%151, %c0_150] : memref<22x8xf32, #tpu.memory_space<vmem>>, vector<1x8xf32>
    %c30_151 = arith.constant 30 : index
    %c0_152 = arith.constant 0 : index
    %153 = vector.load %arg15[%c30_151, %c0_152] : memref<32x8xf32, #tpu.memory_space<vmem>>, vector<1x8xf32>
    tpu.vector_store %arg15[%c30_151, %c0_152], %152 {strides = array<i32>} : memref<32x8xf32, #tpu.memory_space<vmem>>, vector<1x8xf32>,
    %c27_153 = arith.constant 27 : index
    %c0_154 = arith.constant 0 : index
    %154 = vector.load %arg16[%c27_153, %c0_154] : memref<32x8xf32, #tpu.memory_space<vmem>>, vector<1x8xf32>
    tpu.vector_store %arg16[%c27_153, %c0_154], %152 {strides = array<i32>} : memref<32x8xf32, #tpu.memory_space<vmem>>, vector<1x8xf32>,
    %c31 = arith.constant 31 : index
    %155 = memref.load %arg0[%c31] : memref<32xi32, #tpu.memory_space<smem>>
    %156 = arith.index_cast %155 : i32 to index
    %c0_155 = arith.constant 0 : index
    %157 = vector.load %arg1[%156, %c0_155] : memref<22x8xf32, #tpu.memory_space<vmem>>, vector<1x8xf32>
    %c31_156 = arith.constant 31 : index
    %c0_157 = arith.constant 0 : index
    %158 = vector.load %arg15[%c31_156, %c0_157] : memref<32x8xf32, #tpu.memory_space<vmem>>, vector<1x8xf32>
    tpu.vector_store %arg15[%c31_156, %c0_157], %157 {strides = array<i32>} : memref<32x8xf32, #tpu.memory_space<vmem>>, vector<1x8xf32>,
    %c31_158 = arith.constant 31 : index
    %c0_159 = arith.constant 0 : index
    %159 = vector.load %arg16[%c31_158, %c0_159] : memref<32x8xf32, #tpu.memory_space<vmem>>, vector<1x8xf32>
    tpu.vector_store %arg16[%c31_158, %c0_159], %157 {strides = array<i32>} : memref<32x8xf32, #tpu.memory_space<vmem>>, vector<1x8xf32>,
    %c0_160 = arith.constant 0 : index
    %c0_161 = arith.constant 0 : index
    %160 = vector.load %arg16[%c0_160, %c0_161] : memref<32x8xf32, #tpu.memory_space<vmem>>, vector<32x8xf32>
    %c0_162 = arith.constant 0 : index
    %c0_163 = arith.constant 0 : index
    %161 = vector.load %arg2[%c0_162, %c0_163] : memref<8x128xf32, #tpu.memory_space<vmem>>, vector<8x128xf32>
    %cst = arith.constant dense<0.000000e+00> : vector<32x128xf32>
    %162 = tpu.matmul %160, %161, %cst {dimension_numbers = #tpu.dot_dimension_numbers<[1], [0], [0], [1], [0, 0, 1, 1], [], []>} : vector<32x8xf32>, vector<8x128xf32>, vector<32x128xf32> -> vector<32x128xf32>
    %c0_164 = arith.constant 0 : index
    %c0_165 = arith.constant 0 : index
    %163 = vector.load %arg4[%c0_164, %c0_165] : memref<1x128xf32, #tpu.memory_space<vmem>>, vector<1x128xf32>
    %164 = vector.broadcast %163 : vector<1x128xf32> to vector<32x128xf32>
    %165 = arith.addf %162, %164 : vector<32x128xf32>
    %cst_166 = arith.constant 0.000000e+00 : f32
    %166 = vector.broadcast %cst_166 : f32 to vector<4x32xf32>
    %cst_167 = arith.constant 0.000000e+00 : f32
    %167 = vector.broadcast %cst_167 : f32 to vector<4x32xf32>
    %168 = vector.extract_strided_slice %165 {offsets = [0, 0], sizes = [4, 128], strides = [1, 1]} : vector<32x128xf32> to vector<4x128xf32>
    %c0_168 = arith.constant 0 : index
    %c0_169 = arith.constant 0 : index
    %169 = vector.load %arg3[%c0_168, %c0_169] : memref<32x128xf32, #tpu.memory_space<vmem>>, vector<32x128xf32>
    %cst_170 = arith.constant dense<0.000000e+00> : vector<4x128xf32>
    %170 = tpu.matmul %166, %169, %cst_170 {dimension_numbers = #tpu.dot_dimension_numbers<[1], [0], [0], [1], [0, 0, 1, 1], [], []>} : vector<4x32xf32>, vector<32x128xf32>, vector<4x128xf32> -> vector<4x128xf32>
    %171 = arith.addf %168, %170 : vector<4x128xf32>
    %172 = arith.negf %171 : vector<4x128xf32>
    %173 = math.exp %172 : vector<4x128xf32>
    %cst_171 = arith.constant 1.000000e+00 : f32
    %174 = vector.broadcast %cst_171 : f32 to vector<4x128xf32>
    %175 = arith.addf %174, %173 : vector<4x128xf32>
    %176 = arith.divf %174, %175 : vector<4x128xf32>
    %177 = math.tanh %171 : vector<4x128xf32>
    %178 = vector.extract_strided_slice %176 {offsets = [0, 0], sizes = [4, 32], strides = [1, 1]} : vector<4x128xf32> to vector<4x32xf32>
    %179 = vector.extract_strided_slice %176 {offsets = [0, 32], sizes = [4, 32], strides = [1, 1]} : vector<4x128xf32> to vector<4x32xf32>
    %180 = vector.extract_strided_slice %176 {offsets = [0, 96], sizes = [4, 32], strides = [1, 1]} : vector<4x128xf32> to vector<4x32xf32>
    %181 = vector.extract_strided_slice %177 {offsets = [0, 64], sizes = [4, 32], strides = [1, 1]} : vector<4x128xf32> to vector<4x32xf32>
    %182 = arith.mulf %179, %167 : vector<4x32xf32>
    %183 = arith.mulf %178, %181 : vector<4x32xf32>
    %184 = arith.addf %182, %183 : vector<4x32xf32>
    %185 = math.tanh %184 : vector<4x32xf32>
    %186 = arith.mulf %180, %185 : vector<4x32xf32>
    %c0_172 = arith.constant 0 : index
    %c0_173 = arith.constant 0 : index
    %187 = vector.load %arg17[%c0_172, %c0_173] : memref<32x32xf32, #tpu.memory_space<vmem>>, vector<4x32xf32>
    tpu.vector_store %arg17[%c0_172, %c0_173], %186 {strides = array<i32>} : memref<32x32xf32, #tpu.memory_space<vmem>>, vector<4x32xf32>,
    %188 = vector.extract_strided_slice %165 {offsets = [4, 0], sizes = [4, 128], strides = [1, 1]} : vector<32x128xf32> to vector<4x128xf32>
    %c0_174 = arith.constant 0 : index
    %c0_175 = arith.constant 0 : index
    %189 = vector.load %arg3[%c0_174, %c0_175] : memref<32x128xf32, #tpu.memory_space<vmem>>, vector<32x128xf32>
    %cst_176 = arith.constant dense<0.000000e+00> : vector<4x128xf32>
    %190 = tpu.matmul %186, %189, %cst_176 {dimension_numbers = #tpu.dot_dimension_numbers<[1], [0], [0], [1], [0, 0, 1, 1], [], []>} : vector<4x32xf32>, vector<32x128xf32>, vector<4x128xf32> -> vector<4x128xf32>
    %191 = arith.addf %188, %190 : vector<4x128xf32>
    %192 = arith.negf %191 : vector<4x128xf32>
    %193 = math.exp %192 : vector<4x128xf32>
    %cst_177 = arith.constant 1.000000e+00 : f32
    %194 = vector.broadcast %cst_177 : f32 to vector<4x128xf32>
    %195 = arith.addf %194, %193 : vector<4x128xf32>
    %196 = arith.divf %194, %195 : vector<4x128xf32>
    %197 = math.tanh %191 : vector<4x128xf32>
    %198 = vector.extract_strided_slice %196 {offsets = [0, 0], sizes = [4, 32], strides = [1, 1]} : vector<4x128xf32> to vector<4x32xf32>
    %199 = vector.extract_strided_slice %196 {offsets = [0, 32], sizes = [4, 32], strides = [1, 1]} : vector<4x128xf32> to vector<4x32xf32>
    %200 = vector.extract_strided_slice %196 {offsets = [0, 96], sizes = [4, 32], strides = [1, 1]} : vector<4x128xf32> to vector<4x32xf32>
    %201 = vector.extract_strided_slice %197 {offsets = [0, 64], sizes = [4, 32], strides = [1, 1]} : vector<4x128xf32> to vector<4x32xf32>
    %202 = arith.mulf %199, %184 : vector<4x32xf32>
    %203 = arith.mulf %198, %201 : vector<4x32xf32>
    %204 = arith.addf %202, %203 : vector<4x32xf32>
    %205 = math.tanh %204 : vector<4x32xf32>
    %206 = arith.mulf %200, %205 : vector<4x32xf32>
    %c4_178 = arith.constant 4 : index
    %c0_179 = arith.constant 0 : index
    %207 = vector.load %arg17[%c4_178, %c0_179] : memref<32x32xf32, #tpu.memory_space<vmem>>, vector<4x32xf32>
    tpu.vector_store %arg17[%c4_178, %c0_179], %206 {strides = array<i32>} : memref<32x32xf32, #tpu.memory_space<vmem>>, vector<4x32xf32>,
    %208 = vector.extract_strided_slice %165 {offsets = [8, 0], sizes = [4, 128], strides = [1, 1]} : vector<32x128xf32> to vector<4x128xf32>
    %c0_180 = arith.constant 0 : index
    %c0_181 = arith.constant 0 : index
    %209 = vector.load %arg3[%c0_180, %c0_181] : memref<32x128xf32, #tpu.memory_space<vmem>>, vector<32x128xf32>
    %cst_182 = arith.constant dense<0.000000e+00> : vector<4x128xf32>
    %210 = tpu.matmul %206, %209, %cst_182 {dimension_numbers = #tpu.dot_dimension_numbers<[1], [0], [0], [1], [0, 0, 1, 1], [], []>} : vector<4x32xf32>, vector<32x128xf32>, vector<4x128xf32> -> vector<4x128xf32>
    %211 = arith.addf %208, %210 : vector<4x128xf32>
    %212 = arith.negf %211 : vector<4x128xf32>
    %213 = math.exp %212 : vector<4x128xf32>
    %cst_183 = arith.constant 1.000000e+00 : f32
    %214 = vector.broadcast %cst_183 : f32 to vector<4x128xf32>
    %215 = arith.addf %214, %213 : vector<4x128xf32>
    %216 = arith.divf %214, %215 : vector<4x128xf32>
    %217 = math.tanh %211 : vector<4x128xf32>
    %218 = vector.extract_strided_slice %216 {offsets = [0, 0], sizes = [4, 32], strides = [1, 1]} : vector<4x128xf32> to vector<4x32xf32>
    %219 = vector.extract_strided_slice %216 {offsets = [0, 32], sizes = [4, 32], strides = [1, 1]} : vector<4x128xf32> to vector<4x32xf32>
    %220 = vector.extract_strided_slice %216 {offsets = [0, 96], sizes = [4, 32], strides = [1, 1]} : vector<4x128xf32> to vector<4x32xf32>
    %221 = vector.extract_strided_slice %217 {offsets = [0, 64], sizes = [4, 32], strides = [1, 1]} : vector<4x128xf32> to vector<4x32xf32>
    %222 = arith.mulf %219, %204 : vector<4x32xf32>
    %223 = arith.mulf %218, %221 : vector<4x32xf32>
    %224 = arith.addf %222, %223 : vector<4x32xf32>
    %225 = math.tanh %224 : vector<4x32xf32>
    %226 = arith.mulf %220, %225 : vector<4x32xf32>
    %c8_184 = arith.constant 8 : index
    %c0_185 = arith.constant 0 : index
    %227 = vector.load %arg17[%c8_184, %c0_185] : memref<32x32xf32, #tpu.memory_space<vmem>>, vector<4x32xf32>
    tpu.vector_store %arg17[%c8_184, %c0_185], %226 {strides = array<i32>} : memref<32x32xf32, #tpu.memory_space<vmem>>, vector<4x32xf32>,
    %228 = vector.extract_strided_slice %165 {offsets = [12, 0], sizes = [4, 128], strides = [1, 1]} : vector<32x128xf32> to vector<4x128xf32>
    %c0_186 = arith.constant 0 : index
    %c0_187 = arith.constant 0 : index
    %229 = vector.load %arg3[%c0_186, %c0_187] : memref<32x128xf32, #tpu.memory_space<vmem>>, vector<32x128xf32>
    %cst_188 = arith.constant dense<0.000000e+00> : vector<4x128xf32>
    %230 = tpu.matmul %226, %229, %cst_188 {dimension_numbers = #tpu.dot_dimension_numbers<[1], [0], [0], [1], [0, 0, 1, 1], [], []>} : vector<4x32xf32>, vector<32x128xf32>, vector<4x128xf32> -> vector<4x128xf32>
    %231 = arith.addf %228, %230 : vector<4x128xf32>
    %232 = arith.negf %231 : vector<4x128xf32>
    %233 = math.exp %232 : vector<4x128xf32>
    %cst_189 = arith.constant 1.000000e+00 : f32
    %234 = vector.broadcast %cst_189 : f32 to vector<4x128xf32>
    %235 = arith.addf %234, %233 : vector<4x128xf32>
    %236 = arith.divf %234, %235 : vector<4x128xf32>
    %237 = math.tanh %231 : vector<4x128xf32>
    %238 = vector.extract_strided_slice %236 {offsets = [0, 0], sizes = [4, 32], strides = [1, 1]} : vector<4x128xf32> to vector<4x32xf32>
    %239 = vector.extract_strided_slice %236 {offsets = [0, 32], sizes = [4, 32], strides = [1, 1]} : vector<4x128xf32> to vector<4x32xf32>
    %240 = vector.extract_strided_slice %236 {offsets = [0, 96], sizes = [4, 32], strides = [1, 1]} : vector<4x128xf32> to vector<4x32xf32>
    %241 = vector.extract_strided_slice %237 {offsets = [0, 64], sizes = [4, 32], strides = [1, 1]} : vector<4x128xf32> to vector<4x32xf32>
    %242 = arith.mulf %239, %224 : vector<4x32xf32>
    %243 = arith.mulf %238, %241 : vector<4x32xf32>
    %244 = arith.addf %242, %243 : vector<4x32xf32>
    %245 = math.tanh %244 : vector<4x32xf32>
    %246 = arith.mulf %240, %245 : vector<4x32xf32>
    %c12_190 = arith.constant 12 : index
    %c0_191 = arith.constant 0 : index
    %247 = vector.load %arg17[%c12_190, %c0_191] : memref<32x32xf32, #tpu.memory_space<vmem>>, vector<4x32xf32>
    tpu.vector_store %arg17[%c12_190, %c0_191], %246 {strides = array<i32>} : memref<32x32xf32, #tpu.memory_space<vmem>>, vector<4x32xf32>,
    %248 = vector.extract_strided_slice %165 {offsets = [16, 0], sizes = [4, 128], strides = [1, 1]} : vector<32x128xf32> to vector<4x128xf32>
    %c0_192 = arith.constant 0 : index
    %c0_193 = arith.constant 0 : index
    %249 = vector.load %arg3[%c0_192, %c0_193] : memref<32x128xf32, #tpu.memory_space<vmem>>, vector<32x128xf32>
    %cst_194 = arith.constant dense<0.000000e+00> : vector<4x128xf32>
    %250 = tpu.matmul %246, %249, %cst_194 {dimension_numbers = #tpu.dot_dimension_numbers<[1], [0], [0], [1], [0, 0, 1, 1], [], []>} : vector<4x32xf32>, vector<32x128xf32>, vector<4x128xf32> -> vector<4x128xf32>
    %251 = arith.addf %248, %250 : vector<4x128xf32>
    %252 = arith.negf %251 : vector<4x128xf32>
    %253 = math.exp %252 : vector<4x128xf32>
    %cst_195 = arith.constant 1.000000e+00 : f32
    %254 = vector.broadcast %cst_195 : f32 to vector<4x128xf32>
    %255 = arith.addf %254, %253 : vector<4x128xf32>
    %256 = arith.divf %254, %255 : vector<4x128xf32>
    %257 = math.tanh %251 : vector<4x128xf32>
    %258 = vector.extract_strided_slice %256 {offsets = [0, 0], sizes = [4, 32], strides = [1, 1]} : vector<4x128xf32> to vector<4x32xf32>
    %259 = vector.extract_strided_slice %256 {offsets = [0, 32], sizes = [4, 32], strides = [1, 1]} : vector<4x128xf32> to vector<4x32xf32>
    %260 = vector.extract_strided_slice %256 {offsets = [0, 96], sizes = [4, 32], strides = [1, 1]} : vector<4x128xf32> to vector<4x32xf32>
    %261 = vector.extract_strided_slice %257 {offsets = [0, 64], sizes = [4, 32], strides = [1, 1]} : vector<4x128xf32> to vector<4x32xf32>
    %262 = arith.mulf %259, %244 : vector<4x32xf32>
    %263 = arith.mulf %258, %261 : vector<4x32xf32>
    %264 = arith.addf %262, %263 : vector<4x32xf32>
    %265 = math.tanh %264 : vector<4x32xf32>
    %266 = arith.mulf %260, %265 : vector<4x32xf32>
    %c16_196 = arith.constant 16 : index
    %c0_197 = arith.constant 0 : index
    %267 = vector.load %arg17[%c16_196, %c0_197] : memref<32x32xf32, #tpu.memory_space<vmem>>, vector<4x32xf32>
    tpu.vector_store %arg17[%c16_196, %c0_197], %266 {strides = array<i32>} : memref<32x32xf32, #tpu.memory_space<vmem>>, vector<4x32xf32>,
    %268 = vector.extract_strided_slice %165 {offsets = [20, 0], sizes = [4, 128], strides = [1, 1]} : vector<32x128xf32> to vector<4x128xf32>
    %c0_198 = arith.constant 0 : index
    %c0_199 = arith.constant 0 : index
    %269 = vector.load %arg3[%c0_198, %c0_199] : memref<32x128xf32, #tpu.memory_space<vmem>>, vector<32x128xf32>
    %cst_200 = arith.constant dense<0.000000e+00> : vector<4x128xf32>
    %270 = tpu.matmul %266, %269, %cst_200 {dimension_numbers = #tpu.dot_dimension_numbers<[1], [0], [0], [1], [0, 0, 1, 1], [], []>} : vector<4x32xf32>, vector<32x128xf32>, vector<4x128xf32> -> vector<4x128xf32>
    %271 = arith.addf %268, %270 : vector<4x128xf32>
    %272 = arith.negf %271 : vector<4x128xf32>
    %273 = math.exp %272 : vector<4x128xf32>
    %cst_201 = arith.constant 1.000000e+00 : f32
    %274 = vector.broadcast %cst_201 : f32 to vector<4x128xf32>
    %275 = arith.addf %274, %273 : vector<4x128xf32>
    %276 = arith.divf %274, %275 : vector<4x128xf32>
    %277 = math.tanh %271 : vector<4x128xf32>
    %278 = vector.extract_strided_slice %276 {offsets = [0, 0], sizes = [4, 32], strides = [1, 1]} : vector<4x128xf32> to vector<4x32xf32>
    %279 = vector.extract_strided_slice %276 {offsets = [0, 32], sizes = [4, 32], strides = [1, 1]} : vector<4x128xf32> to vector<4x32xf32>
    %280 = vector.extract_strided_slice %276 {offsets = [0, 96], sizes = [4, 32], strides = [1, 1]} : vector<4x128xf32> to vector<4x32xf32>
    %281 = vector.extract_strided_slice %277 {offsets = [0, 64], sizes = [4, 32], strides = [1, 1]} : vector<4x128xf32> to vector<4x32xf32>
    %282 = arith.mulf %279, %264 : vector<4x32xf32>
    %283 = arith.mulf %278, %281 : vector<4x32xf32>
    %284 = arith.addf %282, %283 : vector<4x32xf32>
    %285 = math.tanh %284 : vector<4x32xf32>
    %286 = arith.mulf %280, %285 : vector<4x32xf32>
    %c20_202 = arith.constant 20 : index
    %c0_203 = arith.constant 0 : index
    %287 = vector.load %arg17[%c20_202, %c0_203] : memref<32x32xf32, #tpu.memory_space<vmem>>, vector<4x32xf32>
    tpu.vector_store %arg17[%c20_202, %c0_203], %286 {strides = array<i32>} : memref<32x32xf32, #tpu.memory_space<vmem>>, vector<4x32xf32>,
    %288 = vector.extract_strided_slice %165 {offsets = [24, 0], sizes = [4, 128], strides = [1, 1]} : vector<32x128xf32> to vector<4x128xf32>
    %c0_204 = arith.constant 0 : index
    %c0_205 = arith.constant 0 : index
    %289 = vector.load %arg3[%c0_204, %c0_205] : memref<32x128xf32, #tpu.memory_space<vmem>>, vector<32x128xf32>
    %cst_206 = arith.constant dense<0.000000e+00> : vector<4x128xf32>
    %290 = tpu.matmul %286, %289, %cst_206 {dimension_numbers = #tpu.dot_dimension_numbers<[1], [0], [0], [1], [0, 0, 1, 1], [], []>} : vector<4x32xf32>, vector<32x128xf32>, vector<4x128xf32> -> vector<4x128xf32>
    %291 = arith.addf %288, %290 : vector<4x128xf32>
    %292 = arith.negf %291 : vector<4x128xf32>
    %293 = math.exp %292 : vector<4x128xf32>
    %cst_207 = arith.constant 1.000000e+00 : f32
    %294 = vector.broadcast %cst_207 : f32 to vector<4x128xf32>
    %295 = arith.addf %294, %293 : vector<4x128xf32>
    %296 = arith.divf %294, %295 : vector<4x128xf32>
    %297 = math.tanh %291 : vector<4x128xf32>
    %298 = vector.extract_strided_slice %296 {offsets = [0, 0], sizes = [4, 32], strides = [1, 1]} : vector<4x128xf32> to vector<4x32xf32>
    %299 = vector.extract_strided_slice %296 {offsets = [0, 32], sizes = [4, 32], strides = [1, 1]} : vector<4x128xf32> to vector<4x32xf32>
    %300 = vector.extract_strided_slice %296 {offsets = [0, 96], sizes = [4, 32], strides = [1, 1]} : vector<4x128xf32> to vector<4x32xf32>
    %301 = vector.extract_strided_slice %297 {offsets = [0, 64], sizes = [4, 32], strides = [1, 1]} : vector<4x128xf32> to vector<4x32xf32>
    %302 = arith.mulf %299, %284 : vector<4x32xf32>
    %303 = arith.mulf %298, %301 : vector<4x32xf32>
    %304 = arith.addf %302, %303 : vector<4x32xf32>
    %305 = math.tanh %304 : vector<4x32xf32>
    %306 = arith.mulf %300, %305 : vector<4x32xf32>
    %c24_208 = arith.constant 24 : index
    %c0_209 = arith.constant 0 : index
    %307 = vector.load %arg17[%c24_208, %c0_209] : memref<32x32xf32, #tpu.memory_space<vmem>>, vector<4x32xf32>
    tpu.vector_store %arg17[%c24_208, %c0_209], %306 {strides = array<i32>} : memref<32x32xf32, #tpu.memory_space<vmem>>, vector<4x32xf32>,
    %308 = vector.extract_strided_slice %165 {offsets = [28, 0], sizes = [4, 128], strides = [1, 1]} : vector<32x128xf32> to vector<4x128xf32>
    %c0_210 = arith.constant 0 : index
    %c0_211 = arith.constant 0 : index
    %309 = vector.load %arg3[%c0_210, %c0_211] : memref<32x128xf32, #tpu.memory_space<vmem>>, vector<32x128xf32>
    %cst_212 = arith.constant dense<0.000000e+00> : vector<4x128xf32>
    %310 = tpu.matmul %306, %309, %cst_212 {dimension_numbers = #tpu.dot_dimension_numbers<[1], [0], [0], [1], [0, 0, 1, 1], [], []>} : vector<4x32xf32>, vector<32x128xf32>, vector<4x128xf32> -> vector<4x128xf32>
    %311 = arith.addf %308, %310 : vector<4x128xf32>
    %312 = arith.negf %311 : vector<4x128xf32>
    %313 = math.exp %312 : vector<4x128xf32>
    %cst_213 = arith.constant 1.000000e+00 : f32
    %314 = vector.broadcast %cst_213 : f32 to vector<4x128xf32>
    %315 = arith.addf %314, %313 : vector<4x128xf32>
    %316 = arith.divf %314, %315 : vector<4x128xf32>
    %317 = math.tanh %311 : vector<4x128xf32>
    %318 = vector.extract_strided_slice %316 {offsets = [0, 0], sizes = [4, 32], strides = [1, 1]} : vector<4x128xf32> to vector<4x32xf32>
    %319 = vector.extract_strided_slice %316 {offsets = [0, 32], sizes = [4, 32], strides = [1, 1]} : vector<4x128xf32> to vector<4x32xf32>
    %320 = vector.extract_strided_slice %316 {offsets = [0, 96], sizes = [4, 32], strides = [1, 1]} : vector<4x128xf32> to vector<4x32xf32>
    %321 = vector.extract_strided_slice %317 {offsets = [0, 64], sizes = [4, 32], strides = [1, 1]} : vector<4x128xf32> to vector<4x32xf32>
    %322 = arith.mulf %319, %304 : vector<4x32xf32>
    %323 = arith.mulf %318, %321 : vector<4x32xf32>
    %324 = arith.addf %322, %323 : vector<4x32xf32>
    %325 = math.tanh %324 : vector<4x32xf32>
    %326 = arith.mulf %320, %325 : vector<4x32xf32>
    %c28_214 = arith.constant 28 : index
    %c0_215 = arith.constant 0 : index
    %327 = vector.load %arg17[%c28_214, %c0_215] : memref<32x32xf32, #tpu.memory_space<vmem>>, vector<4x32xf32>
    tpu.vector_store %arg17[%c28_214, %c0_215], %326 {strides = array<i32>} : memref<32x32xf32, #tpu.memory_space<vmem>>, vector<4x32xf32>,
    %c0_216 = arith.constant 0 : index
    %c0_217 = arith.constant 0 : index
    %328 = vector.load %arg17[%c0_216, %c0_217] : memref<32x32xf32, #tpu.memory_space<vmem>>, vector<32x32xf32>
    %c0_218 = arith.constant 0 : index
    %c0_219 = arith.constant 0 : index
    %329 = vector.load %arg5[%c0_218, %c0_219] : memref<32x128xf32, #tpu.memory_space<vmem>>, vector<32x128xf32>
    %cst_220 = arith.constant dense<0.000000e+00> : vector<32x128xf32>
    %330 = tpu.matmul %328, %329, %cst_220 {dimension_numbers = #tpu.dot_dimension_numbers<[1], [0], [0], [1], [0, 0, 1, 1], [], []>} : vector<32x32xf32>, vector<32x128xf32>, vector<32x128xf32> -> vector<32x128xf32>
    %c0_221 = arith.constant 0 : index
    %c0_222 = arith.constant 0 : index
    %331 = vector.load %arg7[%c0_221, %c0_222] : memref<1x128xf32, #tpu.memory_space<vmem>>, vector<1x128xf32>
    %332 = vector.broadcast %331 : vector<1x128xf32> to vector<32x128xf32>
    %333 = arith.addf %330, %332 : vector<32x128xf32>
    %cst_223 = arith.constant 0.000000e+00 : f32
    %334 = vector.broadcast %cst_223 : f32 to vector<4x32xf32>
    %cst_224 = arith.constant 0.000000e+00 : f32
    %335 = vector.broadcast %cst_224 : f32 to vector<4x32xf32>
    %336 = vector.extract_strided_slice %333 {offsets = [0, 0], sizes = [4, 128], strides = [1, 1]} : vector<32x128xf32> to vector<4x128xf32>
    %c0_225 = arith.constant 0 : index
    %c0_226 = arith.constant 0 : index
    %337 = vector.load %arg6[%c0_225, %c0_226] : memref<32x128xf32, #tpu.memory_space<vmem>>, vector<32x128xf32>
    %cst_227 = arith.constant dense<0.000000e+00> : vector<4x128xf32>
    %338 = tpu.matmul %334, %337, %cst_227 {dimension_numbers = #tpu.dot_dimension_numbers<[1], [0], [0], [1], [0, 0, 1, 1], [], []>} : vector<4x32xf32>, vector<32x128xf32>, vector<4x128xf32> -> vector<4x128xf32>
    %339 = arith.addf %336, %338 : vector<4x128xf32>
    %340 = arith.negf %339 : vector<4x128xf32>
    %341 = math.exp %340 : vector<4x128xf32>
    %cst_228 = arith.constant 1.000000e+00 : f32
    %342 = vector.broadcast %cst_228 : f32 to vector<4x128xf32>
    %343 = arith.addf %342, %341 : vector<4x128xf32>
    %344 = arith.divf %342, %343 : vector<4x128xf32>
    %345 = math.tanh %339 : vector<4x128xf32>
    %346 = vector.extract_strided_slice %344 {offsets = [0, 0], sizes = [4, 32], strides = [1, 1]} : vector<4x128xf32> to vector<4x32xf32>
    %347 = vector.extract_strided_slice %344 {offsets = [0, 32], sizes = [4, 32], strides = [1, 1]} : vector<4x128xf32> to vector<4x32xf32>
    %348 = vector.extract_strided_slice %344 {offsets = [0, 96], sizes = [4, 32], strides = [1, 1]} : vector<4x128xf32> to vector<4x32xf32>
    %349 = vector.extract_strided_slice %345 {offsets = [0, 64], sizes = [4, 32], strides = [1, 1]} : vector<4x128xf32> to vector<4x32xf32>
    %350 = arith.mulf %347, %335 : vector<4x32xf32>
    %351 = arith.mulf %346, %349 : vector<4x32xf32>
    %352 = arith.addf %350, %351 : vector<4x32xf32>
    %353 = math.tanh %352 : vector<4x32xf32>
    %354 = arith.mulf %348, %353 : vector<4x32xf32>
    %355 = vector.extract_strided_slice %333 {offsets = [4, 0], sizes = [4, 128], strides = [1, 1]} : vector<32x128xf32> to vector<4x128xf32>
    %c0_229 = arith.constant 0 : index
    %c0_230 = arith.constant 0 : index
    %356 = vector.load %arg6[%c0_229, %c0_230] : memref<32x128xf32, #tpu.memory_space<vmem>>, vector<32x128xf32>
    %cst_231 = arith.constant dense<0.000000e+00> : vector<4x128xf32>
    %357 = tpu.matmul %354, %356, %cst_231 {dimension_numbers = #tpu.dot_dimension_numbers<[1], [0], [0], [1], [0, 0, 1, 1], [], []>} : vector<4x32xf32>, vector<32x128xf32>, vector<4x128xf32> -> vector<4x128xf32>
    %358 = arith.addf %355, %357 : vector<4x128xf32>
    %359 = arith.negf %358 : vector<4x128xf32>
    %360 = math.exp %359 : vector<4x128xf32>
    %cst_232 = arith.constant 1.000000e+00 : f32
    %361 = vector.broadcast %cst_232 : f32 to vector<4x128xf32>
    %362 = arith.addf %361, %360 : vector<4x128xf32>
    %363 = arith.divf %361, %362 : vector<4x128xf32>
    %364 = math.tanh %358 : vector<4x128xf32>
    %365 = vector.extract_strided_slice %363 {offsets = [0, 0], sizes = [4, 32], strides = [1, 1]} : vector<4x128xf32> to vector<4x32xf32>
    %366 = vector.extract_strided_slice %363 {offsets = [0, 32], sizes = [4, 32], strides = [1, 1]} : vector<4x128xf32> to vector<4x32xf32>
    %367 = vector.extract_strided_slice %363 {offsets = [0, 96], sizes = [4, 32], strides = [1, 1]} : vector<4x128xf32> to vector<4x32xf32>
    %368 = vector.extract_strided_slice %364 {offsets = [0, 64], sizes = [4, 32], strides = [1, 1]} : vector<4x128xf32> to vector<4x32xf32>
    %369 = arith.mulf %366, %352 : vector<4x32xf32>
    %370 = arith.mulf %365, %368 : vector<4x32xf32>
    %371 = arith.addf %369, %370 : vector<4x32xf32>
    %372 = math.tanh %371 : vector<4x32xf32>
    %373 = arith.mulf %367, %372 : vector<4x32xf32>
    %374 = vector.extract_strided_slice %333 {offsets = [8, 0], sizes = [4, 128], strides = [1, 1]} : vector<32x128xf32> to vector<4x128xf32>
    %c0_233 = arith.constant 0 : index
    %c0_234 = arith.constant 0 : index
    %375 = vector.load %arg6[%c0_233, %c0_234] : memref<32x128xf32, #tpu.memory_space<vmem>>, vector<32x128xf32>
    %cst_235 = arith.constant dense<0.000000e+00> : vector<4x128xf32>
    %376 = tpu.matmul %373, %375, %cst_235 {dimension_numbers = #tpu.dot_dimension_numbers<[1], [0], [0], [1], [0, 0, 1, 1], [], []>} : vector<4x32xf32>, vector<32x128xf32>, vector<4x128xf32> -> vector<4x128xf32>
    %377 = arith.addf %374, %376 : vector<4x128xf32>
    %378 = arith.negf %377 : vector<4x128xf32>
    %379 = math.exp %378 : vector<4x128xf32>
    %cst_236 = arith.constant 1.000000e+00 : f32
    %380 = vector.broadcast %cst_236 : f32 to vector<4x128xf32>
    %381 = arith.addf %380, %379 : vector<4x128xf32>
    %382 = arith.divf %380, %381 : vector<4x128xf32>
    %383 = math.tanh %377 : vector<4x128xf32>
    %384 = vector.extract_strided_slice %382 {offsets = [0, 0], sizes = [4, 32], strides = [1, 1]} : vector<4x128xf32> to vector<4x32xf32>
    %385 = vector.extract_strided_slice %382 {offsets = [0, 32], sizes = [4, 32], strides = [1, 1]} : vector<4x128xf32> to vector<4x32xf32>
    %386 = vector.extract_strided_slice %382 {offsets = [0, 96], sizes = [4, 32], strides = [1, 1]} : vector<4x128xf32> to vector<4x32xf32>
    %387 = vector.extract_strided_slice %383 {offsets = [0, 64], sizes = [4, 32], strides = [1, 1]} : vector<4x128xf32> to vector<4x32xf32>
    %388 = arith.mulf %385, %371 : vector<4x32xf32>
    %389 = arith.mulf %384, %387 : vector<4x32xf32>
    %390 = arith.addf %388, %389 : vector<4x32xf32>
    %391 = math.tanh %390 : vector<4x32xf32>
    %392 = arith.mulf %386, %391 : vector<4x32xf32>
    %393 = vector.extract_strided_slice %333 {offsets = [12, 0], sizes = [4, 128], strides = [1, 1]} : vector<32x128xf32> to vector<4x128xf32>
    %c0_237 = arith.constant 0 : index
    %c0_238 = arith.constant 0 : index
    %394 = vector.load %arg6[%c0_237, %c0_238] : memref<32x128xf32, #tpu.memory_space<vmem>>, vector<32x128xf32>
    %cst_239 = arith.constant dense<0.000000e+00> : vector<4x128xf32>
    %395 = tpu.matmul %392, %394, %cst_239 {dimension_numbers = #tpu.dot_dimension_numbers<[1], [0], [0], [1], [0, 0, 1, 1], [], []>} : vector<4x32xf32>, vector<32x128xf32>, vector<4x128xf32> -> vector<4x128xf32>
    %396 = arith.addf %393, %395 : vector<4x128xf32>
    %397 = arith.negf %396 : vector<4x128xf32>
    %398 = math.exp %397 : vector<4x128xf32>
    %cst_240 = arith.constant 1.000000e+00 : f32
    %399 = vector.broadcast %cst_240 : f32 to vector<4x128xf32>
    %400 = arith.addf %399, %398 : vector<4x128xf32>
    %401 = arith.divf %399, %400 : vector<4x128xf32>
    %402 = math.tanh %396 : vector<4x128xf32>
    %403 = vector.extract_strided_slice %401 {offsets = [0, 0], sizes = [4, 32], strides = [1, 1]} : vector<4x128xf32> to vector<4x32xf32>
    %404 = vector.extract_strided_slice %401 {offsets = [0, 32], sizes = [4, 32], strides = [1, 1]} : vector<4x128xf32> to vector<4x32xf32>
    %405 = vector.extract_strided_slice %401 {offsets = [0, 96], sizes = [4, 32], strides = [1, 1]} : vector<4x128xf32> to vector<4x32xf32>
    %406 = vector.extract_strided_slice %402 {offsets = [0, 64], sizes = [4, 32], strides = [1, 1]} : vector<4x128xf32> to vector<4x32xf32>
    %407 = arith.mulf %404, %390 : vector<4x32xf32>
    %408 = arith.mulf %403, %406 : vector<4x32xf32>
    %409 = arith.addf %407, %408 : vector<4x32xf32>
    %410 = math.tanh %409 : vector<4x32xf32>
    %411 = arith.mulf %405, %410 : vector<4x32xf32>
    %412 = vector.extract_strided_slice %333 {offsets = [16, 0], sizes = [4, 128], strides = [1, 1]} : vector<32x128xf32> to vector<4x128xf32>
    %c0_241 = arith.constant 0 : index
    %c0_242 = arith.constant 0 : index
    %413 = vector.load %arg6[%c0_241, %c0_242] : memref<32x128xf32, #tpu.memory_space<vmem>>, vector<32x128xf32>
    %cst_243 = arith.constant dense<0.000000e+00> : vector<4x128xf32>
    %414 = tpu.matmul %411, %413, %cst_243 {dimension_numbers = #tpu.dot_dimension_numbers<[1], [0], [0], [1], [0, 0, 1, 1], [], []>} : vector<4x32xf32>, vector<32x128xf32>, vector<4x128xf32> -> vector<4x128xf32>
    %415 = arith.addf %412, %414 : vector<4x128xf32>
    %416 = arith.negf %415 : vector<4x128xf32>
    %417 = math.exp %416 : vector<4x128xf32>
    %cst_244 = arith.constant 1.000000e+00 : f32
    %418 = vector.broadcast %cst_244 : f32 to vector<4x128xf32>
    %419 = arith.addf %418, %417 : vector<4x128xf32>
    %420 = arith.divf %418, %419 : vector<4x128xf32>
    %421 = math.tanh %415 : vector<4x128xf32>
    %422 = vector.extract_strided_slice %420 {offsets = [0, 0], sizes = [4, 32], strides = [1, 1]} : vector<4x128xf32> to vector<4x32xf32>
    %423 = vector.extract_strided_slice %420 {offsets = [0, 32], sizes = [4, 32], strides = [1, 1]} : vector<4x128xf32> to vector<4x32xf32>
    %424 = vector.extract_strided_slice %420 {offsets = [0, 96], sizes = [4, 32], strides = [1, 1]} : vector<4x128xf32> to vector<4x32xf32>
    %425 = vector.extract_strided_slice %421 {offsets = [0, 64], sizes = [4, 32], strides = [1, 1]} : vector<4x128xf32> to vector<4x32xf32>
    %426 = arith.mulf %423, %409 : vector<4x32xf32>
    %427 = arith.mulf %422, %425 : vector<4x32xf32>
    %428 = arith.addf %426, %427 : vector<4x32xf32>
    %429 = math.tanh %428 : vector<4x32xf32>
    %430 = arith.mulf %424, %429 : vector<4x32xf32>
    %431 = vector.extract_strided_slice %333 {offsets = [20, 0], sizes = [4, 128], strides = [1, 1]} : vector<32x128xf32> to vector<4x128xf32>
    %c0_245 = arith.constant 0 : index
    %c0_246 = arith.constant 0 : index
    %432 = vector.load %arg6[%c0_245, %c0_246] : memref<32x128xf32, #tpu.memory_space<vmem>>, vector<32x128xf32>
    %cst_247 = arith.constant dense<0.000000e+00> : vector<4x128xf32>
    %433 = tpu.matmul %430, %432, %cst_247 {dimension_numbers = #tpu.dot_dimension_numbers<[1], [0], [0], [1], [0, 0, 1, 1], [], []>} : vector<4x32xf32>, vector<32x128xf32>, vector<4x128xf32> -> vector<4x128xf32>
    %434 = arith.addf %431, %433 : vector<4x128xf32>
    %435 = arith.negf %434 : vector<4x128xf32>
    %436 = math.exp %435 : vector<4x128xf32>
    %cst_248 = arith.constant 1.000000e+00 : f32
    %437 = vector.broadcast %cst_248 : f32 to vector<4x128xf32>
    %438 = arith.addf %437, %436 : vector<4x128xf32>
    %439 = arith.divf %437, %438 : vector<4x128xf32>
    %440 = math.tanh %434 : vector<4x128xf32>
    %441 = vector.extract_strided_slice %439 {offsets = [0, 0], sizes = [4, 32], strides = [1, 1]} : vector<4x128xf32> to vector<4x32xf32>
    %442 = vector.extract_strided_slice %439 {offsets = [0, 32], sizes = [4, 32], strides = [1, 1]} : vector<4x128xf32> to vector<4x32xf32>
    %443 = vector.extract_strided_slice %439 {offsets = [0, 96], sizes = [4, 32], strides = [1, 1]} : vector<4x128xf32> to vector<4x32xf32>
    %444 = vector.extract_strided_slice %440 {offsets = [0, 64], sizes = [4, 32], strides = [1, 1]} : vector<4x128xf32> to vector<4x32xf32>
    %445 = arith.mulf %442, %428 : vector<4x32xf32>
    %446 = arith.mulf %441, %444 : vector<4x32xf32>
    %447 = arith.addf %445, %446 : vector<4x32xf32>
    %448 = math.tanh %447 : vector<4x32xf32>
    %449 = arith.mulf %443, %448 : vector<4x32xf32>
    %450 = vector.extract_strided_slice %333 {offsets = [24, 0], sizes = [4, 128], strides = [1, 1]} : vector<32x128xf32> to vector<4x128xf32>
    %c0_249 = arith.constant 0 : index
    %c0_250 = arith.constant 0 : index
    %451 = vector.load %arg6[%c0_249, %c0_250] : memref<32x128xf32, #tpu.memory_space<vmem>>, vector<32x128xf32>
    %cst_251 = arith.constant dense<0.000000e+00> : vector<4x128xf32>
    %452 = tpu.matmul %449, %451, %cst_251 {dimension_numbers = #tpu.dot_dimension_numbers<[1], [0], [0], [1], [0, 0, 1, 1], [], []>} : vector<4x32xf32>, vector<32x128xf32>, vector<4x128xf32> -> vector<4x128xf32>
    %453 = arith.addf %450, %452 : vector<4x128xf32>
    %454 = arith.negf %453 : vector<4x128xf32>
    %455 = math.exp %454 : vector<4x128xf32>
    %cst_252 = arith.constant 1.000000e+00 : f32
    %456 = vector.broadcast %cst_252 : f32 to vector<4x128xf32>
    %457 = arith.addf %456, %455 : vector<4x128xf32>
    %458 = arith.divf %456, %457 : vector<4x128xf32>
    %459 = math.tanh %453 : vector<4x128xf32>
    %460 = vector.extract_strided_slice %458 {offsets = [0, 0], sizes = [4, 32], strides = [1, 1]} : vector<4x128xf32> to vector<4x32xf32>
    %461 = vector.extract_strided_slice %458 {offsets = [0, 32], sizes = [4, 32], strides = [1, 1]} : vector<4x128xf32> to vector<4x32xf32>
    %462 = vector.extract_strided_slice %458 {offsets = [0, 96], sizes = [4, 32], strides = [1, 1]} : vector<4x128xf32> to vector<4x32xf32>
    %463 = vector.extract_strided_slice %459 {offsets = [0, 64], sizes = [4, 32], strides = [1, 1]} : vector<4x128xf32> to vector<4x32xf32>
    %464 = arith.mulf %461, %447 : vector<4x32xf32>
    %465 = arith.mulf %460, %463 : vector<4x32xf32>
    %466 = arith.addf %464, %465 : vector<4x32xf32>
    %467 = math.tanh %466 : vector<4x32xf32>
    %468 = arith.mulf %462, %467 : vector<4x32xf32>
    %469 = vector.extract_strided_slice %333 {offsets = [28, 0], sizes = [4, 128], strides = [1, 1]} : vector<32x128xf32> to vector<4x128xf32>
    %c0_253 = arith.constant 0 : index
    %c0_254 = arith.constant 0 : index
    %470 = vector.load %arg6[%c0_253, %c0_254] : memref<32x128xf32, #tpu.memory_space<vmem>>, vector<32x128xf32>
    %cst_255 = arith.constant dense<0.000000e+00> : vector<4x128xf32>
    %471 = tpu.matmul %468, %470, %cst_255 {dimension_numbers = #tpu.dot_dimension_numbers<[1], [0], [0], [1], [0, 0, 1, 1], [], []>} : vector<4x32xf32>, vector<32x128xf32>, vector<4x128xf32> -> vector<4x128xf32>
    %472 = arith.addf %469, %471 : vector<4x128xf32>
    %473 = arith.negf %472 : vector<4x128xf32>
    %474 = math.exp %473 : vector<4x128xf32>
    %cst_256 = arith.constant 1.000000e+00 : f32
    %475 = vector.broadcast %cst_256 : f32 to vector<4x128xf32>
    %476 = arith.addf %475, %474 : vector<4x128xf32>
    %477 = arith.divf %475, %476 : vector<4x128xf32>
    %478 = math.tanh %472 : vector<4x128xf32>
    %479 = vector.extract_strided_slice %477 {offsets = [0, 0], sizes = [4, 32], strides = [1, 1]} : vector<4x128xf32> to vector<4x32xf32>
    %480 = vector.extract_strided_slice %477 {offsets = [0, 32], sizes = [4, 32], strides = [1, 1]} : vector<4x128xf32> to vector<4x32xf32>
    %481 = vector.extract_strided_slice %477 {offsets = [0, 96], sizes = [4, 32], strides = [1, 1]} : vector<4x128xf32> to vector<4x32xf32>
    %482 = vector.extract_strided_slice %478 {offsets = [0, 64], sizes = [4, 32], strides = [1, 1]} : vector<4x128xf32> to vector<4x32xf32>
    %483 = arith.mulf %480, %466 : vector<4x32xf32>
    %484 = arith.mulf %479, %482 : vector<4x32xf32>
    %485 = arith.addf %483, %484 : vector<4x32xf32>
    %486 = math.tanh %485 : vector<4x32xf32>
    %487 = arith.mulf %481, %486 : vector<4x32xf32>
    %c0_257 = arith.constant 0 : index
    %c0_258 = arith.constant 0 : index
    %488 = vector.load %arg8[%c0_257, %c0_258] : memref<32x32xf32, #tpu.memory_space<vmem>>, vector<32x32xf32>
    %cst_259 = arith.constant dense<0.000000e+00> : vector<4x32xf32>
    %489 = tpu.matmul %487, %488, %cst_259 {dimension_numbers = #tpu.dot_dimension_numbers<[1], [0], [0], [1], [0, 0, 1, 1], [], []>} : vector<4x32xf32>, vector<32x32xf32>, vector<4x32xf32> -> vector<4x32xf32>
    %c0_260 = arith.constant 0 : index
    %c0_261 = arith.constant 0 : index
    %490 = vector.load %arg10[%c0_260, %c0_261] : memref<1x32xf32, #tpu.memory_space<vmem>>, vector<1x32xf32>
    %491 = vector.broadcast %490 : vector<1x32xf32> to vector<4x32xf32>
    %492 = arith.addf %489, %491 : vector<4x32xf32>
    %cst_262 = arith.constant 0.000000e+00 : f32
    %493 = vector.broadcast %cst_262 : f32 to vector<4x8xf32>
    %cst_263 = arith.constant 0.000000e+00 : f32
    %494 = vector.broadcast %cst_263 : f32 to vector<4x8xf32>
    %c0_264 = arith.constant 0 : index
    %c0_265 = arith.constant 0 : index
    %495 = vector.load %arg9[%c0_264, %c0_265] : memref<8x32xf32, #tpu.memory_space<vmem>>, vector<8x32xf32>
    %cst_266 = arith.constant dense<0.000000e+00> : vector<4x32xf32>
    %496 = tpu.matmul %493, %495, %cst_266 {dimension_numbers = #tpu.dot_dimension_numbers<[1], [0], [0], [1], [0, 0, 1, 1], [], []>} : vector<4x8xf32>, vector<8x32xf32>, vector<4x32xf32> -> vector<4x32xf32>
    %497 = arith.addf %492, %496 : vector<4x32xf32>
    %498 = arith.negf %497 : vector<4x32xf32>
    %499 = math.exp %498 : vector<4x32xf32>
    %cst_267 = arith.constant 1.000000e+00 : f32
    %500 = vector.broadcast %cst_267 : f32 to vector<4x32xf32>
    %501 = arith.addf %500, %499 : vector<4x32xf32>
    %502 = arith.divf %500, %501 : vector<4x32xf32>
    %503 = math.tanh %497 : vector<4x32xf32>
    %504 = vector.extract_strided_slice %502 {offsets = [0, 0], sizes = [4, 8], strides = [1, 1]} : vector<4x32xf32> to vector<4x8xf32>
    %505 = vector.extract_strided_slice %502 {offsets = [0, 8], sizes = [4, 8], strides = [1, 1]} : vector<4x32xf32> to vector<4x8xf32>
    %506 = vector.extract_strided_slice %502 {offsets = [0, 24], sizes = [4, 8], strides = [1, 1]} : vector<4x32xf32> to vector<4x8xf32>
    %507 = vector.extract_strided_slice %503 {offsets = [0, 16], sizes = [4, 8], strides = [1, 1]} : vector<4x32xf32> to vector<4x8xf32>
    %508 = arith.mulf %505, %494 : vector<4x8xf32>
    %509 = arith.mulf %504, %507 : vector<4x8xf32>
    %510 = arith.addf %508, %509 : vector<4x8xf32>
    %511 = math.tanh %510 : vector<4x8xf32>
    %512 = arith.mulf %506, %511 : vector<4x8xf32>
    %c0_268 = arith.constant 0 : index
    %c0_269 = arith.constant 0 : index
    %513 = vector.load %arg18[%c0_268, %c0_269] : memref<32x8xf32, #tpu.memory_space<vmem>>, vector<4x8xf32>
    tpu.vector_store %arg18[%c0_268, %c0_269], %512 {strides = array<i32>} : memref<32x8xf32, #tpu.memory_space<vmem>>, vector<4x8xf32>,
    %c0_270 = arith.constant 0 : index
    %c0_271 = arith.constant 0 : index
    %514 = vector.load %arg9[%c0_270, %c0_271] : memref<8x32xf32, #tpu.memory_space<vmem>>, vector<8x32xf32>
    %cst_272 = arith.constant dense<0.000000e+00> : vector<4x32xf32>
    %515 = tpu.matmul %512, %514, %cst_272 {dimension_numbers = #tpu.dot_dimension_numbers<[1], [0], [0], [1], [0, 0, 1, 1], [], []>} : vector<4x8xf32>, vector<8x32xf32>, vector<4x32xf32> -> vector<4x32xf32>
    %516 = arith.addf %492, %515 : vector<4x32xf32>
    %517 = arith.negf %516 : vector<4x32xf32>
    %518 = math.exp %517 : vector<4x32xf32>
    %cst_273 = arith.constant 1.000000e+00 : f32
    %519 = vector.broadcast %cst_273 : f32 to vector<4x32xf32>
    %520 = arith.addf %519, %518 : vector<4x32xf32>
    %521 = arith.divf %519, %520 : vector<4x32xf32>
    %522 = math.tanh %516 : vector<4x32xf32>
    %523 = vector.extract_strided_slice %521 {offsets = [0, 0], sizes = [4, 8], strides = [1, 1]} : vector<4x32xf32> to vector<4x8xf32>
    %524 = vector.extract_strided_slice %521 {offsets = [0, 8], sizes = [4, 8], strides = [1, 1]} : vector<4x32xf32> to vector<4x8xf32>
    %525 = vector.extract_strided_slice %521 {offsets = [0, 24], sizes = [4, 8], strides = [1, 1]} : vector<4x32xf32> to vector<4x8xf32>
    %526 = vector.extract_strided_slice %522 {offsets = [0, 16], sizes = [4, 8], strides = [1, 1]} : vector<4x32xf32> to vector<4x8xf32>
    %527 = arith.mulf %524, %510 : vector<4x8xf32>
    %528 = arith.mulf %523, %526 : vector<4x8xf32>
    %529 = arith.addf %527, %528 : vector<4x8xf32>
    %530 = math.tanh %529 : vector<4x8xf32>
    %531 = arith.mulf %525, %530 : vector<4x8xf32>
    %c4_274 = arith.constant 4 : index
    %c0_275 = arith.constant 0 : index
    %532 = vector.load %arg18[%c4_274, %c0_275] : memref<32x8xf32, #tpu.memory_space<vmem>>, vector<4x8xf32>
    tpu.vector_store %arg18[%c4_274, %c0_275], %531 {strides = array<i32>} : memref<32x8xf32, #tpu.memory_space<vmem>>, vector<4x8xf32>,
    %c0_276 = arith.constant 0 : index
    %c0_277 = arith.constant 0 : index
    %533 = vector.load %arg9[%c0_276, %c0_277] : memref<8x32xf32, #tpu.memory_space<vmem>>, vector<8x32xf32>
    %cst_278 = arith.constant dense<0.000000e+00> : vector<4x32xf32>
    %534 = tpu.matmul %531, %533, %cst_278 {dimension_numbers = #tpu.dot_dimension_numbers<[1], [0], [0], [1], [0, 0, 1, 1], [], []>} : vector<4x8xf32>, vector<8x32xf32>, vector<4x32xf32> -> vector<4x32xf32>
    %535 = arith.addf %492, %534 : vector<4x32xf32>
    %536 = arith.negf %535 : vector<4x32xf32>
    %537 = math.exp %536 : vector<4x32xf32>
    %cst_279 = arith.constant 1.000000e+00 : f32
    %538 = vector.broadcast %cst_279 : f32 to vector<4x32xf32>
    %539 = arith.addf %538, %537 : vector<4x32xf32>
    %540 = arith.divf %538, %539 : vector<4x32xf32>
    %541 = math.tanh %535 : vector<4x32xf32>
    %542 = vector.extract_strided_slice %540 {offsets = [0, 0], sizes = [4, 8], strides = [1, 1]} : vector<4x32xf32> to vector<4x8xf32>
    %543 = vector.extract_strided_slice %540 {offsets = [0, 8], sizes = [4, 8], strides = [1, 1]} : vector<4x32xf32> to vector<4x8xf32>
    %544 = vector.extract_strided_slice %540 {offsets = [0, 24], sizes = [4, 8], strides = [1, 1]} : vector<4x32xf32> to vector<4x8xf32>
    %545 = vector.extract_strided_slice %541 {offsets = [0, 16], sizes = [4, 8], strides = [1, 1]} : vector<4x32xf32> to vector<4x8xf32>
    %546 = arith.mulf %543, %529 : vector<4x8xf32>
    %547 = arith.mulf %542, %545 : vector<4x8xf32>
    %548 = arith.addf %546, %547 : vector<4x8xf32>
    %549 = math.tanh %548 : vector<4x8xf32>
    %550 = arith.mulf %544, %549 : vector<4x8xf32>
    %c8_280 = arith.constant 8 : index
    %c0_281 = arith.constant 0 : index
    %551 = vector.load %arg18[%c8_280, %c0_281] : memref<32x8xf32, #tpu.memory_space<vmem>>, vector<4x8xf32>
    tpu.vector_store %arg18[%c8_280, %c0_281], %550 {strides = array<i32>} : memref<32x8xf32, #tpu.memory_space<vmem>>, vector<4x8xf32>,
    %c0_282 = arith.constant 0 : index
    %c0_283 = arith.constant 0 : index
    %552 = vector.load %arg9[%c0_282, %c0_283] : memref<8x32xf32, #tpu.memory_space<vmem>>, vector<8x32xf32>
    %cst_284 = arith.constant dense<0.000000e+00> : vector<4x32xf32>
    %553 = tpu.matmul %550, %552, %cst_284 {dimension_numbers = #tpu.dot_dimension_numbers<[1], [0], [0], [1], [0, 0, 1, 1], [], []>} : vector<4x8xf32>, vector<8x32xf32>, vector<4x32xf32> -> vector<4x32xf32>
    %554 = arith.addf %492, %553 : vector<4x32xf32>
    %555 = arith.negf %554 : vector<4x32xf32>
    %556 = math.exp %555 : vector<4x32xf32>
    %cst_285 = arith.constant 1.000000e+00 : f32
    %557 = vector.broadcast %cst_285 : f32 to vector<4x32xf32>
    %558 = arith.addf %557, %556 : vector<4x32xf32>
    %559 = arith.divf %557, %558 : vector<4x32xf32>
    %560 = math.tanh %554 : vector<4x32xf32>
    %561 = vector.extract_strided_slice %559 {offsets = [0, 0], sizes = [4, 8], strides = [1, 1]} : vector<4x32xf32> to vector<4x8xf32>
    %562 = vector.extract_strided_slice %559 {offsets = [0, 8], sizes = [4, 8], strides = [1, 1]} : vector<4x32xf32> to vector<4x8xf32>
    %563 = vector.extract_strided_slice %559 {offsets = [0, 24], sizes = [4, 8], strides = [1, 1]} : vector<4x32xf32> to vector<4x8xf32>
    %564 = vector.extract_strided_slice %560 {offsets = [0, 16], sizes = [4, 8], strides = [1, 1]} : vector<4x32xf32> to vector<4x8xf32>
    %565 = arith.mulf %562, %548 : vector<4x8xf32>
    %566 = arith.mulf %561, %564 : vector<4x8xf32>
    %567 = arith.addf %565, %566 : vector<4x8xf32>
    %568 = math.tanh %567 : vector<4x8xf32>
    %569 = arith.mulf %563, %568 : vector<4x8xf32>
    %c12_286 = arith.constant 12 : index
    %c0_287 = arith.constant 0 : index
    %570 = vector.load %arg18[%c12_286, %c0_287] : memref<32x8xf32, #tpu.memory_space<vmem>>, vector<4x8xf32>
    tpu.vector_store %arg18[%c12_286, %c0_287], %569 {strides = array<i32>} : memref<32x8xf32, #tpu.memory_space<vmem>>, vector<4x8xf32>,
    %c0_288 = arith.constant 0 : index
    %c0_289 = arith.constant 0 : index
    %571 = vector.load %arg9[%c0_288, %c0_289] : memref<8x32xf32, #tpu.memory_space<vmem>>, vector<8x32xf32>
    %cst_290 = arith.constant dense<0.000000e+00> : vector<4x32xf32>
    %572 = tpu.matmul %569, %571, %cst_290 {dimension_numbers = #tpu.dot_dimension_numbers<[1], [0], [0], [1], [0, 0, 1, 1], [], []>} : vector<4x8xf32>, vector<8x32xf32>, vector<4x32xf32> -> vector<4x32xf32>
    %573 = arith.addf %492, %572 : vector<4x32xf32>
    %574 = arith.negf %573 : vector<4x32xf32>
    %575 = math.exp %574 : vector<4x32xf32>
    %cst_291 = arith.constant 1.000000e+00 : f32
    %576 = vector.broadcast %cst_291 : f32 to vector<4x32xf32>
    %577 = arith.addf %576, %575 : vector<4x32xf32>
    %578 = arith.divf %576, %577 : vector<4x32xf32>
    %579 = math.tanh %573 : vector<4x32xf32>
    %580 = vector.extract_strided_slice %578 {offsets = [0, 0], sizes = [4, 8], strides = [1, 1]} : vector<4x32xf32> to vector<4x8xf32>
    %581 = vector.extract_strided_slice %578 {offsets = [0, 8], sizes = [4, 8], strides = [1, 1]} : vector<4x32xf32> to vector<4x8xf32>
    %582 = vector.extract_strided_slice %578 {offsets = [0, 24], sizes = [4, 8], strides = [1, 1]} : vector<4x32xf32> to vector<4x8xf32>
    %583 = vector.extract_strided_slice %579 {offsets = [0, 16], sizes = [4, 8], strides = [1, 1]} : vector<4x32xf32> to vector<4x8xf32>
    %584 = arith.mulf %581, %567 : vector<4x8xf32>
    %585 = arith.mulf %580, %583 : vector<4x8xf32>
    %586 = arith.addf %584, %585 : vector<4x8xf32>
    %587 = math.tanh %586 : vector<4x8xf32>
    %588 = arith.mulf %582, %587 : vector<4x8xf32>
    %c16_292 = arith.constant 16 : index
    %c0_293 = arith.constant 0 : index
    %589 = vector.load %arg18[%c16_292, %c0_293] : memref<32x8xf32, #tpu.memory_space<vmem>>, vector<4x8xf32>
    tpu.vector_store %arg18[%c16_292, %c0_293], %588 {strides = array<i32>} : memref<32x8xf32, #tpu.memory_space<vmem>>, vector<4x8xf32>,
    %c0_294 = arith.constant 0 : index
    %c0_295 = arith.constant 0 : index
    %590 = vector.load %arg9[%c0_294, %c0_295] : memref<8x32xf32, #tpu.memory_space<vmem>>, vector<8x32xf32>
    %cst_296 = arith.constant dense<0.000000e+00> : vector<4x32xf32>
    %591 = tpu.matmul %588, %590, %cst_296 {dimension_numbers = #tpu.dot_dimension_numbers<[1], [0], [0], [1], [0, 0, 1, 1], [], []>} : vector<4x8xf32>, vector<8x32xf32>, vector<4x32xf32> -> vector<4x32xf32>
    %592 = arith.addf %492, %591 : vector<4x32xf32>
    %593 = arith.negf %592 : vector<4x32xf32>
    %594 = math.exp %593 : vector<4x32xf32>
    %cst_297 = arith.constant 1.000000e+00 : f32
    %595 = vector.broadcast %cst_297 : f32 to vector<4x32xf32>
    %596 = arith.addf %595, %594 : vector<4x32xf32>
    %597 = arith.divf %595, %596 : vector<4x32xf32>
    %598 = math.tanh %592 : vector<4x32xf32>
    %599 = vector.extract_strided_slice %597 {offsets = [0, 0], sizes = [4, 8], strides = [1, 1]} : vector<4x32xf32> to vector<4x8xf32>
    %600 = vector.extract_strided_slice %597 {offsets = [0, 8], sizes = [4, 8], strides = [1, 1]} : vector<4x32xf32> to vector<4x8xf32>
    %601 = vector.extract_strided_slice %597 {offsets = [0, 24], sizes = [4, 8], strides = [1, 1]} : vector<4x32xf32> to vector<4x8xf32>
    %602 = vector.extract_strided_slice %598 {offsets = [0, 16], sizes = [4, 8], strides = [1, 1]} : vector<4x32xf32> to vector<4x8xf32>
    %603 = arith.mulf %600, %586 : vector<4x8xf32>
    %604 = arith.mulf %599, %602 : vector<4x8xf32>
    %605 = arith.addf %603, %604 : vector<4x8xf32>
    %606 = math.tanh %605 : vector<4x8xf32>
    %607 = arith.mulf %601, %606 : vector<4x8xf32>
    %c20_298 = arith.constant 20 : index
    %c0_299 = arith.constant 0 : index
    %608 = vector.load %arg18[%c20_298, %c0_299] : memref<32x8xf32, #tpu.memory_space<vmem>>, vector<4x8xf32>
    tpu.vector_store %arg18[%c20_298, %c0_299], %607 {strides = array<i32>} : memref<32x8xf32, #tpu.memory_space<vmem>>, vector<4x8xf32>,
    %c0_300 = arith.constant 0 : index
    %c0_301 = arith.constant 0 : index
    %609 = vector.load %arg9[%c0_300, %c0_301] : memref<8x32xf32, #tpu.memory_space<vmem>>, vector<8x32xf32>
    %cst_302 = arith.constant dense<0.000000e+00> : vector<4x32xf32>
    %610 = tpu.matmul %607, %609, %cst_302 {dimension_numbers = #tpu.dot_dimension_numbers<[1], [0], [0], [1], [0, 0, 1, 1], [], []>} : vector<4x8xf32>, vector<8x32xf32>, vector<4x32xf32> -> vector<4x32xf32>
    %611 = arith.addf %492, %610 : vector<4x32xf32>
    %612 = arith.negf %611 : vector<4x32xf32>
    %613 = math.exp %612 : vector<4x32xf32>
    %cst_303 = arith.constant 1.000000e+00 : f32
    %614 = vector.broadcast %cst_303 : f32 to vector<4x32xf32>
    %615 = arith.addf %614, %613 : vector<4x32xf32>
    %616 = arith.divf %614, %615 : vector<4x32xf32>
    %617 = math.tanh %611 : vector<4x32xf32>
    %618 = vector.extract_strided_slice %616 {offsets = [0, 0], sizes = [4, 8], strides = [1, 1]} : vector<4x32xf32> to vector<4x8xf32>
    %619 = vector.extract_strided_slice %616 {offsets = [0, 8], sizes = [4, 8], strides = [1, 1]} : vector<4x32xf32> to vector<4x8xf32>
    %620 = vector.extract_strided_slice %616 {offsets = [0, 24], sizes = [4, 8], strides = [1, 1]} : vector<4x32xf32> to vector<4x8xf32>
    %621 = vector.extract_strided_slice %617 {offsets = [0, 16], sizes = [4, 8], strides = [1, 1]} : vector<4x32xf32> to vector<4x8xf32>
    %622 = arith.mulf %619, %605 : vector<4x8xf32>
    %623 = arith.mulf %618, %621 : vector<4x8xf32>
    %624 = arith.addf %622, %623 : vector<4x8xf32>
    %625 = math.tanh %624 : vector<4x8xf32>
    %626 = arith.mulf %620, %625 : vector<4x8xf32>
    %c24_304 = arith.constant 24 : index
    %c0_305 = arith.constant 0 : index
    %627 = vector.load %arg18[%c24_304, %c0_305] : memref<32x8xf32, #tpu.memory_space<vmem>>, vector<4x8xf32>
    tpu.vector_store %arg18[%c24_304, %c0_305], %626 {strides = array<i32>} : memref<32x8xf32, #tpu.memory_space<vmem>>, vector<4x8xf32>,
    %c0_306 = arith.constant 0 : index
    %c0_307 = arith.constant 0 : index
    %628 = vector.load %arg9[%c0_306, %c0_307] : memref<8x32xf32, #tpu.memory_space<vmem>>, vector<8x32xf32>
    %cst_308 = arith.constant dense<0.000000e+00> : vector<4x32xf32>
    %629 = tpu.matmul %626, %628, %cst_308 {dimension_numbers = #tpu.dot_dimension_numbers<[1], [0], [0], [1], [0, 0, 1, 1], [], []>} : vector<4x8xf32>, vector<8x32xf32>, vector<4x32xf32> -> vector<4x32xf32>
    %630 = arith.addf %492, %629 : vector<4x32xf32>
    %631 = arith.negf %630 : vector<4x32xf32>
    %632 = math.exp %631 : vector<4x32xf32>
    %cst_309 = arith.constant 1.000000e+00 : f32
    %633 = vector.broadcast %cst_309 : f32 to vector<4x32xf32>
    %634 = arith.addf %633, %632 : vector<4x32xf32>
    %635 = arith.divf %633, %634 : vector<4x32xf32>
    %636 = math.tanh %630 : vector<4x32xf32>
    %637 = vector.extract_strided_slice %635 {offsets = [0, 0], sizes = [4, 8], strides = [1, 1]} : vector<4x32xf32> to vector<4x8xf32>
    %638 = vector.extract_strided_slice %635 {offsets = [0, 8], sizes = [4, 8], strides = [1, 1]} : vector<4x32xf32> to vector<4x8xf32>
    %639 = vector.extract_strided_slice %635 {offsets = [0, 24], sizes = [4, 8], strides = [1, 1]} : vector<4x32xf32> to vector<4x8xf32>
    %640 = vector.extract_strided_slice %636 {offsets = [0, 16], sizes = [4, 8], strides = [1, 1]} : vector<4x32xf32> to vector<4x8xf32>
    %641 = arith.mulf %638, %624 : vector<4x8xf32>
    %642 = arith.mulf %637, %640 : vector<4x8xf32>
    %643 = arith.addf %641, %642 : vector<4x8xf32>
    %644 = math.tanh %643 : vector<4x8xf32>
    %645 = arith.mulf %639, %644 : vector<4x8xf32>
    %c28_310 = arith.constant 28 : index
    %c0_311 = arith.constant 0 : index
    %646 = vector.load %arg18[%c28_310, %c0_311] : memref<32x8xf32, #tpu.memory_space<vmem>>, vector<4x8xf32>
    tpu.vector_store %arg18[%c28_310, %c0_311], %645 {strides = array<i32>} : memref<32x8xf32, #tpu.memory_space<vmem>>, vector<4x8xf32>,
    %c0_312 = arith.constant 0 : index
    %c0_313 = arith.constant 0 : index
    %647 = vector.load %arg18[%c0_312, %c0_313] : memref<32x8xf32, #tpu.memory_space<vmem>>, vector<32x8xf32>
    %c0_314 = arith.constant 0 : index
    %c0_315 = arith.constant 0 : index
    %648 = vector.load %arg11[%c0_314, %c0_315] : memref<8x32xf32, #tpu.memory_space<vmem>>, vector<8x32xf32>
    %cst_316 = arith.constant dense<0.000000e+00> : vector<32x32xf32>
    %649 = tpu.matmul %647, %648, %cst_316 {dimension_numbers = #tpu.dot_dimension_numbers<[1], [0], [0], [1], [0, 0, 1, 1], [], []>} : vector<32x8xf32>, vector<8x32xf32>, vector<32x32xf32> -> vector<32x32xf32>
    %c0_317 = arith.constant 0 : index
    %c0_318 = arith.constant 0 : index
    %650 = vector.load %arg13[%c0_317, %c0_318] : memref<1x32xf32, #tpu.memory_space<vmem>>, vector<1x32xf32>
    %651 = vector.broadcast %650 : vector<1x32xf32> to vector<32x32xf32>
    %652 = arith.addf %649, %651 : vector<32x32xf32>
    %cst_319 = arith.constant 0.000000e+00 : f32
    %653 = vector.broadcast %cst_319 : f32 to vector<4x8xf32>
    %cst_320 = arith.constant 0.000000e+00 : f32
    %654 = vector.broadcast %cst_320 : f32 to vector<4x8xf32>
    %655 = vector.extract_strided_slice %652 {offsets = [0, 0], sizes = [4, 32], strides = [1, 1]} : vector<32x32xf32> to vector<4x32xf32>
    %c0_321 = arith.constant 0 : index
    %c0_322 = arith.constant 0 : index
    %656 = vector.load %arg12[%c0_321, %c0_322] : memref<8x32xf32, #tpu.memory_space<vmem>>, vector<8x32xf32>
    %cst_323 = arith.constant dense<0.000000e+00> : vector<4x32xf32>
    %657 = tpu.matmul %653, %656, %cst_323 {dimension_numbers = #tpu.dot_dimension_numbers<[1], [0], [0], [1], [0, 0, 1, 1], [], []>} : vector<4x8xf32>, vector<8x32xf32>, vector<4x32xf32> -> vector<4x32xf32>
    %658 = arith.addf %655, %657 : vector<4x32xf32>
    %659 = arith.negf %658 : vector<4x32xf32>
    %660 = math.exp %659 : vector<4x32xf32>
    %cst_324 = arith.constant 1.000000e+00 : f32
    %661 = vector.broadcast %cst_324 : f32 to vector<4x32xf32>
    %662 = arith.addf %661, %660 : vector<4x32xf32>
    %663 = arith.divf %661, %662 : vector<4x32xf32>
    %664 = math.tanh %658 : vector<4x32xf32>
    %665 = vector.extract_strided_slice %663 {offsets = [0, 0], sizes = [4, 8], strides = [1, 1]} : vector<4x32xf32> to vector<4x8xf32>
    %666 = vector.extract_strided_slice %663 {offsets = [0, 8], sizes = [4, 8], strides = [1, 1]} : vector<4x32xf32> to vector<4x8xf32>
    %667 = vector.extract_strided_slice %663 {offsets = [0, 24], sizes = [4, 8], strides = [1, 1]} : vector<4x32xf32> to vector<4x8xf32>
    %668 = vector.extract_strided_slice %664 {offsets = [0, 16], sizes = [4, 8], strides = [1, 1]} : vector<4x32xf32> to vector<4x8xf32>
    %669 = arith.mulf %666, %654 : vector<4x8xf32>
    %670 = arith.mulf %665, %668 : vector<4x8xf32>
    %671 = arith.addf %669, %670 : vector<4x8xf32>
    %672 = math.tanh %671 : vector<4x8xf32>
    %673 = arith.mulf %667, %672 : vector<4x8xf32>
    %674 = vector.extract_strided_slice %673 {offsets = [0, 0], sizes = [1, 8], strides = [1, 1]} : vector<4x8xf32> to vector<1x8xf32>
    %c0_325 = arith.constant 0 : index
    %c0_326 = arith.constant 0 : index
    %675 = vector.load %arg14[%c0_325, %c0_326] : memref<32x8xf32, #tpu.memory_space<vmem>>, vector<1x8xf32>
    tpu.vector_store %arg14[%c0_325, %c0_326], %674 {strides = array<i32>} : memref<32x8xf32, #tpu.memory_space<vmem>>, vector<1x8xf32>,
    %676 = vector.extract_strided_slice %673 {offsets = [1, 0], sizes = [1, 8], strides = [1, 1]} : vector<4x8xf32> to vector<1x8xf32>
    %c8_327 = arith.constant 8 : index
    %c0_328 = arith.constant 0 : index
    %677 = vector.load %arg14[%c8_327, %c0_328] : memref<32x8xf32, #tpu.memory_space<vmem>>, vector<1x8xf32>
    tpu.vector_store %arg14[%c8_327, %c0_328], %676 {strides = array<i32>} : memref<32x8xf32, #tpu.memory_space<vmem>>, vector<1x8xf32>,
    %678 = vector.extract_strided_slice %673 {offsets = [2, 0], sizes = [1, 8], strides = [1, 1]} : vector<4x8xf32> to vector<1x8xf32>
    %c16_329 = arith.constant 16 : index
    %c0_330 = arith.constant 0 : index
    %679 = vector.load %arg14[%c16_329, %c0_330] : memref<32x8xf32, #tpu.memory_space<vmem>>, vector<1x8xf32>
    tpu.vector_store %arg14[%c16_329, %c0_330], %678 {strides = array<i32>} : memref<32x8xf32, #tpu.memory_space<vmem>>, vector<1x8xf32>,
    %680 = vector.extract_strided_slice %673 {offsets = [3, 0], sizes = [1, 8], strides = [1, 1]} : vector<4x8xf32> to vector<1x8xf32>
    %c24_331 = arith.constant 24 : index
    %c0_332 = arith.constant 0 : index
    %681 = vector.load %arg14[%c24_331, %c0_332] : memref<32x8xf32, #tpu.memory_space<vmem>>, vector<1x8xf32>
    tpu.vector_store %arg14[%c24_331, %c0_332], %680 {strides = array<i32>} : memref<32x8xf32, #tpu.memory_space<vmem>>, vector<1x8xf32>,
    %682 = vector.extract_strided_slice %652 {offsets = [4, 0], sizes = [4, 32], strides = [1, 1]} : vector<32x32xf32> to vector<4x32xf32>
    %c0_333 = arith.constant 0 : index
    %c0_334 = arith.constant 0 : index
    %683 = vector.load %arg12[%c0_333, %c0_334] : memref<8x32xf32, #tpu.memory_space<vmem>>, vector<8x32xf32>
    %cst_335 = arith.constant dense<0.000000e+00> : vector<4x32xf32>
    %684 = tpu.matmul %673, %683, %cst_335 {dimension_numbers = #tpu.dot_dimension_numbers<[1], [0], [0], [1], [0, 0, 1, 1], [], []>} : vector<4x8xf32>, vector<8x32xf32>, vector<4x32xf32> -> vector<4x32xf32>
    %685 = arith.addf %682, %684 : vector<4x32xf32>
    %686 = arith.negf %685 : vector<4x32xf32>
    %687 = math.exp %686 : vector<4x32xf32>
    %cst_336 = arith.constant 1.000000e+00 : f32
    %688 = vector.broadcast %cst_336 : f32 to vector<4x32xf32>
    %689 = arith.addf %688, %687 : vector<4x32xf32>
    %690 = arith.divf %688, %689 : vector<4x32xf32>
    %691 = math.tanh %685 : vector<4x32xf32>
    %692 = vector.extract_strided_slice %690 {offsets = [0, 0], sizes = [4, 8], strides = [1, 1]} : vector<4x32xf32> to vector<4x8xf32>
    %693 = vector.extract_strided_slice %690 {offsets = [0, 8], sizes = [4, 8], strides = [1, 1]} : vector<4x32xf32> to vector<4x8xf32>
    %694 = vector.extract_strided_slice %690 {offsets = [0, 24], sizes = [4, 8], strides = [1, 1]} : vector<4x32xf32> to vector<4x8xf32>
    %695 = vector.extract_strided_slice %691 {offsets = [0, 16], sizes = [4, 8], strides = [1, 1]} : vector<4x32xf32> to vector<4x8xf32>
    %696 = arith.mulf %693, %671 : vector<4x8xf32>
    %697 = arith.mulf %692, %695 : vector<4x8xf32>
    %698 = arith.addf %696, %697 : vector<4x8xf32>
    %699 = math.tanh %698 : vector<4x8xf32>
    %700 = arith.mulf %694, %699 : vector<4x8xf32>
    %701 = vector.extract_strided_slice %700 {offsets = [0, 0], sizes = [1, 8], strides = [1, 1]} : vector<4x8xf32> to vector<1x8xf32>
    %c1_337 = arith.constant 1 : index
    %c0_338 = arith.constant 0 : index
    %702 = vector.load %arg14[%c1_337, %c0_338] : memref<32x8xf32, #tpu.memory_space<vmem>>, vector<1x8xf32>
    tpu.vector_store %arg14[%c1_337, %c0_338], %701 {strides = array<i32>} : memref<32x8xf32, #tpu.memory_space<vmem>>, vector<1x8xf32>,
    %703 = vector.extract_strided_slice %700 {offsets = [1, 0], sizes = [1, 8], strides = [1, 1]} : vector<4x8xf32> to vector<1x8xf32>
    %c9_339 = arith.constant 9 : index
    %c0_340 = arith.constant 0 : index
    %704 = vector.load %arg14[%c9_339, %c0_340] : memref<32x8xf32, #tpu.memory_space<vmem>>, vector<1x8xf32>
    tpu.vector_store %arg14[%c9_339, %c0_340], %703 {strides = array<i32>} : memref<32x8xf32, #tpu.memory_space<vmem>>, vector<1x8xf32>,
    %705 = vector.extract_strided_slice %700 {offsets = [2, 0], sizes = [1, 8], strides = [1, 1]} : vector<4x8xf32> to vector<1x8xf32>
    %c17_341 = arith.constant 17 : index
    %c0_342 = arith.constant 0 : index
    %706 = vector.load %arg14[%c17_341, %c0_342] : memref<32x8xf32, #tpu.memory_space<vmem>>, vector<1x8xf32>
    tpu.vector_store %arg14[%c17_341, %c0_342], %705 {strides = array<i32>} : memref<32x8xf32, #tpu.memory_space<vmem>>, vector<1x8xf32>,
    %707 = vector.extract_strided_slice %700 {offsets = [3, 0], sizes = [1, 8], strides = [1, 1]} : vector<4x8xf32> to vector<1x8xf32>
    %c25_343 = arith.constant 25 : index
    %c0_344 = arith.constant 0 : index
    %708 = vector.load %arg14[%c25_343, %c0_344] : memref<32x8xf32, #tpu.memory_space<vmem>>, vector<1x8xf32>
    tpu.vector_store %arg14[%c25_343, %c0_344], %707 {strides = array<i32>} : memref<32x8xf32, #tpu.memory_space<vmem>>, vector<1x8xf32>,
    %709 = vector.extract_strided_slice %652 {offsets = [8, 0], sizes = [4, 32], strides = [1, 1]} : vector<32x32xf32> to vector<4x32xf32>
    %c0_345 = arith.constant 0 : index
    %c0_346 = arith.constant 0 : index
    %710 = vector.load %arg12[%c0_345, %c0_346] : memref<8x32xf32, #tpu.memory_space<vmem>>, vector<8x32xf32>
    %cst_347 = arith.constant dense<0.000000e+00> : vector<4x32xf32>
    %711 = tpu.matmul %700, %710, %cst_347 {dimension_numbers = #tpu.dot_dimension_numbers<[1], [0], [0], [1], [0, 0, 1, 1], [], []>} : vector<4x8xf32>, vector<8x32xf32>, vector<4x32xf32> -> vector<4x32xf32>
    %712 = arith.addf %709, %711 : vector<4x32xf32>
    %713 = arith.negf %712 : vector<4x32xf32>
    %714 = math.exp %713 : vector<4x32xf32>
    %cst_348 = arith.constant 1.000000e+00 : f32
    %715 = vector.broadcast %cst_348 : f32 to vector<4x32xf32>
    %716 = arith.addf %715, %714 : vector<4x32xf32>
    %717 = arith.divf %715, %716 : vector<4x32xf32>
    %718 = math.tanh %712 : vector<4x32xf32>
    %719 = vector.extract_strided_slice %717 {offsets = [0, 0], sizes = [4, 8], strides = [1, 1]} : vector<4x32xf32> to vector<4x8xf32>
    %720 = vector.extract_strided_slice %717 {offsets = [0, 8], sizes = [4, 8], strides = [1, 1]} : vector<4x32xf32> to vector<4x8xf32>
    %721 = vector.extract_strided_slice %717 {offsets = [0, 24], sizes = [4, 8], strides = [1, 1]} : vector<4x32xf32> to vector<4x8xf32>
    %722 = vector.extract_strided_slice %718 {offsets = [0, 16], sizes = [4, 8], strides = [1, 1]} : vector<4x32xf32> to vector<4x8xf32>
    %723 = arith.mulf %720, %698 : vector<4x8xf32>
    %724 = arith.mulf %719, %722 : vector<4x8xf32>
    %725 = arith.addf %723, %724 : vector<4x8xf32>
    %726 = math.tanh %725 : vector<4x8xf32>
    %727 = arith.mulf %721, %726 : vector<4x8xf32>
    %728 = vector.extract_strided_slice %727 {offsets = [0, 0], sizes = [1, 8], strides = [1, 1]} : vector<4x8xf32> to vector<1x8xf32>
    %c2_349 = arith.constant 2 : index
    %c0_350 = arith.constant 0 : index
    %729 = vector.load %arg14[%c2_349, %c0_350] : memref<32x8xf32, #tpu.memory_space<vmem>>, vector<1x8xf32>
    tpu.vector_store %arg14[%c2_349, %c0_350], %728 {strides = array<i32>} : memref<32x8xf32, #tpu.memory_space<vmem>>, vector<1x8xf32>,
    %730 = vector.extract_strided_slice %727 {offsets = [1, 0], sizes = [1, 8], strides = [1, 1]} : vector<4x8xf32> to vector<1x8xf32>
    %c10_351 = arith.constant 10 : index
    %c0_352 = arith.constant 0 : index
    %731 = vector.load %arg14[%c10_351, %c0_352] : memref<32x8xf32, #tpu.memory_space<vmem>>, vector<1x8xf32>
    tpu.vector_store %arg14[%c10_351, %c0_352], %730 {strides = array<i32>} : memref<32x8xf32, #tpu.memory_space<vmem>>, vector<1x8xf32>,
    %732 = vector.extract_strided_slice %727 {offsets = [2, 0], sizes = [1, 8], strides = [1, 1]} : vector<4x8xf32> to vector<1x8xf32>
    %c18_353 = arith.constant 18 : index
    %c0_354 = arith.constant 0 : index
    %733 = vector.load %arg14[%c18_353, %c0_354] : memref<32x8xf32, #tpu.memory_space<vmem>>, vector<1x8xf32>
    tpu.vector_store %arg14[%c18_353, %c0_354], %732 {strides = array<i32>} : memref<32x8xf32, #tpu.memory_space<vmem>>, vector<1x8xf32>,
    %734 = vector.extract_strided_slice %727 {offsets = [3, 0], sizes = [1, 8], strides = [1, 1]} : vector<4x8xf32> to vector<1x8xf32>
    %c26_355 = arith.constant 26 : index
    %c0_356 = arith.constant 0 : index
    %735 = vector.load %arg14[%c26_355, %c0_356] : memref<32x8xf32, #tpu.memory_space<vmem>>, vector<1x8xf32>
    tpu.vector_store %arg14[%c26_355, %c0_356], %734 {strides = array<i32>} : memref<32x8xf32, #tpu.memory_space<vmem>>, vector<1x8xf32>,
    %736 = vector.extract_strided_slice %652 {offsets = [12, 0], sizes = [4, 32], strides = [1, 1]} : vector<32x32xf32> to vector<4x32xf32>
    %c0_357 = arith.constant 0 : index
    %c0_358 = arith.constant 0 : index
    %737 = vector.load %arg12[%c0_357, %c0_358] : memref<8x32xf32, #tpu.memory_space<vmem>>, vector<8x32xf32>
    %cst_359 = arith.constant dense<0.000000e+00> : vector<4x32xf32>
    %738 = tpu.matmul %727, %737, %cst_359 {dimension_numbers = #tpu.dot_dimension_numbers<[1], [0], [0], [1], [0, 0, 1, 1], [], []>} : vector<4x8xf32>, vector<8x32xf32>, vector<4x32xf32> -> vector<4x32xf32>
    %739 = arith.addf %736, %738 : vector<4x32xf32>
    %740 = arith.negf %739 : vector<4x32xf32>
    %741 = math.exp %740 : vector<4x32xf32>
    %cst_360 = arith.constant 1.000000e+00 : f32
    %742 = vector.broadcast %cst_360 : f32 to vector<4x32xf32>
    %743 = arith.addf %742, %741 : vector<4x32xf32>
    %744 = arith.divf %742, %743 : vector<4x32xf32>
    %745 = math.tanh %739 : vector<4x32xf32>
    %746 = vector.extract_strided_slice %744 {offsets = [0, 0], sizes = [4, 8], strides = [1, 1]} : vector<4x32xf32> to vector<4x8xf32>
    %747 = vector.extract_strided_slice %744 {offsets = [0, 8], sizes = [4, 8], strides = [1, 1]} : vector<4x32xf32> to vector<4x8xf32>
    %748 = vector.extract_strided_slice %744 {offsets = [0, 24], sizes = [4, 8], strides = [1, 1]} : vector<4x32xf32> to vector<4x8xf32>
    %749 = vector.extract_strided_slice %745 {offsets = [0, 16], sizes = [4, 8], strides = [1, 1]} : vector<4x32xf32> to vector<4x8xf32>
    %750 = arith.mulf %747, %725 : vector<4x8xf32>
    %751 = arith.mulf %746, %749 : vector<4x8xf32>
    %752 = arith.addf %750, %751 : vector<4x8xf32>
    %753 = math.tanh %752 : vector<4x8xf32>
    %754 = arith.mulf %748, %753 : vector<4x8xf32>
    %755 = vector.extract_strided_slice %754 {offsets = [0, 0], sizes = [1, 8], strides = [1, 1]} : vector<4x8xf32> to vector<1x8xf32>
    %c3_361 = arith.constant 3 : index
    %c0_362 = arith.constant 0 : index
    %756 = vector.load %arg14[%c3_361, %c0_362] : memref<32x8xf32, #tpu.memory_space<vmem>>, vector<1x8xf32>
    tpu.vector_store %arg14[%c3_361, %c0_362], %755 {strides = array<i32>} : memref<32x8xf32, #tpu.memory_space<vmem>>, vector<1x8xf32>,
    %757 = vector.extract_strided_slice %754 {offsets = [1, 0], sizes = [1, 8], strides = [1, 1]} : vector<4x8xf32> to vector<1x8xf32>
    %c11_363 = arith.constant 11 : index
    %c0_364 = arith.constant 0 : index
    %758 = vector.load %arg14[%c11_363, %c0_364] : memref<32x8xf32, #tpu.memory_space<vmem>>, vector<1x8xf32>
    tpu.vector_store %arg14[%c11_363, %c0_364], %757 {strides = array<i32>} : memref<32x8xf32, #tpu.memory_space<vmem>>, vector<1x8xf32>,
    %759 = vector.extract_strided_slice %754 {offsets = [2, 0], sizes = [1, 8], strides = [1, 1]} : vector<4x8xf32> to vector<1x8xf32>
    %c19_365 = arith.constant 19 : index
    %c0_366 = arith.constant 0 : index
    %760 = vector.load %arg14[%c19_365, %c0_366] : memref<32x8xf32, #tpu.memory_space<vmem>>, vector<1x8xf32>
    tpu.vector_store %arg14[%c19_365, %c0_366], %759 {strides = array<i32>} : memref<32x8xf32, #tpu.memory_space<vmem>>, vector<1x8xf32>,
    %761 = vector.extract_strided_slice %754 {offsets = [3, 0], sizes = [1, 8], strides = [1, 1]} : vector<4x8xf32> to vector<1x8xf32>
    %c27_367 = arith.constant 27 : index
    %c0_368 = arith.constant 0 : index
    %762 = vector.load %arg14[%c27_367, %c0_368] : memref<32x8xf32, #tpu.memory_space<vmem>>, vector<1x8xf32>
    tpu.vector_store %arg14[%c27_367, %c0_368], %761 {strides = array<i32>} : memref<32x8xf32, #tpu.memory_space<vmem>>, vector<1x8xf32>,
    %763 = vector.extract_strided_slice %652 {offsets = [16, 0], sizes = [4, 32], strides = [1, 1]} : vector<32x32xf32> to vector<4x32xf32>
    %c0_369 = arith.constant 0 : index
    %c0_370 = arith.constant 0 : index
    %764 = vector.load %arg12[%c0_369, %c0_370] : memref<8x32xf32, #tpu.memory_space<vmem>>, vector<8x32xf32>
    %cst_371 = arith.constant dense<0.000000e+00> : vector<4x32xf32>
    %765 = tpu.matmul %754, %764, %cst_371 {dimension_numbers = #tpu.dot_dimension_numbers<[1], [0], [0], [1], [0, 0, 1, 1], [], []>} : vector<4x8xf32>, vector<8x32xf32>, vector<4x32xf32> -> vector<4x32xf32>
    %766 = arith.addf %763, %765 : vector<4x32xf32>
    %767 = arith.negf %766 : vector<4x32xf32>
    %768 = math.exp %767 : vector<4x32xf32>
    %cst_372 = arith.constant 1.000000e+00 : f32
    %769 = vector.broadcast %cst_372 : f32 to vector<4x32xf32>
    %770 = arith.addf %769, %768 : vector<4x32xf32>
    %771 = arith.divf %769, %770 : vector<4x32xf32>
    %772 = math.tanh %766 : vector<4x32xf32>
    %773 = vector.extract_strided_slice %771 {offsets = [0, 0], sizes = [4, 8], strides = [1, 1]} : vector<4x32xf32> to vector<4x8xf32>
    %774 = vector.extract_strided_slice %771 {offsets = [0, 8], sizes = [4, 8], strides = [1, 1]} : vector<4x32xf32> to vector<4x8xf32>
    %775 = vector.extract_strided_slice %771 {offsets = [0, 24], sizes = [4, 8], strides = [1, 1]} : vector<4x32xf32> to vector<4x8xf32>
    %776 = vector.extract_strided_slice %772 {offsets = [0, 16], sizes = [4, 8], strides = [1, 1]} : vector<4x32xf32> to vector<4x8xf32>
    %777 = arith.mulf %774, %752 : vector<4x8xf32>
    %778 = arith.mulf %773, %776 : vector<4x8xf32>
    %779 = arith.addf %777, %778 : vector<4x8xf32>
    %780 = math.tanh %779 : vector<4x8xf32>
    %781 = arith.mulf %775, %780 : vector<4x8xf32>
    %782 = vector.extract_strided_slice %781 {offsets = [0, 0], sizes = [1, 8], strides = [1, 1]} : vector<4x8xf32> to vector<1x8xf32>
    %c4_373 = arith.constant 4 : index
    %c0_374 = arith.constant 0 : index
    %783 = vector.load %arg14[%c4_373, %c0_374] : memref<32x8xf32, #tpu.memory_space<vmem>>, vector<1x8xf32>
    tpu.vector_store %arg14[%c4_373, %c0_374], %782 {strides = array<i32>} : memref<32x8xf32, #tpu.memory_space<vmem>>, vector<1x8xf32>,
    %784 = vector.extract_strided_slice %781 {offsets = [1, 0], sizes = [1, 8], strides = [1, 1]} : vector<4x8xf32> to vector<1x8xf32>
    %c12_375 = arith.constant 12 : index
    %c0_376 = arith.constant 0 : index
    %785 = vector.load %arg14[%c12_375, %c0_376] : memref<32x8xf32, #tpu.memory_space<vmem>>, vector<1x8xf32>
    tpu.vector_store %arg14[%c12_375, %c0_376], %784 {strides = array<i32>} : memref<32x8xf32, #tpu.memory_space<vmem>>, vector<1x8xf32>,
    %786 = vector.extract_strided_slice %781 {offsets = [2, 0], sizes = [1, 8], strides = [1, 1]} : vector<4x8xf32> to vector<1x8xf32>
    %c20_377 = arith.constant 20 : index
    %c0_378 = arith.constant 0 : index
    %787 = vector.load %arg14[%c20_377, %c0_378] : memref<32x8xf32, #tpu.memory_space<vmem>>, vector<1x8xf32>
    tpu.vector_store %arg14[%c20_377, %c0_378], %786 {strides = array<i32>} : memref<32x8xf32, #tpu.memory_space<vmem>>, vector<1x8xf32>,
    %788 = vector.extract_strided_slice %781 {offsets = [3, 0], sizes = [1, 8], strides = [1, 1]} : vector<4x8xf32> to vector<1x8xf32>
    %c28_379 = arith.constant 28 : index
    %c0_380 = arith.constant 0 : index
    %789 = vector.load %arg14[%c28_379, %c0_380] : memref<32x8xf32, #tpu.memory_space<vmem>>, vector<1x8xf32>
    tpu.vector_store %arg14[%c28_379, %c0_380], %788 {strides = array<i32>} : memref<32x8xf32, #tpu.memory_space<vmem>>, vector<1x8xf32>,
    %790 = vector.extract_strided_slice %652 {offsets = [20, 0], sizes = [4, 32], strides = [1, 1]} : vector<32x32xf32> to vector<4x32xf32>
    %c0_381 = arith.constant 0 : index
    %c0_382 = arith.constant 0 : index
    %791 = vector.load %arg12[%c0_381, %c0_382] : memref<8x32xf32, #tpu.memory_space<vmem>>, vector<8x32xf32>
    %cst_383 = arith.constant dense<0.000000e+00> : vector<4x32xf32>
    %792 = tpu.matmul %781, %791, %cst_383 {dimension_numbers = #tpu.dot_dimension_numbers<[1], [0], [0], [1], [0, 0, 1, 1], [], []>} : vector<4x8xf32>, vector<8x32xf32>, vector<4x32xf32> -> vector<4x32xf32>
    %793 = arith.addf %790, %792 : vector<4x32xf32>
    %794 = arith.negf %793 : vector<4x32xf32>
    %795 = math.exp %794 : vector<4x32xf32>
    %cst_384 = arith.constant 1.000000e+00 : f32
    %796 = vector.broadcast %cst_384 : f32 to vector<4x32xf32>
    %797 = arith.addf %796, %795 : vector<4x32xf32>
    %798 = arith.divf %796, %797 : vector<4x32xf32>
    %799 = math.tanh %793 : vector<4x32xf32>
    %800 = vector.extract_strided_slice %798 {offsets = [0, 0], sizes = [4, 8], strides = [1, 1]} : vector<4x32xf32> to vector<4x8xf32>
    %801 = vector.extract_strided_slice %798 {offsets = [0, 8], sizes = [4, 8], strides = [1, 1]} : vector<4x32xf32> to vector<4x8xf32>
    %802 = vector.extract_strided_slice %798 {offsets = [0, 24], sizes = [4, 8], strides = [1, 1]} : vector<4x32xf32> to vector<4x8xf32>
    %803 = vector.extract_strided_slice %799 {offsets = [0, 16], sizes = [4, 8], strides = [1, 1]} : vector<4x32xf32> to vector<4x8xf32>
    %804 = arith.mulf %801, %779 : vector<4x8xf32>
    %805 = arith.mulf %800, %803 : vector<4x8xf32>
    %806 = arith.addf %804, %805 : vector<4x8xf32>
    %807 = math.tanh %806 : vector<4x8xf32>
    %808 = arith.mulf %802, %807 : vector<4x8xf32>
    %809 = vector.extract_strided_slice %808 {offsets = [0, 0], sizes = [1, 8], strides = [1, 1]} : vector<4x8xf32> to vector<1x8xf32>
    %c5_385 = arith.constant 5 : index
    %c0_386 = arith.constant 0 : index
    %810 = vector.load %arg14[%c5_385, %c0_386] : memref<32x8xf32, #tpu.memory_space<vmem>>, vector<1x8xf32>
    tpu.vector_store %arg14[%c5_385, %c0_386], %809 {strides = array<i32>} : memref<32x8xf32, #tpu.memory_space<vmem>>, vector<1x8xf32>,
    %811 = vector.extract_strided_slice %808 {offsets = [1, 0], sizes = [1, 8], strides = [1, 1]} : vector<4x8xf32> to vector<1x8xf32>
    %c13_387 = arith.constant 13 : index
    %c0_388 = arith.constant 0 : index
    %812 = vector.load %arg14[%c13_387, %c0_388] : memref<32x8xf32, #tpu.memory_space<vmem>>, vector<1x8xf32>
    tpu.vector_store %arg14[%c13_387, %c0_388], %811 {strides = array<i32>} : memref<32x8xf32, #tpu.memory_space<vmem>>, vector<1x8xf32>,
    %813 = vector.extract_strided_slice %808 {offsets = [2, 0], sizes = [1, 8], strides = [1, 1]} : vector<4x8xf32> to vector<1x8xf32>
    %c21_389 = arith.constant 21 : index
    %c0_390 = arith.constant 0 : index
    %814 = vector.load %arg14[%c21_389, %c0_390] : memref<32x8xf32, #tpu.memory_space<vmem>>, vector<1x8xf32>
    tpu.vector_store %arg14[%c21_389, %c0_390], %813 {strides = array<i32>} : memref<32x8xf32, #tpu.memory_space<vmem>>, vector<1x8xf32>,
    %815 = vector.extract_strided_slice %808 {offsets = [3, 0], sizes = [1, 8], strides = [1, 1]} : vector<4x8xf32> to vector<1x8xf32>
    %c29_391 = arith.constant 29 : index
    %c0_392 = arith.constant 0 : index
    %816 = vector.load %arg14[%c29_391, %c0_392] : memref<32x8xf32, #tpu.memory_space<vmem>>, vector<1x8xf32>
    tpu.vector_store %arg14[%c29_391, %c0_392], %815 {strides = array<i32>} : memref<32x8xf32, #tpu.memory_space<vmem>>, vector<1x8xf32>,
    %817 = vector.extract_strided_slice %652 {offsets = [24, 0], sizes = [4, 32], strides = [1, 1]} : vector<32x32xf32> to vector<4x32xf32>
    %c0_393 = arith.constant 0 : index
    %c0_394 = arith.constant 0 : index
    %818 = vector.load %arg12[%c0_393, %c0_394] : memref<8x32xf32, #tpu.memory_space<vmem>>, vector<8x32xf32>
    %cst_395 = arith.constant dense<0.000000e+00> : vector<4x32xf32>
    %819 = tpu.matmul %808, %818, %cst_395 {dimension_numbers = #tpu.dot_dimension_numbers<[1], [0], [0], [1], [0, 0, 1, 1], [], []>} : vector<4x8xf32>, vector<8x32xf32>, vector<4x32xf32> -> vector<4x32xf32>
    %820 = arith.addf %817, %819 : vector<4x32xf32>
    %821 = arith.negf %820 : vector<4x32xf32>
    %822 = math.exp %821 : vector<4x32xf32>
    %cst_396 = arith.constant 1.000000e+00 : f32
    %823 = vector.broadcast %cst_396 : f32 to vector<4x32xf32>
    %824 = arith.addf %823, %822 : vector<4x32xf32>
    %825 = arith.divf %823, %824 : vector<4x32xf32>
    %826 = math.tanh %820 : vector<4x32xf32>
    %827 = vector.extract_strided_slice %825 {offsets = [0, 0], sizes = [4, 8], strides = [1, 1]} : vector<4x32xf32> to vector<4x8xf32>
    %828 = vector.extract_strided_slice %825 {offsets = [0, 8], sizes = [4, 8], strides = [1, 1]} : vector<4x32xf32> to vector<4x8xf32>
    %829 = vector.extract_strided_slice %825 {offsets = [0, 24], sizes = [4, 8], strides = [1, 1]} : vector<4x32xf32> to vector<4x8xf32>
    %830 = vector.extract_strided_slice %826 {offsets = [0, 16], sizes = [4, 8], strides = [1, 1]} : vector<4x32xf32> to vector<4x8xf32>
    %831 = arith.mulf %828, %806 : vector<4x8xf32>
    %832 = arith.mulf %827, %830 : vector<4x8xf32>
    %833 = arith.addf %831, %832 : vector<4x8xf32>
    %834 = math.tanh %833 : vector<4x8xf32>
    %835 = arith.mulf %829, %834 : vector<4x8xf32>
    %836 = vector.extract_strided_slice %835 {offsets = [0, 0], sizes = [1, 8], strides = [1, 1]} : vector<4x8xf32> to vector<1x8xf32>
    %c6_397 = arith.constant 6 : index
    %c0_398 = arith.constant 0 : index
    %837 = vector.load %arg14[%c6_397, %c0_398] : memref<32x8xf32, #tpu.memory_space<vmem>>, vector<1x8xf32>
    tpu.vector_store %arg14[%c6_397, %c0_398], %836 {strides = array<i32>} : memref<32x8xf32, #tpu.memory_space<vmem>>, vector<1x8xf32>,
    %838 = vector.extract_strided_slice %835 {offsets = [1, 0], sizes = [1, 8], strides = [1, 1]} : vector<4x8xf32> to vector<1x8xf32>
    %c14_399 = arith.constant 14 : index
    %c0_400 = arith.constant 0 : index
    %839 = vector.load %arg14[%c14_399, %c0_400] : memref<32x8xf32, #tpu.memory_space<vmem>>, vector<1x8xf32>
    tpu.vector_store %arg14[%c14_399, %c0_400], %838 {strides = array<i32>} : memref<32x8xf32, #tpu.memory_space<vmem>>, vector<1x8xf32>,
    %840 = vector.extract_strided_slice %835 {offsets = [2, 0], sizes = [1, 8], strides = [1, 1]} : vector<4x8xf32> to vector<1x8xf32>
    %c22_401 = arith.constant 22 : index
    %c0_402 = arith.constant 0 : index
    %841 = vector.load %arg14[%c22_401, %c0_402] : memref<32x8xf32, #tpu.memory_space<vmem>>, vector<1x8xf32>
    tpu.vector_store %arg14[%c22_401, %c0_402], %840 {strides = array<i32>} : memref<32x8xf32, #tpu.memory_space<vmem>>, vector<1x8xf32>,
    %842 = vector.extract_strided_slice %835 {offsets = [3, 0], sizes = [1, 8], strides = [1, 1]} : vector<4x8xf32> to vector<1x8xf32>
    %c30_403 = arith.constant 30 : index
    %c0_404 = arith.constant 0 : index
    %843 = vector.load %arg14[%c30_403, %c0_404] : memref<32x8xf32, #tpu.memory_space<vmem>>, vector<1x8xf32>
    tpu.vector_store %arg14[%c30_403, %c0_404], %842 {strides = array<i32>} : memref<32x8xf32, #tpu.memory_space<vmem>>, vector<1x8xf32>,
    %844 = vector.extract_strided_slice %652 {offsets = [28, 0], sizes = [4, 32], strides = [1, 1]} : vector<32x32xf32> to vector<4x32xf32>
    %c0_405 = arith.constant 0 : index
    %c0_406 = arith.constant 0 : index
    %845 = vector.load %arg12[%c0_405, %c0_406] : memref<8x32xf32, #tpu.memory_space<vmem>>, vector<8x32xf32>
    %cst_407 = arith.constant dense<0.000000e+00> : vector<4x32xf32>
    %846 = tpu.matmul %835, %845, %cst_407 {dimension_numbers = #tpu.dot_dimension_numbers<[1], [0], [0], [1], [0, 0, 1, 1], [], []>} : vector<4x8xf32>, vector<8x32xf32>, vector<4x32xf32> -> vector<4x32xf32>
    %847 = arith.addf %844, %846 : vector<4x32xf32>
    %848 = arith.negf %847 : vector<4x32xf32>
    %849 = math.exp %848 : vector<4x32xf32>
    %cst_408 = arith.constant 1.000000e+00 : f32
    %850 = vector.broadcast %cst_408 : f32 to vector<4x32xf32>
    %851 = arith.addf %850, %849 : vector<4x32xf32>
    %852 = arith.divf %850, %851 : vector<4x32xf32>
    %853 = math.tanh %847 : vector<4x32xf32>
    %854 = vector.extract_strided_slice %852 {offsets = [0, 0], sizes = [4, 8], strides = [1, 1]} : vector<4x32xf32> to vector<4x8xf32>
    %855 = vector.extract_strided_slice %852 {offsets = [0, 8], sizes = [4, 8], strides = [1, 1]} : vector<4x32xf32> to vector<4x8xf32>
    %856 = vector.extract_strided_slice %852 {offsets = [0, 24], sizes = [4, 8], strides = [1, 1]} : vector<4x32xf32> to vector<4x8xf32>
    %857 = vector.extract_strided_slice %853 {offsets = [0, 16], sizes = [4, 8], strides = [1, 1]} : vector<4x32xf32> to vector<4x8xf32>
    %858 = arith.mulf %855, %833 : vector<4x8xf32>
    %859 = arith.mulf %854, %857 : vector<4x8xf32>
    %860 = arith.addf %858, %859 : vector<4x8xf32>
    %861 = math.tanh %860 : vector<4x8xf32>
    %862 = arith.mulf %856, %861 : vector<4x8xf32>
    %863 = vector.extract_strided_slice %862 {offsets = [0, 0], sizes = [1, 8], strides = [1, 1]} : vector<4x8xf32> to vector<1x8xf32>
    %c7_409 = arith.constant 7 : index
    %c0_410 = arith.constant 0 : index
    %864 = vector.load %arg14[%c7_409, %c0_410] : memref<32x8xf32, #tpu.memory_space<vmem>>, vector<1x8xf32>
    tpu.vector_store %arg14[%c7_409, %c0_410], %863 {strides = array<i32>} : memref<32x8xf32, #tpu.memory_space<vmem>>, vector<1x8xf32>,
    %865 = vector.extract_strided_slice %862 {offsets = [1, 0], sizes = [1, 8], strides = [1, 1]} : vector<4x8xf32> to vector<1x8xf32>
    %c15_411 = arith.constant 15 : index
    %c0_412 = arith.constant 0 : index
    %866 = vector.load %arg14[%c15_411, %c0_412] : memref<32x8xf32, #tpu.memory_space<vmem>>, vector<1x8xf32>
    tpu.vector_store %arg14[%c15_411, %c0_412], %865 {strides = array<i32>} : memref<32x8xf32, #tpu.memory_space<vmem>>, vector<1x8xf32>,
    %867 = vector.extract_strided_slice %862 {offsets = [2, 0], sizes = [1, 8], strides = [1, 1]} : vector<4x8xf32> to vector<1x8xf32>
    %c23_413 = arith.constant 23 : index
    %c0_414 = arith.constant 0 : index
    %868 = vector.load %arg14[%c23_413, %c0_414] : memref<32x8xf32, #tpu.memory_space<vmem>>, vector<1x8xf32>
    tpu.vector_store %arg14[%c23_413, %c0_414], %867 {strides = array<i32>} : memref<32x8xf32, #tpu.memory_space<vmem>>, vector<1x8xf32>,
    %869 = vector.extract_strided_slice %862 {offsets = [3, 0], sizes = [1, 8], strides = [1, 1]} : vector<4x8xf32> to vector<1x8xf32>
    %c31_415 = arith.constant 31 : index
    %c0_416 = arith.constant 0 : index
    %870 = vector.load %arg14[%c31_415, %c0_416] : memref<32x8xf32, #tpu.memory_space<vmem>>, vector<1x8xf32>
    tpu.vector_store %arg14[%c31_415, %c0_416], %869 {strides = array<i32>} : memref<32x8xf32, #tpu.memory_space<vmem>>, vector<1x8xf32>,
    return
  }
}

</mosaic_0001>

<bundles_post_ra>
// kernel: gapped_seq2vec_forward.1
= control target key start
LH: loop header
LB: loop body
LE: loop exit
PB: predicated region body
PF: predicated region fallthrough
CT: control target
= control target key end

     0   :  { %s6378_s0 = inlined_call_operand.vmem [shape: s32[32], index: 0, kind: input, shape index: {}]   ;;  %s6379_s1 = inlined_call_operand.vmem [shape: f32[22,8], index: 1, kind: input, shape index: {}]   ;;  %s6380_s2 = inlined_call_operand.hbm [shape: f32[8,128], index: 2, kind: input, shape index: {}]   ;;  %s6381_s3 = inlined_call_operand.vmem [shape: f32[32,128], index: 3, kind: input, shape index: {}]   ;;  %s6382_s4 = inlined_call_operand.vmem [shape: f32[1,128], index: 4, kind: input, shape index: {}]   ;;  %s6383_s5 = inlined_call_operand.vmem [shape: f32[32,128], index: 5, kind: input, shape index: {}]   ;;  %s6384_s6 = inlined_call_operand.vmem [shape: f32[32,128], index: 6, kind: input, shape index: {}]   ;;  %s6385_s7 = inlined_call_operand.vmem [shape: f32[1,128], index: 7, kind: input, shape index: {}]   ;;  %s6386_s8 = inlined_call_operand.hbm [shape: f32[32,32], index: 8, kind: input, shape index: {}]   ;;  %s6387_s9 = inlined_call_operand.hbm [shape: f32[8,32], index: 9, kind: input, shape index: {}]   ;;  %s6388_s10 = inlined_call_operand.hbm [shape: f32[1,32], index: 10, kind: input, shape index: {}]   ;;  %s6389_s11 = inlined_call_operand.hbm [shape: f32[8,32], index: 11, kind: input, shape index: {}]   ;;  %s6390_s12 = inlined_call_operand.hbm [shape: f32[8,32], index: 12, kind: input, shape index: {}]   ;;  %s6391_s13 = inlined_call_operand.hbm [shape: f32[1,32], index: 13, kind: input, shape index: {}]   ;;  %s6392_s14 = inlined_call_operand.hbm [shape: f32[32,8], index: 14, kind: output, shape index: {0}]   ;;  %s6393_s15 = inlined_call_operand.hbm [shape: f32[32,8], index: 15, kind: output, shape index: {1}]  }
   0x1   :  { %6399 = sst [smem:[#allocation29_spill]] %s6392_s14 }
   0x2   :  { %21 = vsyncpa [#allocation8], 0 }
   0x3   :  { %22 = vsyncpa [#allocation6], 0 }
   0x4   :  { %23 = vsyncpa [#allocation11], 0 }
   0x5   :  { %24 = vsyncpa [#allocation14], 0 }
   0x6   :  { %25 = vsyncpa [#allocation17], 0 }
   0x7   :  { %26 = vsyncpa [#allocation7], 0 }
   0x8   :  { %27 = vsyncpa [#allocation21], 0  ;;  %s5394_s18 = smov [#allocation10]   ;;  %s5170_s22 = scalar_lea.hbm %s6386_s8, 512 }
   0x9   :  { %s65_s19 = sshll.u32 %s5394_s18, 4  ;;  %p5171_p0 = scmp.ne.s32.totalorder %s6386_s8, %s5170_s22  ;;  %s66_s19 = int_to_ptr.vmem [resolvable:$true] %s65_s19 }
   0xa   :  { %p5174_p1 = scmp.lt.u32.totalorder %s5170_s22, %s6386_s8 }
   0xc   :  { %p5176_p2 = pnand %p5174_p1, %p5171_p0 }
   0xe   :  { %5179 = shalt.err (!%p5176_p2)
}
   0xf   :  { %s5180_s27 = scalar_lea.vmem %s66_s19, 512  ;;  %p5185_p4 = scmp.lt.s32.totalorder %s66_s19, %s66_s19 }
  0x10   :  { %p5181_p3 = scmp.ne.s32.totalorder %s66_s19, %s5180_s27  ;;  %p5186_p5 = scmp.lt.s32.totalorder %s5180_s27, %s5180_s27 }
  0x12   :  { %p5187_p6 = por %p5186_p5, %p5185_p4 }
  0x14   :  { %p5188_p7 = pnand %p5187_p6, %p5181_p3 }
  0x16   :  { %5191 = shalt.err (!%p5188_p7)
}
  0x17   :  { %s6395_s28 = smov 128   ;;  %s6397_s29 = smov 8  }
  0x18   :  { %71 = dma.hbm_to_vmem [thread:$0]  %s6386_s8, 512, %s66_s19, [#allocation11], %s6395_s28, %s6395_s28, %s6397_s29  }
  0x19   :  { %s5397_s17 = smov [#allocation13]   ;;  %s5398_s20 = smov [#allocation16]  }
  0x1a   :  { %s88_s18 = sshll.u32 %s5397_s17, 4  ;;  %s108_s21 = sshll.u32 %s5398_s20, 4  ;;  %s89_s18 = int_to_ptr.vmem [resolvable:$true] %s88_s18  ;;  %s109_s21 = int_to_ptr.vmem [resolvable:$true] %s108_s21 }
  0x1b   :  { %s5192_s24 = scalar_lea.hbm %s6388_s10, 16 }
  0x1c   :  { %p5193_p8 = scmp.ne.s32.totalorder %s6388_s10, %s5192_s24  ;;  %p5196_p9 = scmp.lt.u32.totalorder %s5192_s24, %s6388_s10 }
  0x1e   :  { %p5198_p10 = pnand %p5196_p9, %p5193_p8 }
  0x20   :  { %5201 = shalt.err (!%p5198_p10)
}
  0x21   :  { %s5202_s8 = scalar_lea.vmem %s89_s18, 16  ;;  %s5206_s19 = scalar_lea.vmem %s89_s18, 32 }
  0x22   :  { %p5203_p11 = scmp.ne.s32.totalorder %s89_s18, %s5202_s8  ;;  %p5207_p12 = scmp.lt.s32.totalorder %s89_s18, %s89_s18 }
  0x23   :  { %p5208_p13 = scmp.lt.s32.totalorder %s5206_s19, %s5202_s8 }
  0x25   :  { %p5209_p0 = por %p5208_p13, %p5207_p12 }
  0x27   :  { %p5210_p1 = pnand %p5209_p0, %p5203_p11 }
  0x29   :  { %5213 = shalt.err (!%p5210_p1)
}
  0x2a   :  { %91 = dma.hbm_to_vmem [thread:$0]  %s6388_s10, 16, %s89_s18, [#allocation14]  }
  0x2b   :  { %s34_s14 = sshll.u32 %s6378_s0, 4  ;;  %s5214_s24 = scalar_lea.hbm %s6390_s12, 128  ;;  %s35_s14 = int_to_ptr.vmem [resolvable:$true] %s34_s14 }
  0x2c   :  { %p5215_p2 = scmp.ne.s32.totalorder %s6390_s12, %s5214_s24  ;;  %p5218_p3 = scmp.lt.u32.totalorder %s5214_s24, %s6390_s12 }
  0x2e   :  { %p5220_p4 = pnand %p5218_p3, %p5215_p2 }
  0x30   :  { %5223 = shalt.err (!%p5220_p4)
}
  0x31   :  { %s5224_s10 = scalar_lea.vmem %s109_s21, 128  ;;  %p5229_p6 = scmp.lt.s32.totalorder %s109_s21, %s109_s21 }
  0x32   :  { %p5225_p5 = scmp.ne.s32.totalorder %s109_s21, %s5224_s10  ;;  %p5230_p7 = scmp.lt.s32.totalorder %s5224_s10, %s5224_s10 }
  0x34   :  { %p5231_p8 = por %p5230_p7, %p5229_p6 }
  0x36   :  { %p5232_p9 = pnand %p5231_p8, %p5225_p5 }
  0x38   :  { %5235 = shalt.err (!%p5232_p9)
}
  0x39   :  { %111 = dma.hbm_to_vmem [thread:$0]  %s6390_s12, 128, %s109_s21, [#allocation17]  }
  0x3a   :  { %s5236_s19 = scalar_lea.vmem %s35_s14, 16  ;;  %p5241_p11 = scmp.lt.s32.totalorder %s35_s14, %s35_s14 }
  0x3b   :  { %p5237_p10 = scmp.ne.s32.totalorder %s35_s14, %s5236_s19  ;;  %p5242_p12 = scmp.lt.s32.totalorder %s5236_s19, %s5236_s19 }
  0x3d   :  { %p5243_p13 = por %p5242_p12, %p5241_p11 }
  0x3f   :  { %p5244_p0 = pnand %p5243_p13, %p5237_p10 }
  0x41   :  { %5247 = shalt.err (!%p5244_p0)
}
  0x42   :  { %s5399_s30 = smov [#allocation5]   ;;  %s5400_s16 = smov [#allocation9]  }
  0x43   :  { %37 = dma.vmem_to_smem %s35_s14, 16, %s5399_s30, [#allocation8]  }
  0x44   :  { %s46_s17 = sshll.u32 %s5400_s16, 4  ;;  %s5401_s20 = smov [#allocation12]   ;;  %s47_s17 = int_to_ptr.vmem [resolvable:$true] %s46_s17 }
  0x45   :  { %s78_s22 = sshll.u32 %s5401_s20, 4  ;;  %s5248_s12 = scalar_lea.hbm %s6380_s2, 128  ;;  %s79_s22 = int_to_ptr.vmem [resolvable:$true] %s78_s22 }
  0x46   :  { %p5249_p1 = scmp.ne.s32.totalorder %s6380_s2, %s5248_s12  ;;  %p5252_p2 = scmp.lt.u32.totalorder %s5248_s12, %s6380_s2 }
  0x48   :  { %p5254_p3 = pnand %p5252_p2, %p5249_p1 }
  0x4a   :  { %5257 = shalt.err (!%p5254_p3)
}
  0x4b   :  { %s5258_s14 = scalar_lea.vmem %s47_s17, 128  ;;  %p5263_p5 = scmp.lt.s32.totalorder %s47_s17, %s47_s17 }
  0x4c   :  { %p5259_p4 = scmp.ne.s32.totalorder %s47_s17, %s5258_s14  ;;  %p5264_p6 = scmp.lt.s32.totalorder %s5258_s14, %s5258_s14 }
  0x4e   :  { %p5265_p7 = por %p5264_p6, %p5263_p5 }
  0x50   :  { %p5266_p8 = pnand %p5265_p7, %p5259_p4 }
  0x52   :  { %5269 = shalt.err (!%p5266_p8)
}
  0x53   :  { %49 = dma.hbm_to_vmem [thread:$0]  %s6380_s2, 128, %s47_s17, [#allocation6]  }
  0x54   :  { %s5270_s19 = scalar_lea.hbm %s6387_s9, 128 }
  0x55   :  { %p5271_p9 = scmp.ne.s32.totalorder %s6387_s9, %s5270_s19  ;;  %p5274_p10 = scmp.lt.u32.totalorder %s5270_s19, %s6387_s9 }
  0x57   :  { %p5276_p11 = pnand %p5274_p10, %p5271_p9 }
  0x59   :  { %5279 = shalt.err (!%p5276_p11)
}
  0x5a   :  { %s5280_s24 = scalar_lea.vmem %s79_s22, 128  ;;  %p5285_p13 = scmp.lt.s32.totalorder %s79_s22, %s79_s22 }
  0x5b   :  { %p5281_p12 = scmp.ne.s32.totalorder %s79_s22, %s5280_s24  ;;  %p5286_p0 = scmp.lt.s32.totalorder %s5280_s24, %s5280_s24 }
  0x5d   :  { %p5287_p1 = por %p5286_p0, %p5285_p13 }
  0x5f   :  { %p5288_p2 = pnand %p5287_p1, %p5281_p12 }
  0x61   :  { %5291 = shalt.err (!%p5288_p2)
}
  0x62   :  { %81 = dma.hbm_to_vmem [thread:$0]  %s6387_s9, 128, %s79_s22, [#allocation11]  }
  0x63   :  { %s5402_s12 = smov [#allocation15]   ;;  %s5403_s25 = smov [#allocation18]  }
  0x64   :  { %s98_s21 = sshll.u32 %s5402_s12, 4  ;;  %s118_s26 = sshll.u32 %s5403_s25, 4  ;;  %s99_s21 = int_to_ptr.vmem [resolvable:$true] %s98_s21  ;;  %s119_s26 = int_to_ptr.vmem [resolvable:$true] %s118_s26 }
  0x65   :  { %s5292_s8 = scalar_lea.hbm %s6389_s11, 128 }
  0x66   :  { %p5293_p3 = scmp.ne.s32.totalorder %s6389_s11, %s5292_s8  ;;  %p5296_p4 = scmp.lt.u32.totalorder %s5292_s8, %s6389_s11 }
  0x68   :  { %p5298_p5 = pnand %p5296_p4, %p5293_p3 }
  0x6a   :  { %5301 = shalt.err (!%p5298_p5)
}
  0x6b   :  { %s5302_s9 = scalar_lea.vmem %s99_s21, 128  ;;  %p5307_p7 = scmp.lt.s32.totalorder %s99_s21, %s99_s21 }
  0x6c   :  { %p5303_p6 = scmp.ne.s32.totalorder %s99_s21, %s5302_s9  ;;  %p5308_p8 = scmp.lt.s32.totalorder %s5302_s9, %s5302_s9 }
  0x6e   :  { %p5309_p9 = por %p5308_p8, %p5307_p7 }
  0x70   :  { %p5310_p10 = pnand %p5309_p9, %p5303_p6 }
  0x72   :  { %5313 = shalt.err (!%p5310_p10)
}
  0x73   :  { %101 = dma.hbm_to_vmem [thread:$0]  %s6389_s11, 128, %s99_s21, [#allocation14]  }
  0x74   :  { %s5314_s23 = scalar_lea.hbm %s6391_s13, 16 }
  0x75   :  { %p5315_p11 = scmp.ne.s32.totalorder %s6391_s13, %s5314_s23  ;;  %p5318_p12 = scmp.lt.u32.totalorder %s5314_s23, %s6391_s13 }
  0x77   :  { %p5320_p13 = pnand %p5318_p12, %p5315_p11 }
  0x79   :  { %5323 = shalt.err (!%p5320_p13)
}
  0x7a   :  { %s5324_s25 = scalar_lea.vmem %s119_s26, 16  ;;  %s5328_s27 = scalar_lea.vmem %s119_s26, 32 }
  0x7b   :  { %p5325_p0 = scmp.ne.s32.totalorder %s119_s26, %s5324_s25  ;;  %p5329_p1 = scmp.lt.s32.totalorder %s119_s26, %s119_s26 }
  0x7c   :  { %p5330_p2 = scmp.lt.s32.totalorder %s5328_s27, %s5324_s25 }
  0x7e   :  { %p5331_p3 = por %p5330_p2, %p5329_p1 }
  0x80   :  { %p5332_p4 = pnand %p5331_p3, %p5325_p0 }
  0x82   :  { %5335 = shalt.err (!%p5332_p4)
}
  0x83   :  { %121 = dma.hbm_to_vmem [thread:$0]  %s6391_s13, 16, %s119_s26, [#allocation17]  }
  0x84   :  { %5380 = dma.done.wait [#allocation8], 16  }
  0x85   :  { %5381 = vsyncadd [#allocation8], 4294967280 }
  0x86   :  { %5382 = dma.done.wait [#allocation6], 128  }
  0x87   :  { %5383 = vsyncadd [#allocation6], 4294967168 }
  0x88   :  { %5384 = dma.done.wait [#allocation11], 640  }
  0x89   :  { %5385 = vsyncadd [#allocation11], 4294966656 }
  0x8a   :  { %5386 = dma.done.wait [#allocation14], 144  }
  0x8b   :  { %5387 = vsyncadd [#allocation14], 4294967152 }
  0x8c   :  { %5388 = dma.done.wait [#allocation17], 144  }
  0x8d   :  { %5389 = vsyncadd [#allocation17], 4294967152 }
  0x8e   :  { %146 = sfence }
  0x8f   :  { %v418_v0 = vld [vmem:[%s6381_s3] sm:$0xff]  ;;  %v419_v1 = vld [vmem:[%s6381_s3 + $0x8] sm:$0xff]  ;;  %s147_s13 = sld [smem:[#allocation5]]  ;;  %v5404_v3 = vmov 0.0|0.0   ;;  %s5593_s26 = sld [smem:[#allocation5 + $0x1]]  ;;  %v420_v5 = vld [vmem:[%s6381_s3 + $0x10] sm:$0xff] }
  0x90   :  { %v312_v2 = vld [vmem:[#allocation9] sm:$0xff]  ;;  %4784 = vmatprep.subr.bf16.mxu1 %v5404_v3  ;;  %v5591_v4 = vpack.c.bf16 %v419_v1, %v418_v0  ;;  %s5595_s18 = sld [smem:[#allocation5 + $0x8]]  ;;  %s5597_s19 = sld [smem:[#allocation5 + $0x9]]  ;;  %v421_v6 = vld [vmem:[%s6381_s3 + $0x18] sm:$0xff]  ;;  %vm5405_vm0 = vmmov 0   ;;  %v5406_v8 = vmov 0.0  }
  0x91   :  { %4487 = vmatprep.subr.mxu0 %v312_v2  ;;  %s5599_s9 = sld [smem:[#allocation5 + $0x10]]  ;;  %s5608_s23 = sld [smem:[#allocation5 + $0x11]]  ;;  %v5612_v7 = vpack.c.bf16 %v421_v6, %v420_v5  ;;  %4503 = vmatprep.mubr.msk.f32.mxu1 %vm5405_vm0, %v5406_v8  ;;  %vm150_vm1 = vcmask 57344   ;;  %vm320_vm2 = vcmask 64512   ;;  %v5737_v29 = vld [vmem:[%s6382_s4] ss:$0 sm:$0xff] }
  0x92   :  { %4488 = vmatpush3.msra.mxu0 %v312_v2  ;;  %4786 = vmatpush3.bf16.msra.mxu1 %v5591_v4  ;;  %s5610_s24 = sld [smem:[#allocation5 + $0x18]]  ;;  %s5616_s2 = sld [smem:[#allocation5 + $0x19]]  ;;  %vm525_vm3 = vcmask 257024   ;;  %vm422_vm4 = vcmask 261120   ;;  %vm638_vm5 = vcmask 261124   ;;  %vm2448_vm6 = vcmask 60416  }
  0x93   :  { %4790 = vmatprep.subr.bf16.mxu0 %v5404_v3  ;;  %4787 = vmatprep.subr.bf16.mxu1 %v5404_v3  ;;  %s5618_s17 = sld [smem:[#allocation5 + $0x2]]  ;;  %s5622_s3 = sld [smem:[#allocation5 + $0x3]]  ;;  %vm3381_vm7 = vcmask 58369   ;;  %vm3383_vm8 = vcmask 59394   ;;  %vm3385_vm9 = vcmask 60419   ;;  %vm3495_vm10 = vcmask 61444  }
  0x94   :  { %s5624_s12 = sld [smem:[#allocation5 + $0xa]]  ;;  %s5629_s21 = sld [smem:[#allocation5 + $0xb]]  ;;  %vm3497_vm11 = vcmask 62469   ;;  %vm3499_vm12 = vcmask 63494   ;;  %vm3501_vm13 = vcmask 64519  }
  0x95   :  { %s148_s11 = scalar_lea.vmem %s6379_s1, %s147_s13  ;;  %s154_s10 = scalar_lea.vmem %s6379_s1, %s5593_s26 }
  0x96   :  { %v149_v9 = vld [vmem:[%s148_s11] sm:$0x1]  ;;  %s189_s30 = scalar_lea.vmem %s6379_s1, %s5595_s18  ;;  %4789 = vmatpush3.bf16.msra.mxu1 %v5612_v7  ;;  %s194_s20 = scalar_lea.vmem %s6379_s1, %s5597_s19 }
  0x97   :  { %151 = vst.msk [vmem:[#allocation20] sm:$0x1] %vm150_vm1, %v149_v9  ;;  %152 = vst.msk [vmem:[#allocation2] sm:$0x1] %vm150_vm1, %v149_v9  ;;  %v155_v10 = vld [vmem:[%s154_s10] sm:$0x1]  ;;  %s229_s27 = scalar_lea.vmem %s6379_s1, %s5599_s9  ;;  %4796 = vmatprep.subr.bf16.mxu1 %v5404_v3  ;;  %s234_s11 = scalar_lea.vmem %s6379_s1, %s5608_s23 }
  0x98   :  { %v190_v11 = vld [vmem:[%s189_s30] sm:$0x1]  ;;  %156 = vst.msk [vmem:[#allocation20 + $0x1] sm:$0x1] %vm150_vm1, %v155_v10  ;;  %157 = vst.msk [vmem:[#allocation2 + $0x4] sm:$0x1] %vm150_vm1, %v155_v10  ;;  %s269_s8 = scalar_lea.vmem %s6379_s1, %s5610_s24  ;;  %s274_s23 = scalar_lea.vmem %s6379_s1, %s5616_s2 }
  0x99   :  { %191 = vst.msk [vmem:[#allocation20 + $0x8] sm:$0x1] %vm150_vm1, %v190_v11  ;;  %192 = vst.msk [vmem:[#allocation2 + $0x1] sm:$0x1] %vm150_vm1, %v190_v11  ;;  %v195_v12 = vld [vmem:[%s194_s20] sm:$0x1]  ;;  %s159_s24 = scalar_lea.vmem %s6379_s1, %s5618_s17  ;;  %4504 = vmatmul.mubr.f32.vlgmr.msra.gmra.mrb[0].mxu1 %v5406_v8  ;;  %s164_s2 = scalar_lea.vmem %s6379_s1, %s5622_s3 }
  0x9a   :  { %v230_v13 = vld [vmem:[%s229_s27] sm:$0x1]  ;;  %196 = vst.msk [vmem:[#allocation20 + $0x9] sm:$0x1] %vm150_vm1, %v195_v12  ;;  %197 = vst.msk [vmem:[#allocation2 + $0x5] sm:$0x1] %vm150_vm1, %v195_v12  ;;  %s199_s17 = scalar_lea.vmem %s6379_s1, %s5624_s12  ;;  %4798 = vmatpush3.bf16.msra.mxu1 %v5591_v4  ;;  %4525 = vmatprep.mubr.msk.f32.mxu1 %vm5405_vm0, %v5406_v8  ;;  %s204_s27 = scalar_lea.vmem %s6379_s1, %s5629_s21 }
  0x9b   :  { %231 = vst.msk [vmem:[#allocation20 + $0x10] sm:$0x1] %vm150_vm1, %v230_v13  ;;  %232 = vst.msk [vmem:[#allocation2 + $0x2] sm:$0x1] %vm150_vm1, %v230_v13  ;;  %v235_v14 = vld [vmem:[%s234_s11] sm:$0x1]  ;;  %4799 = vmatprep.subr.bf16.mxu1 %v5404_v3 }
  0x9c   :  { %v270_v15 = vld [vmem:[%s269_s8] sm:$0x1]  ;;  %236 = vst.msk [vmem:[#allocation20 + $0x11] sm:$0x1] %vm150_vm1, %v235_v14  ;;  %237 = vst.msk [vmem:[#allocation2 + $0x6] sm:$0x1] %vm150_vm1, %v235_v14 }
  0x9d   :  { %271 = vst.msk [vmem:[#allocation20 + $0x18] sm:$0x1] %vm150_vm1, %v270_v15  ;;  %272 = vst.msk [vmem:[#allocation2 + $0x3] sm:$0x1] %vm150_vm1, %v270_v15  ;;  %v275_v16 = vld [vmem:[%s274_s23] sm:$0x1] }
  0x9e   :  { %v160_v17 = vld [vmem:[%s159_s24] sm:$0x1]  ;;  %276 = vst.msk [vmem:[#allocation20 + $0x19] sm:$0x1] %vm150_vm1, %v275_v16  ;;  %277 = vst.msk [vmem:[#allocation2 + $0x7] sm:$0x1] %vm150_vm1, %v275_v16  ;;  %4801 = vmatpush3.bf16.msra.mxu1 %v5612_v7 }
  0x9f   :  { %161 = vst.msk [vmem:[#allocation20 + $0x2] sm:$0x1] %vm150_vm1, %v160_v17  ;;  %162 = vst.msk [vmem:[#allocation2 + $0x8] sm:$0x1] %vm150_vm1, %v160_v17  ;;  %v165_v18 = vld [vmem:[%s164_s2] sm:$0x1]  ;;  %4808 = vmatprep.subr.bf16.mxu1 %v5404_v3 }
  0xa0   :  { %v200_v19 = vld [vmem:[%s199_s17] sm:$0x1]  ;;  %s4261_s12 = sld [smem:[#allocation5 + $0x12]]  ;;  %166 = vst.msk [vmem:[#allocation20 + $0x3] sm:$0x1] %vm150_vm1, %v165_v18  ;;  %s4262_s18 = sld [smem:[#allocation5 + $0x13]] }
  0xa1   :  { %167 = vst.msk [vmem:[#allocation2 + $0xc] sm:$0x1] %vm150_vm1, %v165_v18  ;;  %201 = vst.msk [vmem:[#allocation20 + $0xa] sm:$0x1] %vm150_vm1, %v200_v19  ;;  %v205_v20 = vld [vmem:[%s204_s27] sm:$0x1] }
  0xa2   :  { %202 = vst.msk [vmem:[#allocation2 + $0x9] sm:$0x1] %vm150_vm1, %v200_v19  ;;  %s4269_s19 = sld [smem:[#allocation5 + $0x1a]]  ;;  %206 = vst.msk [vmem:[#allocation20 + $0xb] sm:$0x1] %vm150_vm1, %v205_v20  ;;  %s4270_s11 = sld [smem:[#allocation5 + $0x1b]] }
  0xa3   :  { %207 = vst.msk [vmem:[#allocation2 + $0xd] sm:$0x1] %vm150_vm1, %v205_v20  ;;  %s5407_s25 = smov 64   ;;  %s5408_s4 = smov 32  }
  0xa4   :  { %s4247_s17 = sld [smem:[#allocation5 + $0x4]]  ;;  %s4248_s3 = sld [smem:[#allocation5 + $0x5]] }
  0xa5   :  { %v308_v21 = vld [vmem:[#allocation2] sm:$0xff]  ;;  %s4255_s26 = sld [smem:[#allocation5 + $0xc]]  ;;  %s4256_s27 = sld [smem:[#allocation5 + $0xd]] }
  0xa6   :  { %s239_s9 = scalar_lea.vmem %s6379_s1, %s4261_s12  ;;  %s244_s0 = scalar_lea.vmem %s6379_s1, %s4262_s18  ;;  %4489 = vmatprep.mubr.msk.f32.mxu0 %vm320_vm2, %v308_v21 }
  0xa7   :  { %v240_v22 = vld [vmem:[%s239_s9] sm:$0x1]  ;;  %s4263_s12 = sld [smem:[#allocation5 + $0x14]]  ;;  %s4264_s18 = sld [smem:[#allocation5 + $0x15]] }
  0xa8   :  { %s279_s30 = scalar_lea.vmem %s6379_s1, %s4269_s19  ;;  %241 = vst.msk [vmem:[#allocation20 + $0x12] sm:$0x1] %vm150_vm1, %v240_v22  ;;  %242 = vst.msk [vmem:[#allocation2 + $0xa] sm:$0x1] %vm150_vm1, %v240_v22  ;;  %v245_v23 = vld [vmem:[%s244_s0] sm:$0x1]  ;;  %s284_s16 = scalar_lea.vmem %s6379_s1, %s4270_s11 }
  0xa9   :  { %v280_v24 = vld [vmem:[%s279_s30] sm:$0x1]  ;;  %246 = vst.msk [vmem:[#allocation20 + $0x13] sm:$0x1] %vm150_vm1, %v245_v23  ;;  %247 = vst.msk [vmem:[#allocation2 + $0xe] sm:$0x1] %vm150_vm1, %v245_v23 }
  0xaa   :  { %281 = vst.msk [vmem:[#allocation20 + $0x1a] sm:$0x1] %vm150_vm1, %v280_v24  ;;  %282 = vst.msk [vmem:[#allocation2 + $0xb] sm:$0x1] %vm150_vm1, %v280_v24  ;;  %v285_v25 = vld [vmem:[%s284_s16] sm:$0x1]  ;;  %s169_s23 = scalar_lea.vmem %s6379_s1, %s4247_s17  ;;  %s174_s24 = scalar_lea.vmem %s6379_s1, %s4248_s3 }
  0xab   :  { %286 = vst.msk [vmem:[#allocation20 + $0x1b] sm:$0x1] %vm150_vm1, %v285_v25  ;;  %287 = vst.msk [vmem:[#allocation2 + $0xf] sm:$0x1] %vm150_vm1, %v285_v25  ;;  %s5754_s19 = sld [smem:[#allocation5 + $0x1c]]  ;;  %s5756_s11 = sld [smem:[#allocation5 + $0x1d]] }
  0xac   :  { %s5758_s21 = sld [smem:[#allocation5 + $0x6]]  ;;  %s5760_s14 = sld [smem:[#allocation5 + $0x7]]  ;;  %v170_v44 = vld [vmem:[%s169_s23] sm:$0x1] }
  0xad   :  { %s5762_s9 = sld [smem:[#allocation5 + $0xe]]  ;;  %s5764_s8 = sld [smem:[#allocation5 + $0xf]]  ;;  %v175_v45 = vld [vmem:[%s174_s24] sm:$0x1]  ;;  %171 = vst.msk [vmem:[#allocation20 + $0x4] sm:$0x1] %vm150_vm1, %v170_v44 }
  0xae   :  { %s209_s2 = scalar_lea.vmem %s6379_s1, %s4255_s26  ;;  %s214_s29 = scalar_lea.vmem %s6379_s1, %s4256_s27  ;;  %172 = vst.msk [vmem:[#allocation2 + $0x10] sm:$0x1] %vm150_vm1, %v170_v44  ;;  %176 = vst.msk [vmem:[#allocation20 + $0x5] sm:$0x1] %vm150_vm1, %v175_v45 }
  0xaf   :  { %177 = vst.msk [vmem:[#allocation2 + $0x14] sm:$0x1] %vm150_vm1, %v175_v45  ;;  %v210_v46 = vld [vmem:[%s209_s2] sm:$0x1]  ;;  %s249_s26 = scalar_lea.vmem %s6379_s1, %s4263_s12  ;;  %s254_s28 = scalar_lea.vmem %s6379_s1, %s4264_s18 }
  0xb0   :  { %v215_v47 = vld [vmem:[%s214_s29] sm:$0x1]  ;;  %211 = vst.msk [vmem:[#allocation20 + $0xc] sm:$0x1] %vm150_vm1, %v210_v46  ;;  %212 = vst.msk [vmem:[#allocation2 + $0x11] sm:$0x1] %vm150_vm1, %v210_v46 }
  0xb1   :  { %216 = vst.msk [vmem:[#allocation20 + $0xd] sm:$0x1] %vm150_vm1, %v215_v47  ;;  %217 = vst.msk [vmem:[#allocation2 + $0x15] sm:$0x1] %vm150_vm1, %v215_v47  ;;  %v250_v48 = vld [vmem:[%s249_s26] sm:$0x1]  ;;  %s289_s12 = scalar_lea.vmem %s6379_s1, %s5754_s19  ;;  %s294_s18 = scalar_lea.vmem %s6379_s1, %s5756_s11 }
  0xb2   :  { %v309_v26 = vld [vmem:[#allocation2 + $0x8] sm:$0xff]  ;;  %v255_v49 = vld [vmem:[%s254_s28] sm:$0x1]  ;;  %251 = vst.msk [vmem:[#allocation20 + $0x14] sm:$0x1] %vm150_vm1, %v250_v48  ;;  %s179_s19 = scalar_lea.vmem %s6379_s1, %s5758_s21  ;;  %s184_s11 = scalar_lea.vmem %s6379_s1, %s5760_s14 }
  0xb3   :  { %4490 = vmatmul.mubr.msk.f32.vlgmr.msra.gmra.mrb[0].mxu0 %vm320_vm2, %v309_v26  ;;  %252 = vst.msk [vmem:[#allocation2 + $0x12] sm:$0x1] %vm150_vm1, %v250_v48  ;;  %256 = vst.msk [vmem:[#allocation20 + $0x15] sm:$0x1] %vm150_vm1, %v255_v49  ;;  %v290_v51 = vld [vmem:[%s289_s12] sm:$0x1]  ;;  %s219_s21 = scalar_lea.vmem %s6379_s1, %s5762_s9  ;;  %s224_s14 = scalar_lea.vmem %s6379_s1, %s5764_s8 }
  0xb4   :  { %4792 = vmatpush3.bf16.msra.mxu0 %v5591_v4  ;;  %257 = vst.msk [vmem:[#allocation2 + $0x16] sm:$0x1] %vm150_vm1, %v255_v49  ;;  %v295_v52 = vld [vmem:[%s294_s18] sm:$0x1]  ;;  %291 = vst.msk [vmem:[#allocation20 + $0x1c] sm:$0x1] %vm150_vm1, %v290_v51 }
  0xb5   :  { %4793 = vmatprep.subr.bf16.mxu0 %v5404_v3  ;;  %292 = vst.msk [vmem:[#allocation2 + $0x13] sm:$0x1] %vm150_vm1, %v290_v51  ;;  %296 = vst.msk [vmem:[#allocation20 + $0x1d] sm:$0x1] %vm150_vm1, %v295_v52  ;;  %v180_v53 = vld [vmem:[%s179_s19] sm:$0x1] }
  0xb6   :  { %297 = vst.msk [vmem:[#allocation2 + $0x17] sm:$0x1] %vm150_vm1, %v295_v52  ;;  %v185_v54 = vld [vmem:[%s184_s11] sm:$0x1]  ;;  %181 = vst.msk [vmem:[#allocation20 + $0x6] sm:$0x1] %vm150_vm1, %v180_v53 }
  0xb7   :  { %182 = vst.msk [vmem:[#allocation2 + $0x18] sm:$0x1] %vm150_vm1, %v180_v53  ;;  %186 = vst.msk [vmem:[#allocation20 + $0x7] sm:$0x1] %vm150_vm1, %v185_v54  ;;  %v220_v55 = vld [vmem:[%s219_s21] sm:$0x1] }
  0xb8   :  { %4795 = vmatpush3.bf16.msra.mxu0 %v5612_v7  ;;  %187 = vst.msk [vmem:[#allocation2 + $0x1c] sm:$0x1] %vm150_vm1, %v185_v54  ;;  %v225_v56 = vld [vmem:[%s224_s14] sm:$0x1]  ;;  %s4265_s26 = sld [smem:[#allocation5 + $0x16]]  ;;  %s4266_s9 = sld [smem:[#allocation5 + $0x17]] }
  0xb9   :  { %4802 = vmatprep.subr.bf16.mxu0 %v5404_v3  ;;  %221 = vst.msk [vmem:[#allocation20 + $0xe] sm:$0x1] %vm150_vm1, %v220_v55  ;;  %222 = vst.msk [vmem:[#allocation2 + $0x19] sm:$0x1] %vm150_vm1, %v220_v55  ;;  %s4273_s8 = sld [smem:[#allocation5 + $0x1e]]  ;;  %s4274_s10 = sld [smem:[#allocation5 + $0x1f]] }
  0xba   :  { %226 = vst.msk [vmem:[#allocation20 + $0xf] sm:$0x1] %vm150_vm1, %v225_v56  ;;  %227 = vst.msk [vmem:[#allocation2 + $0x1d] sm:$0x1] %vm150_vm1, %v225_v56  ;;  %s5411_s27 = smov 104   ;;  %s5412_s12 = smov [#allocation20]  }
  0xbd   :  { %v310_v57 = vld [vmem:[#allocation2 + $0x10] sm:$0xff] }
  0xbe   :  { %s259_s29 = scalar_lea.vmem %s6379_s1, %s4265_s26  ;;  %4492 = vmatprep.mubr.msk.f32.mxu0 %vm320_vm2, %v310_v57  ;;  %s264_s23 = scalar_lea.vmem %s6379_s1, %s4266_s9 }
  0xbf   :  { %v260_v58 = vld [vmem:[%s259_s29] sm:$0x1]  ;;  %s299_s30 = scalar_lea.vmem %s6379_s1, %s4273_s8  ;;  %s304_s13 = scalar_lea.vmem %s6379_s1, %s4274_s10 }
  0xc0   :  { %261 = vst.msk [vmem:[#allocation20 + $0x16] sm:$0x1] %vm150_vm1, %v260_v58  ;;  %262 = vst.msk [vmem:[#allocation2 + $0x1a] sm:$0x1] %vm150_vm1, %v260_v58  ;;  %v265_v59 = vld [vmem:[%s264_s23] sm:$0x1] }
  0xc1   :  { %v300_v60 = vld [vmem:[%s299_s30] sm:$0x1]  ;;  %266 = vst.msk [vmem:[#allocation20 + $0x17] sm:$0x1] %vm150_vm1, %v265_v59  ;;  %267 = vst.msk [vmem:[#allocation2 + $0x1e] sm:$0x1] %vm150_vm1, %v265_v59 }
  0xc2   :  { %301 = vst.msk [vmem:[#allocation20 + $0x1e] sm:$0x1] %vm150_vm1, %v300_v60  ;;  %302 = vst.msk [vmem:[#allocation2 + $0x1b] sm:$0x1] %vm150_vm1, %v300_v60  ;;  %v305_v61 = vld [vmem:[%s304_s13] sm:$0x1] }
  0xc3   :  { %306 = vst.msk [vmem:[#allocation20 + $0x1f] sm:$0x1] %vm150_vm1, %v305_v61  ;;  %307 = vst.msk [vmem:[#allocation2 + $0x1f] sm:$0x1] %vm150_vm1, %v305_v61  ;;  %s4192_s23 = sshll.u32 %s5412_s12, 4  ;;  %s4193_s23 = int_to_ptr.vmem [resolvable:$true] %s4192_s23 }
  0xc4   :  { %s5336_s22 = scalar_lea.vmem %s4193_s23, 512  ;;  %p5341_p6 = scmp.lt.s32.totalorder %s4193_s23, %s4193_s23 }
  0xc5   :  { %p5337_p5 = scmp.ne.s32.totalorder %s4193_s23, %s5336_s22  ;;  %p5342_p7 = scmp.lt.s32.totalorder %s5336_s22, %s5336_s22 }
  0xc7   :  { %p5343_p8 = por %p5342_p7, %p5341_p6 }
  0xc9   :  { %p5344_p9 = pnand %p5343_p8, %p5337_p5 }
  0xca   :  { %v311_v62 = vld [vmem:[#allocation2 + $0x18] sm:$0xff] }
  0xcb   :  { %4493 = vmatmul.mubr.msk.f32.gmra.mrb[2].mxu0 %vm320_vm2, %v311_v62 }
  0xcc   :  { %4514 = vmatprep.mubr.msk.f32.mxu0 %vm5405_vm0, %v5406_v8 }
 0x16c   :  { %v492_v27 = vpop.f32.mrb[0].mxu1 }
 0x16d   :  { %v4505_v28 = vpop.f32.mrb[1].mxu1 }
 0x186   :  { %v5739_v30 = vpop.f32.mrb[0].mxu0 }
 0x187   :  { %v399_v31 = vpop.f32.mrb[1].mxu0  ;;  %v405_v28 = vadd.f32 %v5739_v30, %v5737_v29 }
 0x188   :  { %v5742_v32 = vadd.f32 %v5737_v29, %v399_v31 }
 0x18a   :  { %v496_v33 = vadd.f32 %v492_v27, %v5742_v32 }
 0x18c   :  { %4914 = vtanh.f32 %v496_v33  ;;  %v4280_v35 = vmul.f32 -1.442695, %v496_v33 }
 0x18e   :  { %4916 = vpow2.f32 %v4280_v35 }
 0x196   :  { %v4915_v34 = vpop.eup %4914 }
 0x197   :  { %506 = vrot.lane.b32.xlu0 %v4915_v34, %s5407_s25 }
 0x198   :  { %v4917_v36 = vpop.eup %4916 }
 0x199   :  { %v500_v37 = vadd.f32 1.0, %v4917_v36 }
 0x19b   :  { %4918 = vrcp.f32 %v500_v37 }
 0x19e   :  { %v5859_v1 = vpop.f32.mrb[2].mxu0 }
 0x19f   :  { %v5861_v5 = vpop.f32.mrb[3].mxu0 }
 0x1a5   :  { %v5746_v38 = vpop.eup %4918 }
 0x1a6   :  { %v504_v41 = vmul.f32 0.0, %v5746_v38 }
 0x209   :  { %v507_v39 = vpop.permute.xlu0 %506 }
 0x20a   :  { %v509_v40 = vmul.f32 %v5746_v38, %v507_v39 }
 0x20c   :  { %511 = vrot.lane.b32.xlu0 %v509_v40, %s5408_s4 }
 0x27e   :  { %v512_v42 = vpop.permute.xlu0 %511 }
 0x27f   :  { %v5751_v43 = vadd.f32 %v512_v42, %v504_v41 }
 0x281   :  { %4920 = vtanh.f32 %v5751_v43  ;;  %v615_v19 = vrot.slane %v5751_v43, 4 }
 0x28b   :  { %v4921_v50 = vpop.eup %4920 }
 0x28c   :  { %517 = vrot.lane.b32.xlu1 %v4921_v50, %s5407_s25 }
 0x2fe   :  { %v518_v63 = vpop.permute.xlu1 %517 }
 0x2ff   :  { %v520_v0 = vmul.f32 %v5746_v38, %v518_v63 }
 0x301   :  { %522 = vrot.lane.b32.xlu1 %v520_v0, %s5408_s4 }
 0x373   :  { %v523_v2 = vpop.permute.xlu1 %522 }
 0x374   :  { %526 = vst.msk [vmem:[#allocation3] sm:$0xf] %vm525_vm3, %v523_v2  ;;  %4515 = vmatmul.mubr.msk.f32.vlgmr.msra.gmra.mrb[4].mxu0 %vm422_vm4, %v523_v2 }
 0x375   :  { %4804 = vmatpush3.bf16.msra.mxu0 %v5591_v4  ;;  %4536 = vmatprep.mubr.msk.f32.mxu0 %vm5405_vm0, %v5406_v8 }
 0x376   :  { %4805 = vmatprep.subr.bf16.mxu0 %v5404_v3 }
 0x379   :  { %4807 = vmatpush3.bf16.msra.mxu0 %v5612_v7 }
 0x37a   :  { %4814 = vmatprep.subr.bf16.mxu0 %v5404_v3 }
 0x447   :  { %v599_v6 = vpop.f32.mrb[4].mxu0 }
 0x448   :  { %v604_v9 = vrot.slane %v599_v6, 4  ;;  %v4516_v10 = vpop.f32.mrb[5].mxu0 }
 0x449   :  { %v410_v10 = vadd.f32 %v5737_v29, %v5861_v5 }
 0x44a   :  { %v606_v11 = vadd.f32 %v604_v9, %v5742_v32 }
 0x44c   :  { %4922 = vtanh.f32 %v606_v11  ;;  %v4282_v13 = vmul.f32 -1.442695, %v606_v11 }
 0x44e   :  { %4924 = vpow2.f32 %v4282_v13 }
 0x456   :  { %v4923_v12 = vpop.eup %4922 }
 0x457   :  { %619 = vrot.lane.b32.xlu0 %v4923_v12, %s5407_s25 }
 0x458   :  { %v4925_v14 = vpop.eup %4924 }
 0x459   :  { %v610_v15 = vadd.f32 1.0, %v4925_v14 }
 0x45b   :  { %4926 = vrcp.f32 %v610_v15 }
 0x465   :  { %v4927_v16 = vpop.eup %4926 }
 0x466   :  { %v617_v20 = vmul.f32 %v4927_v16, %v615_v19 }
 0x4c9   :  { %v620_v17 = vpop.permute.xlu0 %619 }
 0x4ca   :  { %v622_v18 = vmul.f32 %v4927_v16, %v620_v17 }
 0x4cc   :  { %624 = vrot.lane.b32.xlu1 %v622_v18, %s5408_s4 }
 0x53e   :  { %v625_v21 = vpop.permute.xlu1 %624 }
 0x53f   :  { %v627_v22 = vadd.f32 %v625_v21, %v617_v20 }
 0x541   :  { %4928 = vtanh.f32 %v627_v22  ;;  %v728_v41 = vrot.slane %v627_v22, 4 }
 0x54b   :  { %v4929_v23 = vpop.eup %4928 }
 0x54c   :  { %630 = vrot.lane.b32.xlu0 %v4929_v23, %s5407_s25 }
 0x5be   :  { %v631_v24 = vpop.permute.xlu0 %630 }
 0x5bf   :  { %v5876_v25 = vmul.f32 %v4927_v16, %v631_v24 }
 0x5c1   :  { %v644_v26 = vrot.slane %v5876_v25, 4 }
 0x5c3   :  { %645 = vrot.lane.b32.xlu1 %v644_v26, %s5408_s4 }
 0x635   :  { %v646_v27 = vpop.permute.xlu1 %645 }
 0x636   :  { %4526 = vmatmul.mubr.msk.f32.vlgmr.msra.gmra.mrb[2].mxu1 %vm422_vm4, %v646_v27 }
 0x637   :  { %4810 = vmatpush3.bf16.msra.mxu1 %v5591_v4  ;;  %4547 = vmatprep.mubr.msk.f32.mxu1 %vm5405_vm0, %v5406_v8 }
 0x638   :  { %4811 = vmatprep.subr.bf16.mxu1 %v5404_v3 }
 0x63b   :  { %4813 = vmatpush3.bf16.msra.mxu1 %v5612_v7 }
 0x63c   :  { %4820 = vmatprep.subr.bf16.mxu1 %v5404_v3 }
 0x709   :  { %v715_v31 = vpop.f32.mrb[2].mxu1 }
 0x70a   :  { %v719_v32 = vadd.f32 %v715_v31, %v405_v28  ;;  %v4527_v33 = vpop.f32.mrb[3].mxu1 }
 0x70c   :  { %4930 = vtanh.f32 %v719_v32  ;;  %v4284_v35 = vmul.f32 -1.442695, %v719_v32 }
 0x70e   :  { %4932 = vpow2.f32 %v4284_v35 }
 0x716   :  { %v4931_v34 = vpop.eup %4930 }
 0x717   :  { %732 = vrot.lane.b32.xlu0 %v4931_v34, %s5407_s25 }
 0x718   :  { %v4933_v36 = vpop.eup %4932 }
 0x719   :  { %v723_v37 = vadd.f32 1.0, %v4933_v36 }
 0x71b   :  { %4934 = vrcp.f32 %v723_v37 }
 0x725   :  { %v4935_v38 = vpop.eup %4934 }
 0x726   :  { %v730_v42 = vmul.f32 %v4935_v38, %v728_v41 }
 0x789   :  { %v733_v39 = vpop.permute.xlu0 %732 }
 0x78a   :  { %v735_v40 = vmul.f32 %v4935_v38, %v733_v39 }
 0x78c   :  { %737 = vrot.lane.b32.xlu1 %v735_v40, %s5408_s4 }
 0x7fe   :  { %v738_v30 = vpop.permute.xlu1 %737 }
 0x7ff   :  { %v740_v43 = vadd.f32 %v738_v30, %v730_v42 }
 0x801   :  { %4936 = vtanh.f32 %v740_v43  ;;  %v840_v59 = vrot.slane %v740_v43, 4 }
 0x80b   :  { %v4937_v44 = vpop.eup %4936 }
 0x80c   :  { %743 = vrot.lane.b32.xlu0 %v4937_v44, %s5407_s25 }
 0x87e   :  { %v744_v45 = vpop.permute.xlu0 %743 }
 0x87f   :  { %v746_v46 = vmul.f32 %v4935_v38, %v744_v45 }
 0x881   :  { %748 = vrot.lane.b32.xlu1 %v746_v46, %s5408_s4 }
 0x8f3   :  { %v749_v47 = vpop.permute.xlu1 %748 }
 0x8f4   :  { %751 = vst.msk [vmem:[#allocation3 + $0x8] sm:$0xf] %vm525_vm3, %v749_v47  ;;  %4537 = vmatmul.mubr.msk.f32.vlgmr.msra.gmra.mrb[6].mxu0 %vm422_vm4, %v749_v47 }
 0x8f5   :  { %4816 = vmatpush3.bf16.msra.mxu0 %v5591_v4  ;;  %4558 = vmatprep.mubr.msk.f32.mxu0 %vm5405_vm0, %v5406_v8 }
 0x8f6   :  { %4817 = vmatprep.subr.bf16.mxu0 %v5404_v3 }
 0x8f9   :  { %4819 = vmatpush3.bf16.msra.mxu0 %v5612_v7 }
 0x8fa   :  { %4826 = vmatprep.subr.bf16.mxu0 %v5404_v3 }
 0x9c7   :  { %v824_v48 = vpop.f32.mrb[6].mxu0 }
 0x9c8   :  { %v829_v49 = vrot.slane %v824_v48, 4  ;;  %v4538_v50 = vpop.f32.mrb[7].mxu0  ;;  %v5938_v48 = vadd.f32 %v5859_v1, %v5737_v29 }
 0x9ca   :  { %v831_v51 = vadd.f32 %v829_v49, %v405_v28 }
 0x9cc   :  { %4938 = vtanh.f32 %v831_v51  ;;  %v4286_v53 = vmul.f32 -1.442695, %v831_v51 }
 0x9ce   :  { %4940 = vpow2.f32 %v4286_v53 }
 0x9d6   :  { %v4939_v52 = vpop.eup %4938 }
 0x9d7   :  { %844 = vrot.lane.b32.xlu0 %v4939_v52, %s5407_s25 }
 0x9d8   :  { %v4941_v54 = vpop.eup %4940 }
 0x9d9   :  { %v835_v55 = vadd.f32 1.0, %v4941_v54 }
 0x9db   :  { %4942 = vrcp.f32 %v835_v55 }
 0x9e5   :  { %v4943_v56 = vpop.eup %4942 }
 0x9e6   :  { %v842_v60 = vmul.f32 %v4943_v56, %v840_v59 }
 0xa49   :  { %v845_v57 = vpop.permute.xlu0 %844 }
 0xa4a   :  { %v847_v58 = vmul.f32 %v4943_v56, %v845_v57 }
 0xa4c   :  { %849 = vrot.lane.b32.xlu1 %v847_v58, %s5408_s4 }
 0xabe   :  { %v850_v61 = vpop.permute.xlu1 %849 }
 0xabf   :  { %v852_v62 = vadd.f32 %v850_v61, %v842_v60 }
 0xac1   :  { %4944 = vtanh.f32 %v852_v62  ;;  %v952_v21 = vrot.slane %v852_v62, 4  ;;  %v1316_v62 = vld [vmem:[%s6383_s5] sm:$0xff] }
 0xacb   :  { %v4945_v63 = vpop.eup %4944 }
 0xacc   :  { %855 = vrot.lane.b32.xlu0 %v4945_v63, %s5407_s25  ;;  %v1317_v63 = vld [vmem:[%s6383_s5 + $0x8] sm:$0xff] }
 0xb3e   :  { %v856_v0 = vpop.permute.xlu0 %855 }
 0xb3f   :  { %v5904_v2 = vmul.f32 %v4943_v56, %v856_v0  ;;  %v4832_v0 = vpack.c.bf16 %v1317_v63, %v1316_v62 }
 0xb41   :  { %v868_v6 = vrot.slane %v5904_v2, 4 }
 0xb43   :  { %869 = vrot.lane.b32.xlu1 %v868_v6, %s5408_s4  ;;  %v1318_v6 = vld [vmem:[%s6383_s5 + $0x10] sm:$0xff] }
 0xbb5   :  { %v870_v9 = vpop.permute.xlu1 %869 }
 0xbb6   :  { %4548 = vmatmul.mubr.msk.f32.vlgmr.msra.gmra.mrb[4].mxu1 %vm422_vm4, %v870_v9  ;;  %v1319_v9 = vld [vmem:[%s6383_s5 + $0x18] sm:$0xff] }
 0xbb7   :  { %4822 = vmatpush3.bf16.msra.mxu1 %v5591_v4  ;;  %4569 = vmatprep.mubr.msk.f32.mxu1 %vm5405_vm0, %v5406_v8 }
 0xbb8   :  { %4823 = vmatprep.subr.bf16.mxu1 %v5404_v3 }
 0xbbb   :  { %4825 = vmatpush3.bf16.msra.mxu1 %v5612_v7 }
 0xbbc   :  { %4833 = vmatprep.subr.bf16.mxu1 %v4832_v0 }
 0xc89   :  { %v939_v11 = vpop.f32.mrb[4].mxu1 }
 0xc8a   :  { %v943_v12 = vadd.f32 %v939_v11, %v410_v10  ;;  %v4549_v13 = vpop.f32.mrb[5].mxu1 }
 0xc8c   :  { %4946 = vtanh.f32 %v943_v12  ;;  %v4288_v15 = vmul.f32 -1.442695, %v943_v12 }
 0xc8e   :  { %4948 = vpow2.f32 %v4288_v15  ;;  %v1425_v15 = vld [vmem:[%s6384_s6 + $0x8] sm:$0xff] }
 0xc96   :  { %v4947_v14 = vpop.eup %4946 }
 0xc97   :  { %956 = vrot.lane.b32.xlu0 %v4947_v14, %s5407_s25  ;;  %v1424_v14 = vld [vmem:[%s6384_s6] sm:$0xff] }
 0xc98   :  { %v4949_v16 = vpop.eup %4948 }
 0xc99   :  { %v947_v17 = vadd.f32 1.0, %v4949_v16  ;;  %v5973_v16 = vpack.c.bf16 %v1425_v15, %v1424_v14 }
 0xc9b   :  { %4950 = vrcp.f32 %v947_v17  ;;  %v1426_v17 = vld [vmem:[%s6384_s6 + $0x10] sm:$0xff] }
 0xca5   :  { %v4951_v18 = vpop.eup %4950 }
 0xca6   :  { %v954_v22 = vmul.f32 %v4951_v18, %v952_v21 }
 0xd09   :  { %v957_v19 = vpop.permute.xlu0 %956 }
 0xd0a   :  { %v959_v20 = vmul.f32 %v4951_v18, %v957_v19 }
 0xd0c   :  { %961 = vrot.lane.b32.xlu1 %v959_v20, %s5408_s4 }
 0xd7e   :  { %v962_v5 = vpop.permute.xlu1 %961 }
 0xd7f   :  { %v964_v23 = vadd.f32 %v962_v5, %v954_v22 }
 0xd81   :  { %4952 = vtanh.f32 %v964_v23 }
 0xd8b   :  { %v4953_v24 = vpop.eup %4952 }
 0xd8c   :  { %967 = vrot.lane.b32.xlu0 %v4953_v24, %s5407_s25 }
 0xdfe   :  { %v968_v26 = vpop.permute.xlu0 %967 }
 0xdff   :  { %v970_v27 = vmul.f32 %v4951_v18, %v968_v26 }
 0xe01   :  { %972 = vrot.lane.b32.xlu1 %v970_v27, %s5408_s4 }
 0xe73   :  { %v973_v28 = vpop.permute.xlu1 %972 }
 0xe74   :  { %975 = vst.msk [vmem:[#allocation3 + $0x10] sm:$0xf] %vm525_vm3, %v973_v28  ;;  %4559 = vmatmul.mubr.msk.f32.vlgmr.msra.gmra.mrb[8].mxu0 %vm422_vm4, %v973_v28  ;;  %v6008_v28 = vld [vmem:[%s6385_s7] ss:$0 sm:$0xff]  ;;  %s5409_s7 = smov 112  }
 0xe75   :  { %4828 = vmatpush3.bf16.msra.mxu0 %v5591_v4  ;;  %4580 = vmatprep.mubr.msk.f32.mxu0 %vm5405_vm0, %v5406_v8 }
 0xe76   :  { %4829 = vmatprep.subr.bf16.mxu0 %v5404_v3 }
 0xe79   :  { %4831 = vmatpush3.bf16.msra.mxu0 %v5612_v7  ;;  %v1064_v7 = vrot.slane %v964_v23, 4 }
 0xe7a   :  { %4840 = vmatprep.subr.bf16.mxu0 %v5404_v3 }
 0xf47   :  { %v1048_v31 = vpop.f32.mrb[8].mxu0 }
 0xf48   :  { %v1053_v32 = vrot.slane %v1048_v31, 4  ;;  %v4560_v33 = vpop.f32.mrb[9].mxu0 }
 0xf4a   :  { %v1055_v34 = vadd.f32 %v1053_v32, %v410_v10 }
 0xf4c   :  { %4954 = vtanh.f32 %v1055_v34  ;;  %v4290_v36 = vmul.f32 -1.442695, %v1055_v34 }
 0xf4e   :  { %4956 = vpow2.f32 %v4290_v36 }
 0xf56   :  { %v4955_v35 = vpop.eup %4954 }
 0xf57   :  { %1068 = vrot.lane.b32.xlu0 %v4955_v35, %s5407_s25 }
 0xf58   :  { %v4957_v4 = vpop.eup %4956 }
 0xf59   :  { %v1059_v37 = vadd.f32 1.0, %v4957_v4 }
 0xf5b   :  { %4958 = vrcp.f32 %v1059_v37 }
 0xf65   :  { %v4959_v38 = vpop.eup %4958 }
 0xf66   :  { %v1066_v41 = vmul.f32 %v4959_v38, %v1064_v7 }
 0xfc9   :  { %v1069_v39 = vpop.permute.xlu0 %1068 }
 0xfca   :  { %v1071_v40 = vmul.f32 %v4959_v38, %v1069_v39 }
 0xfcc   :  { %1073 = vrot.lane.b32.xlu1 %v1071_v40, %s5408_s4 }
0x103e   :  { %v1074_v42 = vpop.permute.xlu1 %1073 }
0x103f   :  { %v1076_v30 = vadd.f32 %v1074_v42, %v1066_v41 }
0x1041   :  { %4960 = vtanh.f32 %v1076_v30  ;;  %v1176_v29 = vrot.slane %v1076_v30, 4 }
0x104b   :  { %v4961_v43 = vpop.eup %4960 }
0x104c   :  { %1079 = vrot.lane.b32.xlu0 %v4961_v43, %s5407_s25 }
0x10be   :  { %v1080_v44 = vpop.permute.xlu0 %1079 }
0x10bf   :  { %v5931_v45 = vmul.f32 %v4959_v38, %v1080_v44 }
0x10c1   :  { %v1092_v46 = vrot.slane %v5931_v45, 4 }
0x10c3   :  { %1093 = vrot.lane.b32.xlu1 %v1092_v46, %s5408_s4 }
0x1135   :  { %v1094_v47 = vpop.permute.xlu1 %1093 }
0x1136   :  { %4570 = vmatmul.mubr.msk.f32.vlgmr.msra.gmra.mrb[6].mxu1 %vm422_vm4, %v1094_v47 }
0x1137   :  { %4835 = vmatpush3.bf16.msra.mxu1 %v4832_v0 }
0x1209   :  { %v1163_v49 = vpop.f32.mrb[6].mxu1 }
0x120a   :  { %v1167_v50 = vadd.f32 %v1163_v49, %v5938_v48  ;;  %v4571_v51 = vpop.f32.mrb[7].mxu1 }
0x120c   :  { %4962 = vtanh.f32 %v1167_v50  ;;  %v4292_v53 = vmul.f32 -1.442695, %v1167_v50 }
0x120e   :  { %4964 = vpow2.f32 %v4292_v53 }
0x1216   :  { %v4963_v52 = vpop.eup %4962 }
0x1217   :  { %1180 = vrot.lane.b32.xlu0 %v4963_v52, %s5407_s25 }
0x1218   :  { %v4965_v54 = vpop.eup %4964 }
0x1219   :  { %v1171_v55 = vadd.f32 1.0, %v4965_v54 }
0x121b   :  { %4966 = vrcp.f32 %v1171_v55 }
0x1225   :  { %v4967_v56 = vpop.eup %4966 }
0x1226   :  { %v1178_v1 = vmul.f32 %v4967_v56, %v1176_v29 }
0x1289   :  { %v1181_v57 = vpop.permute.xlu0 %1180 }
0x128a   :  { %v1183_v58 = vmul.f32 %v4967_v56, %v1181_v57 }
0x128c   :  { %1185 = vrot.lane.b32.xlu1 %v1183_v58, %s5408_s4 }
0x12fe   :  { %v1186_v59 = vpop.permute.xlu1 %1185 }
0x12ff   :  { %v5943_v60 = vadd.f32 %v1186_v59, %v1178_v1 }
0x1301   :  { %4968 = vtanh.f32 %v5943_v60  ;;  %v1288_v47 = vrot.slane %v5943_v60, 4 }
0x130b   :  { %v4969_v61 = vpop.eup %4968 }
0x130c   :  { %1191 = vrot.lane.b32.xlu0 %v4969_v61, %s5407_s25 }
0x1310   :  { %635 = vrot.lane.b32.xlu0 %v5876_v25, %s5408_s4  ;;  %v4836_v25 = vpack.c.bf16 %v1319_v9, %v1318_v6 }
0x1312   :  { %4837 = vmatprep.subr.bf16.mxu1 %v4836_v25 }
0x1313   :  { %4839 = vmatpush3.bf16.msra.mxu1 %v4836_v25 }
0x1314   :  { %4846 = vmatprep.subr.bf16.mxu1 %v5404_v3 }
0x137e   :  { %v1192_v10 = vpop.permute.xlu0 %1191 }
0x137f   :  { %v1194_v11 = vmul.f32 %v4967_v56, %v1192_v10 }
0x1381   :  { %1196 = vrot.lane.b32.xlu1 %v1194_v11, %s5408_s4 }
0x1382   :  { %v636_v12 = vpop.permute.xlu0 %635 }
0x1383   :  { %639 = vst.msk [vmem:[#allocation3] sm:$0xf0] %vm638_vm5, %v636_v12 }
0x1385   :  { %860 = vrot.lane.b32.xlu1 %v5904_v2, %s5408_s4  ;;  %v1427_v2 = vld [vmem:[%s6384_s6 + $0x18] sm:$0xff] }
0x1386   :  { %v5984_v19 = vpack.c.bf16 %v1427_v2, %v1426_v17 }
0x138a   :  { %v1312_v13 = vld [vmem:[#allocation3] sm:$0xff] }
0x138b   :  { %4591 = vmatprep.mubr.msk.f32.mxu1 %vm422_vm4, %v1312_v13 }
0x13f3   :  { %v1197_v18 = vpop.permute.xlu1 %1196 }
0x13f4   :  { %1199 = vst.msk [vmem:[#allocation3 + $0x18] sm:$0xf] %vm525_vm3, %v1197_v18  ;;  %4581 = vmatmul.mubr.msk.f32.vlgmr.msra.gmra.mrb[10].mxu0 %vm422_vm4, %v1197_v18 }
0x13f5   :  { %4842 = vmatpush3.bf16.msra.mxu0 %v5973_v16  ;;  %4605 = vmatprep.mubr.msk.f32.mxu0 %vm5405_vm0, %v5406_v8 }
0x13f6   :  { %4843 = vmatprep.subr.bf16.mxu0 %v5404_v3 }
0x13f7   :  { %v861_v20 = vpop.permute.xlu1 %860 }
0x13f8   :  { %863 = vst.msk [vmem:[#allocation3 + $0x8] sm:$0xf0] %vm638_vm5, %v861_v20 }
0x13f9   :  { %4845 = vmatpush3.bf16.msra.mxu0 %v5984_v19 }
0x13fa   :  { %4852 = vmatprep.subr.bf16.mxu0 %v5404_v3 }
0x13fc   :  { %4606 = vmatmul.mubr.f32.vlgmr.msra.gmra.mrb[12].mxu0 %v5406_v8 }
0x13fd   :  { %4854 = vmatpush3.bf16.msra.mxu0 %v5973_v16  ;;  %4627 = vmatprep.mubr.msk.f32.mxu0 %vm5405_vm0, %v5406_v8 }
0x13fe   :  { %4855 = vmatprep.subr.bf16.mxu0 %v5404_v3 }
0x13ff   :  { %v1313_v21 = vld [vmem:[#allocation3 + $0x8] sm:$0xff] }
0x1400   :  { %4592 = vmatmul.mubr.msk.f32.vlgmr.msra.gmra.mrb[8].mxu1 %vm422_vm4, %v1313_v21 }
0x1401   :  { %4848 = vmatpush3.bf16.msra.mxu1 %v5973_v16  ;;  %4857 = vmatpush3.bf16.msra.mxu0 %v5984_v19 }
0x1402   :  { %4849 = vmatprep.subr.bf16.mxu1 %v5404_v3  ;;  %4864 = vmatprep.subr.bf16.mxu0 %v5404_v3 }
0x1405   :  { %4851 = vmatpush3.bf16.msra.mxu1 %v5984_v19 }
0x1406   :  { %4858 = vmatprep.subr.bf16.mxu1 %v5404_v3 }
0x14c7   :  { %v1272_v22 = vpop.f32.mrb[10].mxu0 }
0x14c8   :  { %v1277_v5 = vrot.slane %v1272_v22, 4  ;;  %v4582_v23 = vpop.f32.mrb[11].mxu0 }
0x14ca   :  { %v1279_v24 = vadd.f32 %v1277_v5, %v5938_v48 }
0x14cc   :  { %4970 = vtanh.f32 %v1279_v24  ;;  %v4294_v4 = vmul.f32 -1.442695, %v1279_v24 }
0x14cf   :  { %v1494_v26 = vpop.f32.mrb[12].mxu0 }
0x14d0   :  { %v4607_v27 = vpop.f32.mrb[13].mxu0 }
0x14d3   :  { %v6010_v31 = vpop.f32.mrb[8].mxu1 }
0x14d4   :  { %v1405_v32 = vpop.f32.mrb[9].mxu1  ;;  %v1411_v27 = vadd.f32 %v6010_v31, %v6008_v28 }
0x14d5   :  { %v6013_v33 = vadd.f32 %v6008_v28, %v1405_v32 }
0x14d6   :  { %v4971_v34 = vpop.eup %4970 }
0x14d7   :  { %v1498_v35 = vadd.f32 %v1494_v26, %v6013_v33  ;;  %1292 = vrot.lane.b32.xlu0 %v4971_v34, %s5407_s25 }
0x14d9   :  { %4972 = vtanh.f32 %v1498_v35  ;;  %v4300_v37 = vmul.f32 -1.442695, %v1498_v35 }
0x14da   :  { %4974 = vpow2.f32 %v4294_v4 }
0x14db   :  { %4976 = vpow2.f32 %v4300_v37 }
0x14e3   :  { %v4973_v36 = vpop.eup %4972 }
0x14e4   :  { %1508 = vrot.lane.b32.xlu1 %v4973_v36, %s5407_s25  ;;  %v4975_v38 = vpop.eup %4974 }
0x14e5   :  { %v1283_v39 = vadd.f32 1.0, %v4975_v38  ;;  %v4977_v40 = vpop.eup %4976 }
0x14e6   :  { %v1502_v7 = vadd.f32 1.0, %v4977_v40 }
0x14e7   :  { %4978 = vrcp.f32 %v1283_v39 }
0x14e8   :  { %4980 = vrcp.f32 %v1502_v7 }
0x14f1   :  { %v4979_v41 = vpop.eup %4978 }
0x14f2   :  { %v4981_v43 = vpop.eup %4980  ;;  %v1290_v48 = vmul.f32 %v4979_v41, %v1288_v47 }
0x14f3   :  { %v1506_v51 = vmul.f32 0.0, %v4981_v43 }
0x1549   :  { %v1293_v42 = vpop.permute.xlu0 %1292 }
0x154a   :  { %v1295_v30 = vmul.f32 %v4979_v41, %v1293_v42 }
0x154c   :  { %1297 = vrot.lane.b32.xlu0 %v1295_v30, %s5408_s4 }
0x1556   :  { %v1509_v44 = vpop.permute.xlu1 %1508 }
0x1557   :  { %v1511_v46 = vmul.f32 %v4981_v43, %v1509_v44 }
0x1559   :  { %1513 = vrot.lane.b32.xlu1 %v1511_v46, %s5408_s4 }
0x15be   :  { %v1298_v49 = vpop.permute.xlu0 %1297 }
0x15bf   :  { %v1300_v50 = vadd.f32 %v1298_v49, %v1290_v48 }
0x15c1   :  { %4982 = vtanh.f32 %v1300_v50 }
0x15cb   :  { %v4983_v52 = vpop.eup %4982  ;;  %v1514_v53 = vpop.permute.xlu1 %1513 }
0x15cc   :  { %v1516_v54 = vadd.f32 %v1514_v53, %v1506_v51  ;;  %1303 = vrot.lane.b32.xlu0 %v4983_v52, %s5407_s25 }
0x15ce   :  { %4984 = vtanh.f32 %v1516_v54  ;;  %v1610_v2 = vrot.slane %v1516_v54, 4 }
0x15d0   :  { %1084 = vrot.lane.b32.xlu0 %v5931_v45, %s5408_s4 }
0x15d8   :  { %v4985_v55 = vpop.eup %4984 }
0x15d9   :  { %1519 = vrot.lane.b32.xlu1 %v4985_v55, %s5407_s25 }
0x163e   :  { %v1304_v56 = vpop.permute.xlu0 %1303 }
0x163f   :  { %v1306_v57 = vmul.f32 %v4979_v41, %v1304_v56 }
0x1641   :  { %1308 = vrot.lane.b32.xlu1 %v1306_v57, %s5408_s4 }
0x1642   :  { %v1085_v58 = vpop.permute.xlu0 %1084 }
0x1643   :  { %1087 = vst.msk [vmem:[#allocation3 + $0x10] sm:$0xf0] %vm638_vm5, %v1085_v58 }
0x164a   :  { %v1314_v29 = vld [vmem:[#allocation3 + $0x10] sm:$0xff] }
0x164b   :  { %4594 = vmatprep.mubr.msk.f32.mxu1 %vm422_vm4, %v1314_v29  ;;  %v1520_v1 = vpop.permute.xlu1 %1519 }
0x164c   :  { %v1522_v59 = vmul.f32 %v4981_v43, %v1520_v1 }
0x164e   :  { %1524 = vrot.lane.b32.xlu0 %v1522_v59, %s5408_s4 }
0x16b3   :  { %v1309_v60 = vpop.permute.xlu1 %1308 }
0x16b4   :  { %1311 = vst.msk [vmem:[#allocation3 + $0x18] sm:$0xf0] %vm638_vm5, %v1309_v60 }
0x16bb   :  { %v1315_v45 = vld [vmem:[#allocation3 + $0x18] sm:$0xff] }
0x16bc   :  { %4595 = vmatmul.mubr.msk.f32.gmra.mrb[10].mxu1 %vm422_vm4, %v1315_v45 }
0x16bd   :  { %4616 = vmatprep.mubr.msk.f32.mxu1 %vm5405_vm0, %v5406_v8 }
0x16c0   :  { %v1525_v61 = vpop.permute.xlu0 %1524 }
0x16c1   :  { %4617 = vmatmul.mubr.msk.f32.vlgmr.msra.gmra.mrb[12].mxu1 %vm422_vm4, %v1525_v61 }
0x16c2   :  { %4860 = vmatpush3.bf16.msra.mxu1 %v5973_v16  ;;  %4638 = vmatprep.mubr.msk.f32.mxu1 %vm5405_vm0, %v5406_v8 }
0x16c3   :  { %4861 = vmatprep.subr.bf16.mxu1 %v5404_v3 }
0x16c6   :  { %4863 = vmatpush3.bf16.msra.mxu1 %v5984_v19 }
0x16c7   :  { %4870 = vmatprep.subr.bf16.mxu1 %v5404_v3 }
0x178f   :  { %v6040_v62 = vpop.f32.mrb[10].mxu1 }
0x1790   :  { %v6042_v63 = vpop.f32.mrb[11].mxu1 }
0x1794   :  { %v1594_v0 = vpop.f32.mrb[12].mxu1 }
0x1795   :  { %v1599_v6 = vrot.slane %v1594_v0, 4  ;;  %v4618_v9 = vpop.f32.mrb[13].mxu1 }
0x1796   :  { %v1416_v9 = vadd.f32 %v6008_v28, %v6042_v63 }
0x1797   :  { %v1601_v25 = vadd.f32 %v1599_v6, %v6013_v33 }
0x1799   :  { %4986 = vtanh.f32 %v1601_v25  ;;  %v4302_v11 = vmul.f32 -1.442695, %v1601_v25 }
0x179b   :  { %4988 = vpow2.f32 %v4302_v11 }
0x17a3   :  { %v4987_v10 = vpop.eup %4986 }
0x17a4   :  { %1614 = vrot.lane.b32.xlu1 %v4987_v10, %s5407_s25 }
0x17a5   :  { %v4989_v12 = vpop.eup %4988 }
0x17a6   :  { %v1605_v13 = vadd.f32 1.0, %v4989_v12 }
0x17a8   :  { %4990 = vrcp.f32 %v1605_v13 }
0x17b2   :  { %v4991_v14 = vpop.eup %4990 }
0x17b3   :  { %v1612_v18 = vmul.f32 %v4991_v14, %v1610_v2 }
0x1816   :  { %v1615_v15 = vpop.permute.xlu1 %1614 }
0x1817   :  { %v1617_v17 = vmul.f32 %v4991_v14, %v1615_v15 }
0x1819   :  { %1619 = vrot.lane.b32.xlu0 %v1617_v17, %s5408_s4 }
0x188b   :  { %v1620_v20 = vpop.permute.xlu0 %1619 }
0x188c   :  { %v1622_v21 = vadd.f32 %v1620_v20, %v1612_v18 }
0x188e   :  { %4992 = vtanh.f32 %v1622_v21  ;;  %v1714_v7 = vrot.slane %v1622_v21, 4 }
0x1898   :  { %v4993_v22 = vpop.eup %4992 }
0x1899   :  { %1625 = vrot.lane.b32.xlu1 %v4993_v22, %s5407_s25 }
0x190b   :  { %v1626_v5 = vpop.permute.xlu1 %1625 }
0x190c   :  { %v1628_v23 = vmul.f32 %v4991_v14, %v1626_v5 }
0x190e   :  { %v1630_v24 = vrot.slane %v1628_v23, 4 }
0x1910   :  { %1631 = vrot.lane.b32.xlu0 %v1630_v24, %s5408_s4 }
0x1982   :  { %v1632_v26 = vpop.permute.xlu0 %1631 }
0x1983   :  { %4628 = vmatmul.mubr.msk.f32.vlgmr.msra.gmra.mrb[14].mxu0 %vm422_vm4, %v1632_v26 }
0x1984   :  { %4866 = vmatpush3.bf16.msra.mxu0 %v5973_v16  ;;  %4649 = vmatprep.mubr.msk.f32.mxu0 %vm5405_vm0, %v5406_v8 }
0x1985   :  { %4867 = vmatprep.subr.bf16.mxu0 %v5404_v3 }
0x1988   :  { %4869 = vmatpush3.bf16.msra.mxu0 %v5984_v19 }
0x1989   :  { %4876 = vmatprep.subr.bf16.mxu0 %v5404_v3 }
0x1a56   :  { %v1701_v32 = vpop.f32.mrb[14].mxu0 }
0x1a57   :  { %v1705_v33 = vadd.f32 %v1701_v32, %v1411_v27  ;;  %v4629_v34 = vpop.f32.mrb[15].mxu0 }
0x1a59   :  { %4994 = vtanh.f32 %v1705_v33  ;;  %v4304_v36 = vmul.f32 -1.442695, %v1705_v33 }
0x1a5b   :  { %4996 = vpow2.f32 %v4304_v36 }
0x1a63   :  { %v4995_v35 = vpop.eup %4994 }
0x1a64   :  { %1718 = vrot.lane.b32.xlu1 %v4995_v35, %s5407_s25 }
0x1a65   :  { %v4997_v4 = vpop.eup %4996 }
0x1a66   :  { %v1709_v37 = vadd.f32 1.0, %v4997_v4 }
0x1a68   :  { %4998 = vrcp.f32 %v1709_v37 }
0x1a72   :  { %v4999_v38 = vpop.eup %4998 }
0x1a73   :  { %v1716_v41 = vmul.f32 %v4999_v38, %v1714_v7 }
0x1ad6   :  { %v1719_v39 = vpop.permute.xlu1 %1718 }
0x1ad7   :  { %v1721_v40 = vmul.f32 %v4999_v38, %v1719_v39 }
0x1ad9   :  { %1723 = vrot.lane.b32.xlu0 %v1721_v40, %s5408_s4 }
0x1b4b   :  { %v1724_v31 = vpop.permute.xlu0 %1723 }
0x1b4c   :  { %v1726_v42 = vadd.f32 %v1724_v31, %v1716_v41 }
0x1b4e   :  { %5000 = vtanh.f32 %v1726_v42  ;;  %v1820_v58 = vrot.slane %v1726_v42, 4 }
0x1b58   :  { %v5001_v30 = vpop.eup %5000 }
0x1b59   :  { %1729 = vrot.lane.b32.xlu1 %v5001_v30, %s5407_s25 }
0x1bcb   :  { %v1730_v43 = vpop.permute.xlu1 %1729 }
0x1bcc   :  { %v1732_v44 = vmul.f32 %v4999_v38, %v1730_v43 }
0x1bce   :  { %1734 = vrot.lane.b32.xlu0 %v1732_v44, %s5408_s4 }
0x1c40   :  { %v1735_v46 = vpop.permute.xlu0 %1734 }
0x1c41   :  { %4639 = vmatmul.mubr.msk.f32.vlgmr.msra.gmra.mrb[14].mxu1 %vm422_vm4, %v1735_v46  ;;  %v1421_v46 = vadd.f32 %v6040_v62, %v6008_v28 }
0x1c42   :  { %4872 = vmatpush3.bf16.msra.mxu1 %v5973_v16  ;;  %4660 = vmatprep.mubr.msk.f32.mxu1 %vm5405_vm0, %v5406_v8 }
0x1c43   :  { %4873 = vmatprep.subr.bf16.mxu1 %v5404_v3 }
0x1c46   :  { %4875 = vmatpush3.bf16.msra.mxu1 %v5984_v19 }
0x1c47   :  { %4882 = vmatprep.subr.bf16.mxu1 %v5404_v3 }
0x1d14   :  { %v1804_v47 = vpop.f32.mrb[14].mxu1 }
0x1d15   :  { %v1809_v48 = vrot.slane %v1804_v47, 4  ;;  %v4640_v49 = vpop.f32.mrb[15].mxu1 }
0x1d17   :  { %v1811_v50 = vadd.f32 %v1809_v48, %v1411_v27 }
0x1d19   :  { %5002 = vtanh.f32 %v1811_v50  ;;  %v4306_v52 = vmul.f32 -1.442695, %v1811_v50 }
0x1d1b   :  { %5004 = vpow2.f32 %v4306_v52 }
0x1d23   :  { %v5003_v51 = vpop.eup %5002 }
0x1d24   :  { %1824 = vrot.lane.b32.xlu1 %v5003_v51, %s5407_s25 }
0x1d25   :  { %v5005_v53 = vpop.eup %5004 }
0x1d26   :  { %v1815_v54 = vadd.f32 1.0, %v5005_v53 }
0x1d28   :  { %5006 = vrcp.f32 %v1815_v54 }
0x1d32   :  { %v5007_v55 = vpop.eup %5006 }
0x1d33   :  { %v1822_v29 = vmul.f32 %v5007_v55, %v1820_v58 }
0x1d96   :  { %v1825_v56 = vpop.permute.xlu1 %1824 }
0x1d97   :  { %v1827_v57 = vmul.f32 %v5007_v55, %v1825_v56 }
0x1d99   :  { %1829 = vrot.lane.b32.xlu0 %v1827_v57, %s5408_s4 }
0x1e0b   :  { %v1830_v1 = vpop.permute.xlu0 %1829 }
0x1e0c   :  { %v1832_v59 = vadd.f32 %v1830_v1, %v1822_v29 }
0x1e0e   :  { %5008 = vtanh.f32 %v1832_v59  ;;  %v1924_v20 = vrot.slane %v1832_v59, 4 }
0x1e18   :  { %v5009_v60 = vpop.eup %5008 }
0x1e19   :  { %1835 = vrot.lane.b32.xlu1 %v5009_v60, %s5407_s25 }
0x1e8b   :  { %v1836_v45 = vpop.permute.xlu1 %1835 }
0x1e8c   :  { %v1838_v61 = vmul.f32 %v5007_v55, %v1836_v45 }
0x1e8e   :  { %v1840_v0 = vrot.slane %v1838_v61, 4 }
0x1e90   :  { %1841 = vrot.lane.b32.xlu0 %v1840_v0, %s5408_s4 }
0x1f02   :  { %v1842_v6 = vpop.permute.xlu0 %1841 }
0x1f03   :  { %4650 = vmatmul.mubr.msk.f32.vlgmr.msra.gmra.mrb[16].mxu0 %vm422_vm4, %v1842_v6 }
0x1f04   :  { %4878 = vmatpush3.bf16.msra.mxu0 %v5973_v16  ;;  %4671 = vmatprep.mubr.msk.f32.mxu0 %vm5405_vm0, %v5406_v8 }
0x1f05   :  { %4879 = vmatprep.subr.bf16.mxu0 %v5404_v3 }
0x1f08   :  { %4881 = vmatpush3.bf16.msra.mxu0 %v5984_v19 }
0x1f09   :  { %4888 = vmatprep.subr.bf16.mxu0 %v5404_v3 }
0x1fd6   :  { %v1911_v25 = vpop.f32.mrb[16].mxu0 }
0x1fd7   :  { %v1915_v10 = vadd.f32 %v1911_v25, %v1416_v9  ;;  %v4651_v11 = vpop.f32.mrb[17].mxu0 }
0x1fd9   :  { %5010 = vtanh.f32 %v1915_v10  ;;  %v4308_v13 = vmul.f32 -1.442695, %v1915_v10 }
0x1fdb   :  { %5012 = vpow2.f32 %v4308_v13 }
0x1fe3   :  { %v5011_v12 = vpop.eup %5010 }
0x1fe4   :  { %1928 = vrot.lane.b32.xlu1 %v5011_v12, %s5407_s25 }
0x1fe5   :  { %v5013_v14 = vpop.eup %5012 }
0x1fe6   :  { %v1919_v15 = vadd.f32 1.0, %v5013_v14 }
0x1fe8   :  { %5014 = vrcp.f32 %v1919_v15 }
0x1ff2   :  { %v5015_v17 = vpop.eup %5014 }
0x1ff3   :  { %v1926_v21 = vmul.f32 %v5015_v17, %v1924_v20  ;;  %v2259_v20 = vld [vmem:[#allocation10] sm:$0xff] }
0x2056   :  { %v1929_v2 = vpop.permute.xlu1 %1928 }
0x2057   :  { %v1931_v18 = vmul.f32 %v5015_v17, %v1929_v2 }
0x2059   :  { %1933 = vrot.lane.b32.xlu0 %v1931_v18, %s5408_s4 }
0x20cb   :  { %v1934_v63 = vpop.permute.xlu0 %1933 }
0x20cc   :  { %v1936_v22 = vadd.f32 %v1934_v63, %v1926_v21  ;;  %v2260_v21 = vld [vmem:[#allocation10 + $0x8] sm:$0xff]  ;;  %v2261_v63 = vld [vmem:[#allocation10 + $0x10] sm:$0xff] }
0x20ce   :  { %5016 = vtanh.f32 %v1936_v22 }
0x20d8   :  { %v5017_v5 = vpop.eup %5016 }
0x20d9   :  { %1939 = vrot.lane.b32.xlu1 %v5017_v5, %s5407_s25  ;;  %v2262_v5 = vld [vmem:[#allocation10 + $0x18] sm:$0xff] }
0x214b   :  { %v1940_v23 = vpop.permute.xlu1 %1939 }
0x214c   :  { %v1942_v24 = vmul.f32 %v5015_v17, %v1940_v23  ;;  %v6111_v23 = vld [vmem:[#allocation12] sm:$0xff] }
0x214e   :  { %1944 = vrot.lane.b32.xlu0 %v1942_v24, %s5408_s4  ;;  %v4892_v24 = vpack.c.bf16 %v2262_v5, %v2261_v63 }
0x21c0   :  { %v1945_v26 = vpop.permute.xlu0 %1944 }
0x21c1   :  { %4661 = vmatmul.mubr.msk.f32.vlgmr.msra.gmra.mrb[16].mxu1 %vm422_vm4, %v1945_v26 }
0x21c2   :  { %4884 = vmatpush3.bf16.msra.mxu1 %v5973_v16  ;;  %4682 = vmatprep.mubr.msk.f32.mxu1 %vm5405_vm0, %v5406_v8 }
0x21c3   :  { %4885 = vmatprep.subr.bf16.mxu1 %v5404_v3 }
0x21c6   :  { %4887 = vmatpush3.bf16.msra.mxu1 %v5984_v19  ;;  %v2030_v19 = vrot.slane %v1936_v22, 4  ;;  %v4889_v22 = vpack.c.bf16 %v2260_v21, %v2259_v20 }
0x21c7   :  { %4696 = vmatprep.subr.mxu1 %v5406_v8 }
0x2294   :  { %v2014_v27 = vpop.f32.mrb[16].mxu1 }
0x2295   :  { %v2019_v32 = vrot.slane %v2014_v27, 4  ;;  %v4662_v33 = vpop.f32.mrb[17].mxu1 }
0x2297   :  { %v2021_v34 = vadd.f32 %v2019_v32, %v1416_v9 }
0x2299   :  { %5018 = vtanh.f32 %v2021_v34  ;;  %v4310_v36 = vmul.f32 -1.442695, %v2021_v34 }
0x229b   :  { %5020 = vpow2.f32 %v4310_v36  ;;  %v4315_v36 = vld [vmem:[#allocation13] ss:$0 sm:$0xff] }
0x22a3   :  { %v5019_v35 = vpop.eup %5018 }
0x22a4   :  { %2034 = vrot.lane.b32.xlu1 %v5019_v35, %s5407_s25 }
0x22a5   :  { %v5021_v16 = vpop.eup %5020 }
0x22a6   :  { %v2025_v4 = vadd.f32 1.0, %v5021_v16 }
0x22a8   :  { %5022 = vrcp.f32 %v2025_v4 }
0x22b2   :  { %v5023_v37 = vpop.eup %5022 }
0x22b3   :  { %v2032_v40 = vmul.f32 %v5023_v37, %v2030_v19 }
0x2316   :  { %v2035_v38 = vpop.permute.xlu1 %2034 }
0x2317   :  { %v2037_v39 = vmul.f32 %v5023_v37, %v2035_v38 }
0x2319   :  { %2039 = vrot.lane.b32.xlu0 %v2037_v39, %s5408_s4 }
0x238b   :  { %v2040_v7 = vpop.permute.xlu0 %2039 }
0x238c   :  { %v2042_v41 = vadd.f32 %v2040_v7, %v2032_v40 }
0x238e   :  { %5024 = vtanh.f32 %v2042_v41  ;;  %v2134_v57 = vrot.slane %v2042_v41, 4 }
0x2398   :  { %v5025_v31 = vpop.eup %5024 }
0x2399   :  { %2045 = vrot.lane.b32.xlu1 %v5025_v31, %s5407_s25 }
0x240b   :  { %v2046_v42 = vpop.permute.xlu1 %2045 }
0x240c   :  { %v2048_v30 = vmul.f32 %v5023_v37, %v2046_v42 }
0x240e   :  { %v2050_v43 = vrot.slane %v2048_v30, 4 }
0x2410   :  { %2051 = vrot.lane.b32.xlu0 %v2050_v43, %s5408_s4 }
0x2482   :  { %v2052_v44 = vpop.permute.xlu0 %2051 }
0x2483   :  { %4672 = vmatmul.mubr.msk.f32.vlgmr.msra.gmra.mrb[18].mxu0 %vm422_vm4, %v2052_v44 }
0x2484   :  { %4693 = vmatprep.mubr.msk.f32.mxu0 %vm5405_vm0, %v5406_v8  ;;  %4890 = vmatpush3.bf16.msra.mxu0 %v4889_v22 }
0x2485   :  { %4891 = vmatprep.subr.bf16.mxu0 %v5404_v3 }
0x2488   :  { %4893 = vmatpush3.bf16.msra.mxu0 %v4892_v24 }
0x2489   :  { %4701 = vmatprep.subr.mxu0 %v5406_v8 }
0x2556   :  { %v2121_v47 = vpop.f32.mrb[18].mxu0 }
0x2557   :  { %v2125_v48 = vadd.f32 %v2121_v47, %v1421_v46  ;;  %v4673_v49 = vpop.f32.mrb[19].mxu0 }
0x2559   :  { %5026 = vtanh.f32 %v2125_v48  ;;  %v4312_v51 = vmul.f32 -1.442695, %v2125_v48 }
0x255b   :  { %5028 = vpow2.f32 %v4312_v51 }
0x2563   :  { %v5027_v50 = vpop.eup %5026 }
0x2564   :  { %2138 = vrot.lane.b32.xlu1 %v5027_v50, %s5407_s25 }
0x2565   :  { %v5029_v52 = vpop.eup %5028 }
0x2566   :  { %v2129_v53 = vadd.f32 1.0, %v5029_v52 }
0x2568   :  { %5030 = vrcp.f32 %v2129_v53 }
0x2572   :  { %v5031_v54 = vpop.eup %5030 }
0x2573   :  { %v2136_v58 = vmul.f32 %v5031_v54, %v2134_v57 }
0x25d6   :  { %v2139_v55 = vpop.permute.xlu1 %2138 }
0x25d7   :  { %v2141_v56 = vmul.f32 %v5031_v54, %v2139_v55 }
0x25d9   :  { %2143 = vrot.lane.b32.xlu0 %v2141_v56, %s5408_s4 }
0x264b   :  { %v2144_v28 = vpop.permute.xlu0 %2143 }
0x264c   :  { %v2146_v62 = vadd.f32 %v2144_v28, %v2136_v58 }
0x264e   :  { %5032 = vtanh.f32 %v2146_v62  ;;  %v2240_v15 = vrot.slane %v2146_v62, 4 }
0x2658   :  { %v5033_v29 = vpop.eup %5032 }
0x2659   :  { %2149 = vrot.lane.b32.xlu1 %v5033_v29, %s5407_s25 }
0x26cb   :  { %v2150_v1 = vpop.permute.xlu1 %2149 }
0x26cc   :  { %v2152_v59 = vmul.f32 %v5031_v54, %v2150_v1 }
0x26ce   :  { %2154 = vrot.lane.b32.xlu0 %v2152_v59, %s5408_s4 }
0x2740   :  { %v2155_v60 = vpop.permute.xlu0 %2154 }
0x2741   :  { %4683 = vmatmul.mubr.msk.f32.vlgmr.msra.gmra.mrb[18].mxu1 %vm422_vm4, %v2155_v60 }
0x2742   :  { %4698 = vmatprep.mubr.msk.f32.mxu1 %vm5405_vm0, %v5406_v8  ;;  %4697 = vmatpush3.msra.mxu1 %v6111_v23 }
0x2743   :  { %4706 = vmatprep.subr.mxu1 %v5406_v8 }
0x2745   :  { %4699 = vmatmul.mubr.f32.vlgmr.msra.gmra.mrb[20].mxu1 %v5406_v8 }
0x2746   :  { %4707 = vmatpush3.msra.mxu1 %v6111_v23  ;;  %4708 = vmatprep.mubr.msk.f32.mxu1 %vm5405_vm0, %v5406_v8 }
0x2747   :  { %4716 = vmatprep.subr.mxu1 %v5406_v8 }
0x2814   :  { %v2224_v45 = vpop.f32.mrb[18].mxu1 }
0x2815   :  { %v2229_v61 = vrot.slane %v2224_v45, 4  ;;  %v4684_v0 = vpop.f32.mrb[19].mxu1 }
0x2817   :  { %v2231_v6 = vadd.f32 %v2229_v61, %v1421_v46 }
0x2818   :  { %v2415_v34 = vpop.f32.mrb[20].mxu1 }
0x2819   :  { %5034 = vtanh.f32 %v2231_v6  ;;  %v4314_v25 = vmul.f32 -1.442695, %v2231_v6  ;;  %v4700_v35 = vpop.f32.mrb[21].mxu1 }
0x281b   :  { %5036 = vpow2.f32 %v4314_v25 }
0x2823   :  { %v5035_v9 = vpop.eup %5034 }
0x2824   :  { %2244 = vrot.lane.b32.xlu1 %v5035_v9, %s5407_s25 }
0x2825   :  { %v5037_v10 = vpop.eup %5036 }
0x2826   :  { %v2235_v11 = vadd.f32 1.0, %v5037_v10 }
0x2828   :  { %5038 = vrcp.f32 %v2235_v11 }
0x2832   :  { %v5039_v12 = vpop.eup %5038 }
0x2833   :  { %v2242_v17 = vmul.f32 %v5039_v12, %v2240_v15 }
0x2896   :  { %v2245_v13 = vpop.permute.xlu1 %2244 }
0x2897   :  { %v2247_v14 = vmul.f32 %v5039_v12, %v2245_v13 }
0x2899   :  { %2249 = vrot.lane.b32.xlu0 %v2247_v14, %s5408_s4 }
0x290b   :  { %v2250_v2 = vpop.permute.xlu0 %2249 }
0x290c   :  { %v2252_v18 = vadd.f32 %v2250_v2, %v2242_v17 }
0x290e   :  { %5040 = vtanh.f32 %v2252_v18 }
0x2918   :  { %v5041_v26 = vpop.eup %5040 }
0x2919   :  { %2255 = vrot.lane.b32.xlu1 %v5041_v26, %s5407_s25  ;;  %s6400_s25 = smov 8  }
0x298b   :  { %v2256_v27 = vpop.permute.xlu1 %2255 }
0x298c   :  { %v2258_v32 = vmul.f32 %v5039_v12, %v2256_v27 }
0x298e   :  { %v2271_v33 = vrot.slane %v2258_v32, 4 }
0x2990   :  { %2272 = vrot.lane.b32.xlu0 %v2271_v33, %s5408_s4  ;;  %s5410_s4 = smov 16  }
0x2a02   :  { %v2273_v3 = vpop.permute.xlu0 %2272 }
0x2a03   :  { %4694 = vmatmul.mubr.msk.f32.vlgmr.msra.gmra.mrb[20].mxu0 %vm422_vm4, %v2273_v3 }
0x2a04   :  { %4702 = vmatpush3.msra.mxu0 %v6111_v23  ;;  %4703 = vmatprep.mubr.msk.f32.mxu0 %vm5405_vm0, %v5406_v8 }
0x2a05   :  { %4711 = vmatprep.subr.mxu0 %v5406_v8 }
0x2ad6   :  { %v2342_v16 = vpop.f32.mrb[20].mxu0 }
0x2ad7   :  { %v6129_v4 = vadd.f32 %v4315_v36, %v2342_v16  ;;  %v4695_v37 = vpop.f32.mrb[21].mxu0 }
0x2ad9   :  { %v2419_v38 = vadd.f32 %v2415_v34, %v6129_v4 }
0x2adb   :  { %5042 = vtanh.f32 %v2419_v38  ;;  %v4317_v19 = vmul.f32 -1.442695, %v2419_v38 }
0x2add   :  { %5044 = vpow2.f32 %v4317_v19 }
0x2ae5   :  { %v5043_v39 = vpop.eup %5042 }
0x2ae6   :  { %2429 = vrot.lane.b32.xlu1 %v5043_v39, %s5409_s7 }
0x2ae7   :  { %v5045_v40 = vpop.eup %5044 }
0x2ae8   :  { %v2423_v7 = vadd.f32 1.0, %v5045_v40 }
0x2aea   :  { %5046 = vrcp.f32 %v2423_v7 }
0x2af4   :  { %v5047_v41 = vpop.eup %5046 }
0x2af5   :  { %v2427_v30 = vmul.f32 0.0, %v5047_v41 }
0x2b58   :  { %v2430_v31 = vpop.permute.xlu1 %2429 }
0x2b59   :  { %v2432_v42 = vmul.f32 %v5047_v41, %v2430_v31 }
0x2b5b   :  { %2434 = vrot.lane.b32.xlu0 %v2432_v42, %s6400_s25 }
0x2bcd   :  { %v2435_v43 = vpop.permute.xlu0 %2434 }
0x2bce   :  { %v2437_v44 = vadd.f32 %v2435_v43, %v2427_v30 }
0x2bd0   :  { %5048 = vtanh.f32 %v2437_v44 }
0x2bda   :  { %v5049_v46 = vpop.eup %5048 }
0x2bdb   :  { %2440 = vrot.lane.b32.xlu1 %v5049_v46, %s5410_s4 }
0x2c4d   :  { %v2441_v47 = vpop.permute.xlu1 %2440 }
0x2c4e   :  { %v2443_v48 = vmul.f32 %v5047_v41, %v2441_v47 }
0x2c50   :  { %2445 = vrot.lane.b32.xlu0 %v2443_v48, %s5411_s27 }
0x2cc2   :  { %v2446_v49 = vpop.permute.xlu0 %2445 }
0x2cc3   :  { %2449 = vst.msk [vmem:[#allocation4] sm:$0xf] %vm2448_vm6, %v2446_v49  ;;  %4704 = vmatmul.mubr.msk.f32.vlgmr.msra.gmra.mrb[22].mxu0 %vm320_vm2, %v2446_v49 }
0x2cc4   :  { %4712 = vmatpush3.msra.mxu0 %v6111_v23  ;;  %4713 = vmatprep.mubr.msk.f32.mxu0 %vm5405_vm0, %v5406_v8 }
0x2cc5   :  { %4721 = vmatprep.subr.mxu0 %v5406_v8 }
0x2d96   :  { %v2519_v50 = vpop.f32.mrb[22].mxu0 }
0x2d97   :  { %v2523_v51 = vadd.f32 %v2519_v50, %v6129_v4  ;;  %v4705_v52 = vpop.f32.mrb[23].mxu0 }
0x2d99   :  { %5050 = vtanh.f32 %v2523_v51  ;;  %v4319_v54 = vmul.f32 -1.442695, %v2523_v51 }
0x2d9b   :  { %5052 = vpow2.f32 %v4319_v54 }
0x2da3   :  { %v5051_v53 = vpop.eup %5050 }
0x2da4   :  { %2533 = vrot.lane.b32.xlu1 %v5051_v53, %s5409_s7 }
0x2da5   :  { %v5053_v55 = vpop.eup %5052 }
0x2da6   :  { %v2527_v56 = vadd.f32 1.0, %v5053_v55 }
0x2da8   :  { %5054 = vrcp.f32 %v2527_v56 }
0x2db2   :  { %v5055_v57 = vpop.eup %5054 }
0x2db3   :  { %v2531_v62 = vmul.f32 %v5055_v57, %v2437_v44 }
0x2e16   :  { %v2534_v58 = vpop.permute.xlu1 %2533 }
0x2e17   :  { %v2536_v28 = vmul.f32 %v5055_v57, %v2534_v58 }
0x2e19   :  { %2538 = vrot.lane.b32.xlu0 %v2536_v28, %s6400_s25 }
0x2e8b   :  { %v2539_v29 = vpop.permute.xlu0 %2538 }
0x2e8c   :  { %v2541_v1 = vadd.f32 %v2539_v29, %v2531_v62 }
0x2e8e   :  { %5056 = vtanh.f32 %v2541_v1 }
0x2e98   :  { %v5057_v59 = vpop.eup %5056 }
0x2e99   :  { %2544 = vrot.lane.b32.xlu1 %v5057_v59, %s5410_s4 }
0x2f0b   :  { %v2545_v60 = vpop.permute.xlu1 %2544 }
0x2f0c   :  { %v2547_v45 = vmul.f32 %v5055_v57, %v2545_v60 }
0x2f0e   :  { %2549 = vrot.lane.b32.xlu0 %v2547_v45, %s5411_s27 }
0x2f80   :  { %v2550_v61 = vpop.permute.xlu0 %2549 }
0x2f81   :  { %2552 = vst.msk [vmem:[#allocation4 + $0x4] sm:$0xf] %vm2448_vm6, %v2550_v61  ;;  %4709 = vmatmul.mubr.msk.f32.vlgmr.msra.gmra.mrb[22].mxu1 %vm320_vm2, %v2550_v61 }
0x2f82   :  { %4717 = vmatpush3.msra.mxu1 %v6111_v23  ;;  %4718 = vmatprep.mubr.msk.f32.mxu1 %vm5405_vm0, %v5406_v8 }
0x2f83   :  { %4726 = vmatprep.subr.mxu1 %v5406_v8 }
0x3054   :  { %v2622_v0 = vpop.f32.mrb[22].mxu1 }
0x3055   :  { %v2626_v6 = vadd.f32 %v2622_v0, %v6129_v4  ;;  %v4710_v9 = vpop.f32.mrb[23].mxu1 }
0x3057   :  { %5058 = vtanh.f32 %v2626_v6  ;;  %v4321_v10 = vmul.f32 -1.442695, %v2626_v6 }
0x3059   :  { %5060 = vpow2.f32 %v4321_v10 }
0x3061   :  { %v5059_v25 = vpop.eup %5058 }
0x3062   :  { %2636 = vrot.lane.b32.xlu1 %v5059_v25, %s5409_s7  ;;  %v3175_v25 = vld [vmem:[#allocation15] sm:$0xff] }
0x3063   :  { %v5061_v11 = vpop.eup %5060 }
0x3064   :  { %v2630_v12 = vadd.f32 1.0, %v5061_v11 }
0x3066   :  { %5062 = vrcp.f32 %v2630_v12 }
0x3070   :  { %v5063_v13 = vpop.eup %5062 }
0x3071   :  { %v2634_v17 = vmul.f32 %v5063_v13, %v2541_v1 }
0x30d4   :  { %v2637_v14 = vpop.permute.xlu1 %2636 }
0x30d5   :  { %v2639_v15 = vmul.f32 %v5063_v13, %v2637_v14 }
0x30d7   :  { %2641 = vrot.lane.b32.xlu0 %v2639_v15, %s6400_s25 }
0x3149   :  { %v2642_v2 = vpop.permute.xlu0 %2641 }
0x314a   :  { %v2644_v18 = vadd.f32 %v2642_v2, %v2634_v17 }
0x314c   :  { %5064 = vtanh.f32 %v2644_v18 }
0x3156   :  { %v5065_v20 = vpop.eup %5064 }
0x3157   :  { %2647 = vrot.lane.b32.xlu1 %v5065_v20, %s5410_s4 }
0x31c9   :  { %v2648_v21 = vpop.permute.xlu1 %2647 }
0x31ca   :  { %v2650_v63 = vmul.f32 %v5063_v13, %v2648_v21  ;;  %v3171_v13 = vld [vmem:[#allocation4] sm:$0xff] }
0x31cc   :  { %2652 = vrot.lane.b32.xlu0 %v2650_v63, %s5411_s27 }
0x323e   :  { %v2653_v22 = vpop.permute.xlu0 %2652 }
0x323f   :  { %2655 = vst.msk [vmem:[#allocation4 + $0x8] sm:$0xf] %vm2448_vm6, %v2653_v22  ;;  %4714 = vmatmul.mubr.msk.f32.vlgmr.msra.gmra.mrb[24].mxu0 %vm320_vm2, %v2653_v22 }
0x3240   :  { %4722 = vmatpush3.msra.mxu0 %v6111_v23  ;;  %4723 = vmatprep.mubr.msk.f32.mxu0 %vm5405_vm0, %v5406_v8 }
0x3241   :  { %4731 = vmatprep.subr.mxu0 %v5406_v8 }
0x3312   :  { %v2725_v5 = vpop.f32.mrb[24].mxu0 }
0x3313   :  { %v2729_v24 = vadd.f32 %v2725_v5, %v6129_v4  ;;  %v4715_v26 = vpop.f32.mrb[25].mxu0 }
0x3315   :  { %5066 = vtanh.f32 %v2729_v24  ;;  %v4323_v32 = vmul.f32 -1.442695, %v2729_v24 }
0x3317   :  { %5068 = vpow2.f32 %v4323_v32 }
0x331f   :  { %v5067_v27 = vpop.eup %5066 }
0x3320   :  { %2739 = vrot.lane.b32.xlu1 %v5067_v27, %s5409_s7 }
0x3321   :  { %v5069_v33 = vpop.eup %5068 }
0x3322   :  { %v2733_v3 = vadd.f32 1.0, %v5069_v33 }
0x3324   :  { %5070 = vrcp.f32 %v2733_v3 }
0x332e   :  { %v5071_v34 = vpop.eup %5070 }
0x332f   :  { %v2737_v16 = vmul.f32 %v5071_v34, %v2644_v18 }
0x3392   :  { %v2740_v35 = vpop.permute.xlu1 %2739 }
0x3393   :  { %v2742_v36 = vmul.f32 %v5071_v34, %v2740_v35 }
0x3395   :  { %2744 = vrot.lane.b32.xlu0 %v2742_v36, %s6400_s25  ;;  %v6205_v36 = vld [vmem:[#allocation16] sm:$0xff] }
0x3407   :  { %v2745_v37 = vpop.permute.xlu0 %2744 }
0x3408   :  { %v2747_v38 = vadd.f32 %v2745_v37, %v2737_v16 }
0x340a   :  { %5072 = vtanh.f32 %v2747_v38 }
0x3414   :  { %v5073_v39 = vpop.eup %5072 }
0x3415   :  { %2750 = vrot.lane.b32.xlu1 %v5073_v39, %s5410_s4  ;;  %v6221_v39 = vld [vmem:[#allocation18] ss:$0 sm:$0xff] }
0x3487   :  { %v2751_v19 = vpop.permute.xlu1 %2750 }
0x3488   :  { %v2753_v40 = vmul.f32 %v5071_v34, %v2751_v19 }
0x348a   :  { %2755 = vrot.lane.b32.xlu0 %v2753_v40, %s5411_s27 }
0x34fc   :  { %v2756_v7 = vpop.permute.xlu0 %2755 }
0x34fd   :  { %2758 = vst.msk [vmem:[#allocation4 + $0xc] sm:$0xf] %vm2448_vm6, %v2756_v7  ;;  %4719 = vmatmul.mubr.msk.f32.vlgmr.msra.gmra.mrb[24].mxu1 %vm320_vm2, %v2756_v7 }
0x34fe   :  { %4727 = vmatpush3.msra.mxu1 %v6111_v23  ;;  %4728 = vmatprep.mubr.msk.f32.mxu1 %vm5405_vm0, %v5406_v8 }
0x34ff   :  { %4736 = vmatprep.subr.mxu1 %v3175_v25 }
0x3504   :  { %v3172_v14 = vld [vmem:[#allocation4 + $0x8] sm:$0xff] }
0x35d0   :  { %v2828_v41 = vpop.f32.mrb[24].mxu1 }
0x35d1   :  { %v2832_v31 = vadd.f32 %v2828_v41, %v6129_v4  ;;  %v4720_v42 = vpop.f32.mrb[25].mxu1 }
0x35d3   :  { %5074 = vtanh.f32 %v2832_v31  ;;  %v4325_v43 = vmul.f32 -1.442695, %v2832_v31 }
0x35d5   :  { %5076 = vpow2.f32 %v4325_v43 }
0x35dd   :  { %v5075_v30 = vpop.eup %5074 }
0x35de   :  { %2842 = vrot.lane.b32.xlu1 %v5075_v30, %s5409_s7 }
0x35df   :  { %v5077_v44 = vpop.eup %5076 }
0x35e0   :  { %v2836_v46 = vadd.f32 1.0, %v5077_v44 }
0x35e2   :  { %5078 = vrcp.f32 %v2836_v46 }
0x35ec   :  { %v5079_v47 = vpop.eup %5078 }
0x35ed   :  { %v2840_v50 = vmul.f32 %v5079_v47, %v2747_v38 }
0x3650   :  { %v2843_v48 = vpop.permute.xlu1 %2842 }
0x3651   :  { %v2845_v49 = vmul.f32 %v5079_v47, %v2843_v48 }
0x3653   :  { %2847 = vrot.lane.b32.xlu0 %v2845_v49, %s6400_s25 }
0x36c5   :  { %v2848_v51 = vpop.permute.xlu0 %2847 }
0x36c6   :  { %v2850_v52 = vadd.f32 %v2848_v51, %v2840_v50 }
0x36c8   :  { %5080 = vtanh.f32 %v2850_v52 }
0x36d2   :  { %v5081_v53 = vpop.eup %5080 }
0x36d3   :  { %2853 = vrot.lane.b32.xlu1 %v5081_v53, %s5410_s4 }
0x3745   :  { %v2854_v54 = vpop.permute.xlu1 %2853 }
0x3746   :  { %v2856_v55 = vmul.f32 %v5079_v47, %v2854_v54 }
0x3748   :  { %2858 = vrot.lane.b32.xlu0 %v2856_v55, %s5411_s27 }
0x37ba   :  { %v2859_v56 = vpop.permute.xlu0 %2858 }
0x37bb   :  { %2861 = vst.msk [vmem:[#allocation4 + $0x10] sm:$0xf] %vm2448_vm6, %v2859_v56  ;;  %4724 = vmatmul.mubr.msk.f32.vlgmr.msra.gmra.mrb[26].mxu0 %vm320_vm2, %v2859_v56 }
0x37bc   :  { %4732 = vmatpush3.msra.mxu0 %v6111_v23  ;;  %4733 = vmatprep.mubr.msk.f32.mxu0 %vm5405_vm0, %v5406_v8 }
0x37bd   :  { %4744 = vmatprep.subr.mxu0 %v5406_v8 }
0x388e   :  { %v2931_v57 = vpop.f32.mrb[26].mxu0 }
0x388f   :  { %v2935_v58 = vadd.f32 %v2931_v57, %v6129_v4  ;;  %v4725_v28 = vpop.f32.mrb[27].mxu0 }
0x3891   :  { %5082 = vtanh.f32 %v2935_v58  ;;  %v4327_v29 = vmul.f32 -1.442695, %v2935_v58 }
0x3893   :  { %5084 = vpow2.f32 %v4327_v29 }
0x389b   :  { %v5083_v62 = vpop.eup %5082 }
0x389c   :  { %2945 = vrot.lane.b32.xlu1 %v5083_v62, %s5409_s7 }
0x389d   :  { %v5085_v1 = vpop.eup %5084 }
0x389e   :  { %v2939_v59 = vadd.f32 1.0, %v5085_v1 }
0x38a0   :  { %5086 = vrcp.f32 %v2939_v59 }
0x38aa   :  { %v5087_v60 = vpop.eup %5086 }
0x38ab   :  { %v2943_v61 = vmul.f32 %v5087_v60, %v2850_v52 }
0x390e   :  { %v2946_v23 = vpop.permute.xlu1 %2945 }
0x390f   :  { %v2948_v45 = vmul.f32 %v5087_v60, %v2946_v23 }
0x3911   :  { %2950 = vrot.lane.b32.xlu0 %v2948_v45, %s6400_s25 }
0x3983   :  { %v2951_v0 = vpop.permute.xlu0 %2950 }
0x3984   :  { %v2953_v6 = vadd.f32 %v2951_v0, %v2943_v61 }
0x3986   :  { %5088 = vtanh.f32 %v2953_v6 }
0x3990   :  { %v5089_v9 = vpop.eup %5088 }
0x3991   :  { %2956 = vrot.lane.b32.xlu1 %v5089_v9, %s5410_s4 }
0x3a03   :  { %v2957_v10 = vpop.permute.xlu1 %2956 }
0x3a04   :  { %v2959_v11 = vmul.f32 %v5087_v60, %v2957_v10 }
0x3a06   :  { %2961 = vrot.lane.b32.xlu0 %v2959_v11, %s5411_s27 }
0x3a78   :  { %v2962_v12 = vpop.permute.xlu0 %2961 }
0x3a79   :  { %2964 = vst.msk [vmem:[#allocation4 + $0x14] sm:$0xf] %vm2448_vm6, %v2962_v12  ;;  %4729 = vmatmul.mubr.msk.f32.vlgmr.msra.gmra.mrb[26].mxu1 %vm320_vm2, %v2962_v12 }
0x3a7a   :  { %4738 = vmatprep.mubr.msk.f32.mxu1 %vm320_vm2, %v3171_v13  ;;  %4737 = vmatpush3.msra.mxu1 %v3175_v25 }
0x3a7b   :  { %4754 = vmatprep.subr.mxu1 %v5406_v8 }
0x3a7d   :  { %4739 = vmatmul.mubr.msk.f32.vlgmr.msra.gmra.mrb[28].mxu1 %vm320_vm2, %v3172_v14 }
0x3a7e   :  { %4755 = vmatpush3.msra.mxu1 %v6205_v36 }
0x3a7f   :  { %4764 = vmatprep.subr.mxu1 %v5406_v8 }
0x3a80   :  { %v3173_v15 = vld [vmem:[#allocation4 + $0x10] sm:$0xff] }
0x3a81   :  { %4741 = vmatprep.mubr.msk.f32.mxu1 %vm320_vm2, %v3173_v15 }
0x3b4c   :  { %v3034_v17 = vpop.f32.mrb[26].mxu1 }
0x3b4d   :  { %v3038_v2 = vadd.f32 %v3034_v17, %v6129_v4  ;;  %v4730_v18 = vpop.f32.mrb[27].mxu1 }
0x3b4f   :  { %5090 = vtanh.f32 %v3038_v2  ;;  %v4329_v22 = vmul.f32 -1.442695, %v3038_v2 }
0x3b50   :  { %v6197_v20 = vpop.f32.mrb[28].mxu1 }
0x3b51   :  { %v3261_v21 = vpop.f32.mrb[29].mxu1  ;;  %5092 = vpow2.f32 %v4329_v22 }
0x3b52   :  { %v3262_v7 = vadd.f32 %v6221_v39, %v3261_v21 }
0x3b59   :  { %v5091_v63 = vpop.eup %5090 }
0x3b5a   :  { %3048 = vrot.lane.b32.xlu1 %v5091_v63, %s5409_s7 }
0x3b5b   :  { %v5093_v5 = vpop.eup %5092 }
0x3b5c   :  { %v3042_v24 = vadd.f32 1.0, %v5093_v5 }
0x3b5e   :  { %5094 = vrcp.f32 %v3042_v24 }
0x3b68   :  { %v5095_v26 = vpop.eup %5094 }
0x3b69   :  { %v3046_v33 = vmul.f32 %v5095_v26, %v2953_v6 }
0x3bcc   :  { %v3049_v27 = vpop.permute.xlu1 %3048 }
0x3bcd   :  { %v3051_v32 = vmul.f32 %v5095_v26, %v3049_v27 }
0x3bcf   :  { %3053 = vrot.lane.b32.xlu0 %v3051_v32, %s6400_s25 }
0x3c41   :  { %v3054_v3 = vpop.permute.xlu0 %3053 }
0x3c42   :  { %v6201_v34 = vadd.f32 %v3054_v3, %v3046_v33 }
0x3c44   :  { %5096 = vtanh.f32 %v6201_v34 }
0x3c4e   :  { %v5097_v35 = vpop.eup %5096 }
0x3c4f   :  { %3059 = vrot.lane.b32.xlu1 %v5097_v35, %s5410_s4 }
0x3cc1   :  { %v3060_v16 = vpop.permute.xlu1 %3059 }
0x3cc2   :  { %v3062_v37 = vmul.f32 %v5095_v26, %v3060_v16 }
0x3cc4   :  { %3064 = vrot.lane.b32.xlu0 %v3062_v37, %s5411_s27  ;;  %v3267_v37 = vadd.f32 %v6197_v20, %v6221_v39 }
0x3d36   :  { %v3065_v38 = vpop.permute.xlu0 %3064 }
0x3d37   :  { %3067 = vst.msk [vmem:[#allocation4 + $0x18] sm:$0xf] %vm2448_vm6, %v3065_v38  ;;  %4734 = vmatmul.mubr.msk.f32.vlgmr.msra.gmra.mrb[28].mxu0 %vm320_vm2, %v3065_v38 }
0x3d38   :  { %4745 = vmatpush3.msra.mxu0 %v6205_v36  ;;  %4746 = vmatprep.mubr.msk.f32.mxu0 %vm5405_vm0, %v5406_v8 }
0x3d39   :  { %4749 = vmatprep.subr.mxu0 %v5406_v8 }
0x3d3b   :  { %4747 = vmatmul.mubr.f32.vlgmr.msra.gmra.mrb[30].mxu0 %v5406_v8 }
0x3d3c   :  { %4750 = vmatpush3.msra.mxu0 %v6205_v36  ;;  %4751 = vmatprep.mubr.msk.f32.mxu0 %vm5405_vm0, %v5406_v8 }
0x3d3d   :  { %4759 = vmatprep.subr.mxu0 %v5406_v8 }
0x3e0a   :  { %v3137_v19 = vpop.f32.mrb[28].mxu0 }
0x3e0b   :  { %v4735_v40 = vpop.f32.mrb[29].mxu0  ;;  %v3141_v53 = vadd.f32 %v3137_v19, %v6129_v4 }
0x3e0d   :  { %v4331_v56 = vmul.f32 -1.442695, %v3141_v53 }
0x3e0e   :  { %v3347_v41 = vpop.f32.mrb[30].mxu0 }
0x3e0f   :  { %v3351_v31 = vadd.f32 %v3347_v41, %v3262_v7  ;;  %v4748_v42 = vpop.f32.mrb[31].mxu0 }
0x3e11   :  { %5098 = vtanh.f32 %v3351_v31  ;;  %v4337_v43 = vmul.f32 -1.442695, %v3351_v31 }
0x3e13   :  { %5100 = vpow2.f32 %v4337_v43 }
0x3e1b   :  { %v5099_v30 = vpop.eup %5098 }
0x3e1c   :  { %3361 = vrot.lane.b32.xlu1 %v5099_v30, %s5409_s7 }
0x3e1d   :  { %v5101_v44 = vpop.eup %5100 }
0x3e1e   :  { %v3355_v46 = vadd.f32 1.0, %v5101_v44 }
0x3e20   :  { %5102 = vrcp.f32 %v3355_v46 }
0x3e2a   :  { %v5103_v47 = vpop.eup %5102 }
0x3e2b   :  { %v3359_v50 = vmul.f32 0.0, %v5103_v47 }
0x3e8e   :  { %v3362_v48 = vpop.permute.xlu1 %3361 }
0x3e8f   :  { %v3364_v49 = vmul.f32 %v5103_v47, %v3362_v48 }
0x3e91   :  { %3366 = vrot.lane.b32.xlu0 %v3364_v49, %s6400_s25 }
0x3f03   :  { %v3367_v51 = vpop.permute.xlu0 %3366 }
0x3f04   :  { %v6226_v52 = vadd.f32 %v3367_v51, %v3359_v50 }
0x3f06   :  { %5104 = vtanh.f32 %v6226_v52  ;;  %v3472_v22 = vrot.slane %v6226_v52, 4 }
0x3f07   :  { %5106 = vtanh.f32 %v3141_v53 }
0x3f08   :  { %5108 = vpow2.f32 %v4331_v56 }
0x3f10   :  { %v5105_v54 = vpop.eup %5104 }
0x3f11   :  { %3372 = vrot.lane.b32.xlu1 %v5105_v54, %s5410_s4  ;;  %v5107_v55 = vpop.eup %5106 }
0x3f12   :  { %v5109_v57 = vpop.eup %5108 }
0x3f13   :  { %v3145_v58 = vadd.f32 1.0, %v5109_v57 }
0x3f15   :  { %3151 = vrot.lane.b32.xlu1 %v5107_v55, %s5409_s7  ;;  %5110 = vrcp.f32 %v3145_v58 }
0x3f1f   :  { %v5111_v29 = vpop.eup %5110 }
0x3f20   :  { %v3149_v60 = vmul.f32 %v5111_v29, %v6201_v34 }
0x3f83   :  { %v3373_v28 = vpop.permute.xlu1 %3372 }
0x3f84   :  { %v3375_v62 = vmul.f32 %v5103_v47, %v3373_v28 }
0x3f86   :  { %3377 = vrot.lane.b32.xlu0 %v3375_v62, %s5411_s27 }
0x3f87   :  { %v3152_v4 = vpop.permute.xlu1 %3151 }
0x3f88   :  { %v3154_v1 = vmul.f32 %v5111_v29, %v3152_v4 }
0x3f8a   :  { %3156 = vrot.lane.b32.xlu1 %v3154_v1, %s6400_s25 }
0x3ff8   :  { %v3378_v59 = vpop.permute.xlu0 %3377 }
0x3ff9   :  { %3380 = vst.msk [vmem:[#allocation19] sm:$0x1] %vm150_vm1, %v3378_v59  ;;  %4752 = vmatmul.mubr.msk.f32.vlgmr.msra.gmra.mrb[32].mxu0 %vm320_vm2, %v3378_v59 }
0x3ffa   :  { %3382 = vst.msk [vmem:[#allocation19 + $0x7] sm:$0x2] %vm3381_vm7, %v3378_v59  ;;  %4760 = vmatpush3.msra.mxu0 %v6205_v36  ;;  %4761 = vmatprep.mubr.msk.f32.mxu0 %vm5405_vm0, %v5406_v8 }
0x3ffb   :  { %3384 = vst.msk [vmem:[#allocation19 + $0xe] sm:$0x4] %vm3383_vm8, %v3378_v59  ;;  %4769 = vmatprep.subr.mxu0 %v5406_v8 }
0x3ffc   :  { %3386 = vst.msk [vmem:[#allocation19 + $0x15] sm:$0x8] %vm3385_vm9, %v3378_v59  ;;  %v3157_v23 = vpop.permute.xlu1 %3156 }
0x3ffd   :  { %v3159_v45 = vadd.f32 %v3157_v23, %v3149_v60 }
0x3fff   :  { %5112 = vtanh.f32 %v3159_v45 }
0x4009   :  { %v5113_v61 = vpop.eup %5112 }
0x400a   :  { %3162 = vrot.lane.b32.xlu1 %v5113_v61, %s5410_s4 }
0x407c   :  { %v3163_v0 = vpop.permute.xlu1 %3162 }
0x407d   :  { %v3165_v6 = vmul.f32 %v5111_v29, %v3163_v0 }
0x407f   :  { %3167 = vrot.lane.b32.xlu1 %v3165_v6, %s5411_s27 }
0x40cc   :  { %v3456_v9 = vpop.f32.mrb[32].mxu0 }
0x40cd   :  { %v3461_v25 = vrot.slane %v3456_v9, 4  ;;  %v4753_v10 = vpop.f32.mrb[33].mxu0 }
0x40cf   :  { %v3463_v11 = vadd.f32 %v3461_v25, %v3262_v7 }
0x40d1   :  { %5114 = vtanh.f32 %v3463_v11  ;;  %v4339_v15 = vmul.f32 -1.442695, %v3463_v11 }
0x40d3   :  { %5116 = vpow2.f32 %v4339_v15 }
0x40db   :  { %v5115_v12 = vpop.eup %5114 }
0x40dc   :  { %3476 = vrot.lane.b32.xlu0 %v5115_v12, %s5409_s7 }
0x40dd   :  { %v5117_v17 = vpop.eup %5116 }
0x40de   :  { %v3467_v2 = vadd.f32 1.0, %v5117_v17 }
0x40e0   :  { %5118 = vrcp.f32 %v3467_v2 }
0x40ea   :  { %v5119_v18 = vpop.eup %5118 }
0x40eb   :  { %v3474_v5 = vmul.f32 %v5119_v18, %v3472_v22 }
0x40f1   :  { %v3168_v13 = vpop.permute.xlu1 %3167 }
0x40f2   :  { %3170 = vst.msk [vmem:[#allocation4 + $0x1c] sm:$0xf] %vm2448_vm6, %v3168_v13 }
0x40f9   :  { %v3174_v14 = vld [vmem:[#allocation4 + $0x18] sm:$0xff] }
0x40fa   :  { %4742 = vmatmul.mubr.msk.f32.gmra.mrb[30].mxu1 %vm320_vm2, %v3174_v14 }
0x40fb   :  { %4756 = vmatprep.mubr.msk.f32.mxu1 %vm5405_vm0, %v5406_v8 }
0x414e   :  { %v3477_v21 = vpop.permute.xlu0 %3476 }
0x414f   :  { %v3479_v63 = vmul.f32 %v5119_v18, %v3477_v21 }
0x4151   :  { %3481 = vrot.lane.b32.xlu0 %v3479_v63, %s6400_s25 }
0x41c3   :  { %v3482_v24 = vpop.permute.xlu0 %3481 }
0x41c4   :  { %v3484_v26 = vadd.f32 %v3482_v24, %v3474_v5 }
0x41c6   :  { %5120 = vtanh.f32 %v3484_v26  ;;  %v3588_v46 = vrot.slane %v3484_v26, 4 }
0x41cd   :  { %v6253_v27 = vpop.f32.mrb[30].mxu1 }
0x41ce   :  { %v6255_v32 = vpop.f32.mrb[31].mxu1 }
0x41cf   :  { %v3272_v10 = vadd.f32 %v6221_v39, %v6255_v32 }
0x41d0   :  { %v5121_v33 = vpop.eup %5120 }
0x41d1   :  { %3487 = vrot.lane.b32.xlu0 %v5121_v33, %s5410_s4 }
0x4243   :  { %v3488_v3 = vpop.permute.xlu0 %3487 }
0x4244   :  { %v6258_v34 = vmul.f32 %v5119_v18, %v3488_v3 }
0x4246   :  { %v3504_v35 = vrot.slane %v6258_v34, 4 }
0x4248   :  { %3505 = vrot.lane.b32.xlu0 %v3504_v35, %s5411_s27 }
0x42ba   :  { %v3506_v16 = vpop.permute.xlu0 %3505 }
0x42bb   :  { %4757 = vmatmul.mubr.msk.f32.vlgmr.msra.gmra.mrb[32].mxu1 %vm320_vm2, %v3506_v16 }
0x42bc   :  { %4765 = vmatpush3.msra.mxu1 %v6205_v36  ;;  %4766 = vmatprep.mubr.msk.f32.mxu1 %vm5405_vm0, %v5406_v8 }
0x42bd   :  { %4774 = vmatprep.subr.mxu1 %v5406_v8 }
0x438e   :  { %v3575_v38 = vpop.f32.mrb[32].mxu1 }
0x438f   :  { %v3579_v19 = vadd.f32 %v3575_v38, %v3267_v37  ;;  %v4758_v40 = vpop.f32.mrb[33].mxu1 }
0x4391   :  { %5122 = vtanh.f32 %v3579_v19  ;;  %v4341_v41 = vmul.f32 -1.442695, %v3579_v19 }
0x4393   :  { %5124 = vpow2.f32 %v4341_v41 }
0x439b   :  { %v5123_v7 = vpop.eup %5122 }
0x439c   :  { %3592 = vrot.lane.b32.xlu1 %v5123_v7, %s5409_s7 }
0x439d   :  { %v5125_v31 = vpop.eup %5124 }
0x439e   :  { %v3583_v42 = vadd.f32 1.0, %v5125_v31 }
0x43a0   :  { %5126 = vrcp.f32 %v3583_v42 }
0x43aa   :  { %v5127_v30 = vpop.eup %5126 }
0x43ab   :  { %v3590_v47 = vmul.f32 %v5127_v30, %v3588_v46 }
0x440e   :  { %v3593_v43 = vpop.permute.xlu1 %3592 }
0x440f   :  { %v3595_v44 = vmul.f32 %v5127_v30, %v3593_v43 }
0x4411   :  { %3597 = vrot.lane.b32.xlu0 %v3595_v44, %s6400_s25 }
0x4483   :  { %v3598_v20 = vpop.permute.xlu0 %3597 }
0x4484   :  { %v3600_v48 = vadd.f32 %v3598_v20, %v3590_v47 }
0x4486   :  { %5128 = vtanh.f32 %v3600_v48  ;;  %v3700_v59 = vrot.slane %v3600_v48, 4 }
0x4490   :  { %v5129_v49 = vpop.eup %5128 }
0x4491   :  { %3603 = vrot.lane.b32.xlu1 %v5129_v49, %s5410_s4 }
0x4503   :  { %v3604_v50 = vpop.permute.xlu1 %3603 }
0x4504   :  { %v3606_v51 = vmul.f32 %v5127_v30, %v3604_v50 }
0x4506   :  { %3608 = vrot.lane.b32.xlu0 %v3606_v51, %s5411_s27  ;;  %v3277_v51 = vadd.f32 %v6253_v27, %v6221_v39 }
0x4578   :  { %v3609_v52 = vpop.permute.xlu0 %3608 }
0x4579   :  { %3611 = vst.msk [vmem:[#allocation19 + $0x2] sm:$0x1] %vm150_vm1, %v3609_v52  ;;  %4762 = vmatmul.mubr.msk.f32.vlgmr.msra.gmra.mrb[34].mxu0 %vm320_vm2, %v3609_v52 }
0x457a   :  { %3612 = vst.msk [vmem:[#allocation19 + $0x9] sm:$0x2] %vm3381_vm7, %v3609_v52  ;;  %4770 = vmatpush3.msra.mxu0 %v6205_v36  ;;  %4771 = vmatprep.mubr.msk.f32.mxu0 %vm5405_vm0, %v5406_v8 }
0x457b   :  { %3613 = vst.msk [vmem:[#allocation19 + $0x10] sm:$0x4] %vm3383_vm8, %v3609_v52  ;;  %4779 = vmatprep.subr.mxu0 %v5406_v8 }
0x457c   :  { %3614 = vst.msk [vmem:[#allocation19 + $0x17] sm:$0x8] %vm3385_vm9, %v3609_v52 }
0x464c   :  { %v3684_v53 = vpop.f32.mrb[34].mxu0 }
0x464d   :  { %v3689_v54 = vrot.slane %v3684_v53, 4  ;;  %v4763_v55 = vpop.f32.mrb[35].mxu0 }
0x464f   :  { %v3691_v56 = vadd.f32 %v3689_v54, %v3267_v37 }
0x4651   :  { %5130 = vtanh.f32 %v3691_v56  ;;  %v4343_v58 = vmul.f32 -1.442695, %v3691_v56 }
0x4653   :  { %5132 = vpow2.f32 %v4343_v58 }
0x465b   :  { %v5131_v57 = vpop.eup %5130 }
0x465c   :  { %3704 = vrot.lane.b32.xlu1 %v5131_v57, %s5409_s7 }
0x465d   :  { %v5133_v28 = vpop.eup %5132 }
0x465e   :  { %v3695_v62 = vadd.f32 1.0, %v5133_v28 }
0x4660   :  { %5134 = vrcp.f32 %v3695_v62 }
0x466a   :  { %v5135_v29 = vpop.eup %5134 }
0x466b   :  { %v3702_v60 = vmul.f32 %v5135_v29, %v3700_v59 }
0x46ce   :  { %v3705_v4 = vpop.permute.xlu1 %3704 }
0x46cf   :  { %v3707_v1 = vmul.f32 %v5135_v29, %v3705_v4 }
0x46d1   :  { %3709 = vrot.lane.b32.xlu0 %v3707_v1, %s6400_s25 }
0x4743   :  { %v3710_v23 = vpop.permute.xlu0 %3709 }
0x4744   :  { %v3712_v45 = vadd.f32 %v3710_v23, %v3702_v60 }
0x4746   :  { %5136 = vtanh.f32 %v3712_v45  ;;  %v3812_v22 = vrot.slane %v3712_v45, 4 }
0x4750   :  { %v5137_v61 = vpop.eup %5136 }
0x4751   :  { %3715 = vrot.lane.b32.xlu1 %v5137_v61, %s5410_s4 }
0x47c3   :  { %v3716_v0 = vpop.permute.xlu1 %3715 }
0x47c4   :  { %v6285_v6 = vmul.f32 %v5135_v29, %v3716_v0 }
0x47c6   :  { %v3728_v9 = vrot.slane %v6285_v6, 4 }
0x47c8   :  { %3729 = vrot.lane.b32.xlu0 %v3728_v9, %s5411_s27 }
0x483a   :  { %v3730_v25 = vpop.permute.xlu0 %3729 }
0x483b   :  { %4767 = vmatmul.mubr.msk.f32.vlgmr.msra.gmra.mrb[34].mxu1 %vm320_vm2, %v3730_v25 }
0x483c   :  { %4775 = vmatpush3.msra.mxu1 %v6205_v36  ;;  %4776 = vmatprep.mubr.msk.f32.mxu1 %vm5405_vm0, %v5406_v8 }
0x490e   :  { %v3799_v11 = vpop.f32.mrb[34].mxu1 }
0x490f   :  { %v3803_v12 = vadd.f32 %v3799_v11, %v3272_v10  ;;  %v4768_v13 = vpop.f32.mrb[35].mxu1 }
0x4911   :  { %5138 = vtanh.f32 %v3803_v12  ;;  %v4345_v15 = vmul.f32 -1.442695, %v3803_v12 }
0x4913   :  { %5140 = vpow2.f32 %v4345_v15 }
0x491b   :  { %v5139_v14 = vpop.eup %5138 }
0x491c   :  { %3816 = vrot.lane.b32.xlu1 %v5139_v14, %s5409_s7 }
0x491d   :  { %v5141_v17 = vpop.eup %5140 }
0x491e   :  { %v3807_v2 = vadd.f32 1.0, %v5141_v17 }
0x4920   :  { %5142 = vrcp.f32 %v3807_v2 }
0x492a   :  { %v5143_v18 = vpop.eup %5142 }
0x492b   :  { %v3814_v5 = vmul.f32 %v5143_v18, %v3812_v22 }
0x498e   :  { %v3817_v21 = vpop.permute.xlu1 %3816 }
0x498f   :  { %v3819_v63 = vmul.f32 %v5143_v18, %v3817_v21 }
0x4991   :  { %3821 = vrot.lane.b32.xlu0 %v3819_v63, %s6400_s25 }
0x4a03   :  { %v3822_v24 = vpop.permute.xlu0 %3821 }
0x4a04   :  { %v3824_v26 = vadd.f32 %v3822_v24, %v3814_v5 }
0x4a06   :  { %5144 = vtanh.f32 %v3824_v26 }
0x4a10   :  { %v5145_v32 = vpop.eup %5144 }
0x4a11   :  { %3827 = vrot.lane.b32.xlu1 %v5145_v32, %s5410_s4 }
0x4a83   :  { %v3828_v33 = vpop.permute.xlu1 %3827 }
0x4a84   :  { %v3830_v3 = vmul.f32 %v5143_v18, %v3828_v33 }
0x4a86   :  { %3832 = vrot.lane.b32.xlu0 %v3830_v3, %s5411_s27 }
0x4af8   :  { %v3833_v35 = vpop.permute.xlu0 %3832 }
0x4af9   :  { %3835 = vst.msk [vmem:[#allocation19 + $0x4] sm:$0x1] %vm150_vm1, %v3833_v35  ;;  %4772 = vmatmul.mubr.msk.f32.vlgmr.msra.gmra.mrb[36].mxu0 %vm320_vm2, %v3833_v35 }
0x4afa   :  { %3836 = vst.msk [vmem:[#allocation19 + $0xb] sm:$0x2] %vm3381_vm7, %v3833_v35  ;;  %4780 = vmatpush3.msra.mxu0 %v6205_v36  ;;  %4781 = vmatprep.mubr.msk.f32.mxu0 %vm5405_vm0, %v5406_v8  ;;  %v3924_v36 = vrot.slane %v3824_v26, 4 }
0x4afb   :  { %3837 = vst.msk [vmem:[#allocation19 + $0x12] sm:$0x4] %vm3383_vm8, %v3833_v35 }
0x4afc   :  { %3838 = vst.msk [vmem:[#allocation19 + $0x19] sm:$0x8] %vm3385_vm9, %v3833_v35 }
0x4bcc   :  { %v3908_v16 = vpop.f32.mrb[36].mxu0 }
0x4bcd   :  { %v3913_v37 = vrot.slane %v3908_v16, 4  ;;  %v4773_v38 = vpop.f32.mrb[37].mxu0 }
0x4bcf   :  { %v3915_v19 = vadd.f32 %v3913_v37, %v3272_v10 }
0x4bd1   :  { %5146 = vtanh.f32 %v3915_v19  ;;  %v4347_v7 = vmul.f32 -1.442695, %v3915_v19 }
0x4bd3   :  { %5148 = vpow2.f32 %v4347_v7 }
0x4bdb   :  { %v5147_v40 = vpop.eup %5146 }
0x4bdc   :  { %3928 = vrot.lane.b32.xlu1 %v5147_v40, %s5409_s7 }
0x4bdd   :  { %v5149_v41 = vpop.eup %5148 }
0x4bde   :  { %v3919_v31 = vadd.f32 1.0, %v5149_v41 }
0x4be0   :  { %5150 = vrcp.f32 %v3919_v31 }
0x4bea   :  { %v5151_v42 = vpop.eup %5150 }
0x4beb   :  { %v3926_v8 = vmul.f32 %v5151_v42, %v3924_v36 }
0x4c4e   :  { %v3929_v30 = vpop.permute.xlu1 %3928 }
0x4c4f   :  { %v3931_v43 = vmul.f32 %v5151_v42, %v3929_v30 }
0x4c51   :  { %3933 = vrot.lane.b32.xlu0 %v3931_v43, %s6400_s25 }
0x4cc3   :  { %v3934_v44 = vpop.permute.xlu0 %3933 }
0x4cc4   :  { %v3936_v46 = vadd.f32 %v3934_v44, %v3926_v8 }
0x4cc6   :  { %5152 = vtanh.f32 %v3936_v46  ;;  %v4036_v4 = vrot.slane %v3936_v46, 4 }
0x4cd0   :  { %v5153_v47 = vpop.eup %5152 }
0x4cd1   :  { %3939 = vrot.lane.b32.xlu1 %v5153_v47, %s5410_s4 }
0x4d43   :  { %v3940_v20 = vpop.permute.xlu1 %3939 }
0x4d44   :  { %v3942_v48 = vmul.f32 %v5151_v42, %v3940_v20 }
0x4d46   :  { %v3952_v49 = vrot.slane %v3942_v48, 4 }
0x4d48   :  { %3953 = vrot.lane.b32.xlu0 %v3952_v49, %s5411_s27 }
0x4dba   :  { %v3954_v50 = vpop.permute.xlu0 %3953 }
0x4dbb   :  { %4777 = vmatmul.mubr.msk.f32.vlgmr.msra.gmra.mrb[36].mxu1 %vm320_vm2, %v3954_v50 }
0x4e8e   :  { %v4023_v52 = vpop.f32.mrb[36].mxu1 }
0x4e8f   :  { %v4027_v53 = vadd.f32 %v4023_v52, %v3277_v51  ;;  %v4778_v54 = vpop.f32.mrb[37].mxu1 }
0x4e91   :  { %5154 = vtanh.f32 %v4027_v53  ;;  %v4349_v56 = vmul.f32 -1.442695, %v4027_v53 }
0x4e93   :  { %5156 = vpow2.f32 %v4349_v56 }
0x4e9b   :  { %v5155_v55 = vpop.eup %5154 }
0x4e9c   :  { %4040 = vrot.lane.b32.xlu1 %v5155_v55, %s5409_s7 }
0x4e9d   :  { %v5157_v57 = vpop.eup %5156 }
0x4e9e   :  { %v4031_v58 = vadd.f32 1.0, %v5157_v57 }
0x4ea0   :  { %5158 = vrcp.f32 %v4031_v58 }
0x4eaa   :  { %v5159_v28 = vpop.eup %5158 }
0x4eab   :  { %v4038_v1 = vmul.f32 %v5159_v28, %v4036_v4 }
0x4f0e   :  { %v4041_v62 = vpop.permute.xlu1 %4040 }
0x4f0f   :  { %v4043_v29 = vmul.f32 %v5159_v28, %v4041_v62 }
0x4f11   :  { %4045 = vrot.lane.b32.xlu0 %v4043_v29, %s6400_s25 }
0x4f83   :  { %v4046_v39 = vpop.permute.xlu0 %4045 }
0x4f84   :  { %v4048_v27 = vadd.f32 %v4046_v39, %v4038_v1 }
0x4f86   :  { %5160 = vtanh.f32 %v4048_v27  ;;  %v4148_v2 = vrot.slane %v4048_v27, 4 }
0x4f90   :  { %v5161_v59 = vpop.eup %5160 }
0x4f91   :  { %4051 = vrot.lane.b32.xlu1 %v5161_v59, %s5410_s4 }
0x5003   :  { %v4052_v60 = vpop.permute.xlu1 %4051 }
0x5004   :  { %v4054_v23 = vmul.f32 %v5159_v28, %v4052_v60 }
0x5006   :  { %4056 = vrot.lane.b32.xlu0 %v4054_v23, %s5411_s27 }
0x5078   :  { %v4057_v45 = vpop.permute.xlu0 %4056 }
0x5079   :  { %4059 = vst.msk [vmem:[#allocation19 + $0x6] sm:$0x1] %vm150_vm1, %v4057_v45  ;;  %4782 = vmatmul.mubr.msk.f32.vlgmr.msra.gmra.mrb[38].mxu0 %vm320_vm2, %v4057_v45 }
0x507a   :  { %4060 = vst.msk [vmem:[#allocation19 + $0xd] sm:$0x2] %vm3381_vm7, %v4057_v45 }
0x507b   :  { %4061 = vst.msk [vmem:[#allocation19 + $0x14] sm:$0x4] %vm3383_vm8, %v4057_v45 }
0x507c   :  { %4062 = vst.msk [vmem:[#allocation19 + $0x1b] sm:$0x8] %vm3385_vm9, %v4057_v45 }
0x514c   :  { %v4132_v61 = vpop.f32.mrb[38].mxu0 }
0x514d   :  { %v4137_v0 = vrot.slane %v4132_v61, 4  ;;  %v4783_v9 = vpop.f32.mrb[39].mxu0 }
0x514f   :  { %v4139_v25 = vadd.f32 %v4137_v0, %v3277_v51 }
0x5151   :  { %5162 = vtanh.f32 %v4139_v25  ;;  %v4351_v11 = vmul.f32 -1.442695, %v4139_v25 }
0x5153   :  { %5164 = vpow2.f32 %v4351_v11 }
0x515b   :  { %v5163_v10 = vpop.eup %5162 }
0x515c   :  { %4152 = vrot.lane.b32.xlu1 %v5163_v10, %s5409_s7 }
0x515d   :  { %v5165_v12 = vpop.eup %5164 }
0x515e   :  { %v4143_v13 = vadd.f32 1.0, %v5165_v12 }
0x5160   :  { %5166 = vrcp.f32 %v4143_v13 }
0x516a   :  { %v5167_v14 = vpop.eup %5166 }
0x516b   :  { %v4150_v18 = vmul.f32 %v5167_v14, %v4148_v2 }
0x51ce   :  { %v4153_v15 = vpop.permute.xlu1 %4152 }
0x51cf   :  { %v4155_v17 = vmul.f32 %v5167_v14, %v4153_v15 }
0x51d1   :  { %4157 = vrot.lane.b32.xlu0 %v4155_v17, %s6400_s25 }
0x51d5   :  { %3492 = vrot.lane.b32.xlu0 %v6258_v34, %s5411_s27 }
0x51d9   :  { %3944 = vrot.lane.b32.xlu0 %v3942_v48, %s5411_s27 }
0x5243   :  { %v4158_v21 = vpop.permute.xlu0 %4157 }
0x5244   :  { %v4160_v63 = vadd.f32 %v4158_v21, %v4150_v18 }
0x5246   :  { %5168 = vtanh.f32 %v4160_v63 }
0x5247   :  { %v3493_v22 = vpop.permute.xlu0 %3492 }
0x5248   :  { %3496 = vst.msk [vmem:[#allocation19 - $0x3] sm:$0x10] %vm3495_vm10, %v3493_v22 }
0x5249   :  { %3498 = vst.msk [vmem:[#allocation19 + $0x4] sm:$0x20] %vm3497_vm11, %v3493_v22 }
0x524a   :  { %3500 = vst.msk [vmem:[#allocation19 + $0xb] sm:$0x40] %vm3499_vm12, %v3493_v22 }
0x524b   :  { %3502 = vst.msk [vmem:[#allocation19 + $0x12] sm:$0x80] %vm3501_vm13, %v3493_v22  ;;  %v3945_v34 = vpop.permute.xlu0 %3944 }
0x524c   :  { %3947 = vst.msk [vmem:[#allocation19 + $0x1] sm:$0x10] %vm3495_vm10, %v3945_v34 }
0x524d   :  { %3948 = vst.msk [vmem:[#allocation19 + $0x8] sm:$0x20] %vm3497_vm11, %v3945_v34 }
0x524e   :  { %3949 = vst.msk [vmem:[#allocation19 + $0xf] sm:$0x40] %vm3499_vm12, %v3945_v34 }
0x524f   :  { %3950 = vst.msk [vmem:[#allocation19 + $0x16] sm:$0x80] %vm3501_vm13, %v3945_v34 }
0x5250   :  { %v5169_v5 = vpop.eup %5168 }
0x5251   :  { %4163 = vrot.lane.b32.xlu1 %v5169_v5, %s5410_s4 }
0x5255   :  { %3720 = vrot.lane.b32.xlu1 %v6285_v6, %s5411_s27 }
0x5256   :  { %5347 = shalt.err (!%p5344_p9)
}
0x5257   :  { %s5348_s24 = scalar_lea.hbm %s6393_s15, 512 }
0x5258   :  { %p5349_p10 = scmp.ne.s32.totalorder %s6393_s15, %s5348_s24  ;;  %p5352_p11 = scmp.lt.u32.totalorder %s5348_s24, %s6393_s15 }
0x525a   :  { %p5354_p12 = pnand %p5352_p11, %p5349_p10 }
0x525c   :  { %5357 = shalt.err (!%p5354_p12)
}
0x525d   :  { %s6401_s11 = smov 128   ;;  %s5413_s21 = smov [#allocation19]  }
0x525e   :  { %4198 = dma.vmem_to_hbm [thread:$0]  %s4193_s23, 512, %s6393_s15, [#allocation21], %s6401_s11, %s6401_s11, %s6400_s25  }
0x525f   :  { %s4180_s17 = sshll.u32 %s5413_s21, 4  ;;  %s4181_s17 = int_to_ptr.vmem [resolvable:$true] %s4180_s17 }
0x5260   :  { %s5358_s15 = scalar_lea.vmem %s4181_s17, 512  ;;  %p5363_p0 = scmp.lt.s32.totalorder %s4181_s17, %s4181_s17 }
0x5261   :  { %p5359_p13 = scmp.ne.s32.totalorder %s4181_s17, %s5358_s15  ;;  %p5364_p1 = scmp.lt.s32.totalorder %s5358_s15, %s5358_s15 }
0x5263   :  { %p5365_p2 = por %p5364_p1, %p5363_p0 }
0x5265   :  { %p5366_p3 = pnand %p5365_p2, %p5359_p13 }
0x52c3   :  { %v4164_v6 = vpop.permute.xlu1 %4163 }
0x52c4   :  { %v4166_v24 = vmul.f32 %v5167_v14, %v4164_v6 }
0x52c6   :  { %4168 = vrot.lane.b32.xlu1 %v4166_v24, %s5411_s27 }
0x52c7   :  { %v3721_v26 = vpop.permute.xlu1 %3720 }
0x52c8   :  { %3723 = vst.msk [vmem:[#allocation19 - $0x1] sm:$0x10] %vm3495_vm10, %v3721_v26 }
0x52c9   :  { %3724 = vst.msk [vmem:[#allocation19 + $0x6] sm:$0x20] %vm3497_vm11, %v3721_v26 }
0x52ca   :  { %3725 = vst.msk [vmem:[#allocation19 + $0xd] sm:$0x40] %vm3499_vm12, %v3721_v26 }
0x52cb   :  { %3726 = vst.msk [vmem:[#allocation19 + $0x14] sm:$0x80] %vm3501_vm13, %v3721_v26 }
0x5338   :  { %v4169_v32 = vpop.permute.xlu1 %4168 }
0x5339   :  { %4171 = vst.msk [vmem:[#allocation19 + $0x3] sm:$0x10] %vm3495_vm10, %v4169_v32 }
0x533a   :  { %4172 = vst.msk [vmem:[#allocation19 + $0xa] sm:$0x20] %vm3497_vm11, %v4169_v32 }
0x533b   :  { %4173 = vst.msk [vmem:[#allocation19 + $0x11] sm:$0x40] %vm3499_vm12, %v4169_v32 }
0x533c   :  { %4174 = vst.msk [vmem:[#allocation19 + $0x18] sm:$0x80] %vm3501_vm13, %v4169_v32 }
0x533d   :  { %5369 = shalt.err (!%p5366_p3)
}
0x533e   :  { %s6402_s14 = sld [smem:[#allocation29_spill]] }
0x5344   :  { %s5370_s26 = scalar_lea.hbm %s6402_s14, 512 }
0x5345   :  { %p5371_p4 = scmp.ne.s32.totalorder %s6402_s14, %s5370_s26  ;;  %p5374_p5 = scmp.lt.u32.totalorder %s5370_s26, %s6402_s14 }
0x5347   :  { %p5376_p6 = pnand %p5374_p5, %p5371_p4 }
0x5349   :  { %5379 = shalt.err (!%p5376_p6)
}
0x534a   :  { %4186 = dma.vmem_to_hbm [thread:$0]  %s4181_s17, 512, %s6402_s14, [#allocation7], %s6401_s11, %s6401_s11, %s6400_s25  }
0x534b   :  { %5390 = dma.done.wait [#allocation7], 512  }
0x534c   :  { %5391 = vsyncadd [#allocation7], 4294966784 }
0x534d   :  { %5392 = dma.done.wait [#allocation21], 512  }
0x534e   :  { %5393 = vsyncadd [#allocation21], 4294966784 }
0x534f   :  { %4205 = vsyncpa [#allocation6], 1 }
0x5350   :  { %4206 = vsyncpa [#allocation11], 1 }
0x5351   :  { %4207 = vsyncpa [#allocation14], 1 }
0x5352   :  { %4208 = vsyncpa [#allocation17], 1 }
0x5353   :  { %4209 = vsyncpa [#allocation7], 1 }
0x5354   :  { %4210 = vsyncpa [#allocation21], 1 }
0x5355   :  { %4211 = vsyncpa [#allocation8], 1 }

</bundles_post_ra>
